<compile_context>
chip_gen: v5e
topology: v5e:2x2
jax: 0.10.0
libtpu: 0.0.40
codegen_flags: <defaults>
</compile_context>

<pallas_src>
import functools
import math

import jax
import jax.numpy as jnp
from jax.experimental import pallas as pl
from jax.experimental.pallas import tpu as pltpu


def _attention_kernel(x_ref, qT_ref, w1_ref, b1_ref, w2_ref, b2_ref, out_ref,
                      *, hidden_chunk):
    # x_ref : (B, TS, In) f32      qT_ref: (Q, B)  f32
    # w1_ref: (H, In) bf16         b1_ref: (H, 1)  f32   (PyTorch (out, in) layout)
    # w2_ref: (Q, H)  bf16         b2_ref: (Q, 1)  f32   (1/sqrt(Q) pre-folded)
    # out_ref: (B, TS, In) f32
    B, TS, In = x_ref.shape
    Q = qT_ref.shape[0]
    H = w1_ref.shape[0]
    M = B * TS
    HC = hidden_chunk

    x = x_ref[...]                                    # (B, TS, In) f32
    x2d = x.reshape(M, In)                            # leading-dim merge (TS % 8 == 0)
    # One-time XLU transpose: put the long M axis on MXU lanes / output columns.
    xT_bf = jnp.transpose(x2d).astype(jnp.bfloat16)   # (In, M) bf16 MXU operand

    # Fused key_layer1 -> relu -> key_layer2, transposed and chunked over H: only
    # an (HC, M) slice of the relu activation is ever live; keysT is a lane-dense
    # (Q, M) f32 accumulator that fits comfortably in vregs.
    keysT = jnp.zeros((Q, M), jnp.float32)
    for c in range(H // HC):
        lo = c * HC
        w1_c = w1_ref[lo:lo + HC, :]                  # (HC, In) bf16, static sublane slice
        b1_c = b1_ref[lo:lo + HC, :]                  # (HC, 1)  f32
        h_c = jnp.dot(w1_c, xT_bf, preferred_element_type=jnp.float32)   # (HC, M)
        h_c = jnp.maximum(h_c + b1_c, 0.0)            # relu, f32
        w2_c = w2_ref[:, lo:lo + HC]                  # (Q, HC) bf16, static lane slice
        keysT = keysT + jnp.dot(w2_c, h_c.astype(jnp.bfloat16),
                                preferred_element_type=jnp.float32)      # (Q, M)
    keysT = keysT + b2_ref[...]                       # (Q, 1) broadcast over M lanes

    # scores / legacy dim-0 softmax / sum-over-Q, all lane-dense (TS on lanes).
    # The batch axis is a short static loop: B is never tiled, so the dim-0
    # normalization over the full batch is exact within every S block.
    qT = qT_ref[...]                                  # (Q, B)
    scores = [qT[:, b:b + 1] * keysT[:, b * TS:(b + 1) * TS] for b in range(B)]
    m = scores[0]
    for b in range(1, B):
        m = jnp.maximum(m, scores[b])
    exps = [jnp.exp(s - m) for s in scores]           # (Q, TS) each, EUP, lane-dense
    denom = exps[0]
    for b in range(1, B):
        denom = denom + exps[b]
    inv = pl.reciprocal(denom, approx=True)           # divide -> EUP reciprocal

    # weights[b, s] = sum_q softmax[b, s, q]; rows live on lanes, so one tiny
    # (B, TS) transpose reorients them to sublanes for the broadcast against x.
    w_rows = [jnp.sum(exps[b] * inv, axis=0, keepdims=True) for b in range(B)]  # (1, TS)
    w_lane = jnp.concatenate(w_rows, axis=0)          # (B, TS), TS on lanes
    wT = jnp.transpose(w_lane)                        # (TS, B), TS on sublanes
    for b in range(B):
        # TODO(synk): on v5e, In < 128 makes these masked (lane-sparse) stores; a
        # flattened (B, TS*In) output layout would fix it but costs a relayout.
        out_ref[b] = wT[:, b:b + 1] * x[b]            # (TS, 1) * (TS, In) -> (TS, In)


def _pick_block_s(S, B):
    """Largest multiple-of-8 divisor of S keeping roughly <=1024 rows per step,
    preferring an even number of grid steps (v7x has 2 TensorCores), then >=2."""
    cap = max(8, 1024 // max(B, 1))
    divisors = [d for d in range(8, min(S, cap) + 1, 8) if S % d == 0]
    if not divisors:
        return S
    even = [d for d in divisors if (S // d) % 2 == 0]
    if even:
        return max(even)
    multi = [d for d in divisors if (S // d) >= 2]
    if multi:
        return max(multi)
    return max(divisors)


def attention_forward(x, query, w1, b1, w2, b2, *, block_s=None, hidden_chunk=512):
    """Fused Attention forward.

    Weights use the PyTorch-native nn.Linear (out_features, in_features) layout:
      w1: (2048, In)  b1: (2048,)      -- key_layer1
      w2: (Q, 2048)   b2: (Q,)         -- key_layer2
    """
    B, S, In = x.shape
    H = w1.shape[0]
    Q = w2.shape[0]
    assert w1.shape == (H, In) and w2.shape == (Q, H)
    assert b1.shape == (H,) and b2.shape == (Q,)
    assert (B * S) % (4 * 10) == 0, "final view(-1, In*4*10) is invalid"

    if block_s is None:
        block_s = _pick_block_s(S, B)
    # block_s % 8 keeps the in-kernel (B,TS,In)<->(B*TS,In) merges relayout-free.
    assert S % block_s == 0 and (block_s % 8 == 0 or block_s == S)
    hidden_chunk = max(1, min(hidden_chunk, H))
    if H % hidden_chunk != 0:
        hidden_chunk = math.gcd(H, hidden_chunk)
    grid = (S // block_s,)

    # Exact f32 fold of the 1/sqrt(Q) score scale into key_layer2 (before the bf16
    # cast); bf16 MXU operands halve the resident weights' HBM->VMEM DMA.
    scale = 1.0 / math.sqrt(Q)
    w1_bf = w1.astype(jnp.bfloat16)                             # (H, In)
    w2_bf = (w2.astype(jnp.float32) * scale).astype(jnp.bfloat16)   # (Q, H)
    b1_col = b1.reshape(H, 1).astype(jnp.float32)               # (H, 1)
    b2_col = (b2.astype(jnp.float32) * scale).reshape(Q, 1)     # (Q, 1)
    q_t = jnp.transpose(query).astype(jnp.float32)              # (Q, B), tiny

    kernel = functools.partial(_attention_kernel, hidden_chunk=hidden_chunk)

    flops = 2 * B * S * H * (In + Q)
    bytes_accessed = (2 * x.size * 4 + query.size * 4 + w1_bf.size * 2 +
                      w2_bf.size * 2 + (H + Q) * 4)

    out = pl.pallas_call(
        kernel,
        out_shape=jax.ShapeDtypeStruct((B, S, In), jnp.float32),
        grid_spec=pltpu.PrefetchScalarGridSpec(
            num_scalar_prefetch=0,
            grid=grid,
            in_specs=[
                pl.BlockSpec((B, block_s, In), lambda i: (0, i, 0)),   # x tile
                pl.BlockSpec((Q, B), lambda i: (0, 0)),                # query^T (resident)
                pl.BlockSpec((H, In), lambda i: (0, 0)),               # W1 (resident)
                pl.BlockSpec((H, 1), lambda i: (0, 0)),                # b1 column
                pl.BlockSpec((Q, H), lambda i: (0, 0)),                # W2*scale (resident)
                pl.BlockSpec((Q, 1), lambda i: (0, 0)),                # b2*scale column
            ],
            out_specs=pl.BlockSpec((B, block_s, In), lambda i: (0, i, 0)),
        ),
        compiler_params=pltpu.CompilerParams(
            dimension_semantics=("parallel",),
            vmem_limit_bytes=40 * 1024 * 1024,    # safe on v5e/v6e (128 MiB) and v7x (64 MiB)
        ),
        cost_estimate=pl.CostEstimate(
            flops=flops,
            transcendentals=B * S * Q,
            bytes_accessed=bytes_accessed,
        ),
    )(x, q_t, w1_bf, b1_col, w2_bf, b2_col)

    # Final .view(-1, In*4*10) done at the HBM boundary (free reshape).
    return out.reshape(-1, In * 4 * 10)


def _reference_forward(x, query, w1, b1, w2, b2, *, mxu_bf16=True):
    """Pure-JAX reference mirroring the PyTorch forward (optionally bf16 MXU inputs)."""
    Q = w2.shape[0]
    if mxu_bf16:
        h = jnp.dot(x.astype(jnp.bfloat16), w1.T.astype(jnp.bfloat16),
                    preferred_element_type=jnp.float32)
    else:
        h = jnp.dot(x, w1.T, preferred_element_type=jnp.float32)
    h = jnp.maximum(h + b1, 0.0)
    if mxu_bf16:
        keys = jnp.dot(h.astype(jnp.bfloat16), w2.T.astype(jnp.bfloat16),
                       preferred_element_type=jnp.float32)
    else:
        keys = jnp.dot(h, w2.T, preferred_element_type=jnp.float32)
    keys = keys + b2
    scores = query[:, None, :] * keys / math.sqrt(Q)
    soft = jax.nn.softmax(scores, axis=0)             # legacy dim=0 for a 3-D input
    weights = jnp.sum(soft, axis=2)
    out = weights[:, :, None] * x
    return out.reshape(-1, x.shape[2] * 4 * 10)


if __name__ == "__main__":
    # Small, shape-consistent example: S = 40 = 4 * 10 so view(-1, In*4*10) is valid.
    B, S = 2, 40
    input_size = 32
    query_size = 16
    hidden = 2048           # fixed by the module definition

    key = jax.random.PRNGKey(0)
    kx, kq, kw1, kb1, kw2, kb2 = jax.random.split(key, 6)

    x = jax.random.normal(kx, (B, S, input_size), dtype=jnp.float32)
    query = jax.random.normal(kq, (B, query_size), dtype=jnp.float32)

    # nn.Linear-style init (uniform +/- 1/sqrt(fan_in)); native (out, in) layout.
    lim1 = 1.0 / math.sqrt(input_size)
    w1 = jax.random.uniform(kw1, (hidden, input_size), jnp.float32, -lim1, lim1)
    b1 = jax.random.uniform(kb1, (hidden,), jnp.float32, -lim1, lim1)
    lim2 = 1.0 / math.sqrt(hidden)
    w2 = jax.random.uniform(kw2, (query_size, hidden), jnp.float32, -lim2, lim2)
    b2 = jax.random.uniform(kb2, (query_size,), jnp.float32, -lim2, lim2)

    # block_s=8 -> a 5-step "parallel" grid over S, exercising the pipelined path.
    out = attention_forward(x, query, w1, b1, w2, b2, block_s=8)
    out = jax.block_until_ready(out)

    assert out.shape == (B * S // 40, input_size * 40)

    # Matched-precision reference (same bf16 MXU operands, f32 accumulation).
    ref_bf16 = _reference_forward(x, query, w1, b1, w2, b2, mxu_bf16=True)
    assert jnp.allclose(out, ref_bf16, atol=2e-2, rtol=2e-2), "mismatch vs bf16-matched reference"

    # Loose sanity check against the full-f32 reference.
    ref_f32 = _reference_forward(x, query, w1, b1, w2, b2, mxu_bf16=False)
    assert jnp.allclose(out, ref_f32, atol=1e-1, rtol=1e-1), "mismatch vs f32 reference"

    print("KERNEL_OK")
</pallas_src>

<mosaic_0001>
module attributes {stable_mosaic.version = 11 : i64} {
  func.func @_attention_kernel(%arg0: i32, %arg1: memref<2x8x32xf32, #tpu.memory_space<vmem>>, %arg2: memref<16x2xf32, #tpu.memory_space<vmem>>, %arg3: memref<2048x32xbf16, #tpu.memory_space<vmem>>, %arg4: memref<2048x1xf32, #tpu.memory_space<vmem>>, %arg5: memref<16x2048xbf16, #tpu.memory_space<vmem>>, %arg6: memref<16x1xf32, #tpu.memory_space<vmem>>, %arg7: memref<2x8x32xf32, #tpu.memory_space<vmem>>) attributes {dimension_semantics = [#tpu.dimension_semantics<parallel>], iteration_bounds = array<i64: 5>, scalar_prefetch = 0 : i64, scratch_operands = 0 : i64, tpu.core_type = #tpu.core_type<tc>, window_params = [{transform_indices = @transform_0, window_bounds = array<i64: 2, 8, 32>}, {pipeline_mode = #tpu.pipeline_mode<synchronous>, transform_indices = @transform_1, window_bounds = array<i64: 16, 2>}, {pipeline_mode = #tpu.pipeline_mode<synchronous>, transform_indices = @transform_2, window_bounds = array<i64: 2048, 32>}, {pipeline_mode = #tpu.pipeline_mode<synchronous>, transform_indices = @transform_3, window_bounds = array<i64: 2048, 1>}, {pipeline_mode = #tpu.pipeline_mode<synchronous>, transform_indices = @transform_4, window_bounds = array<i64: 16, 2048>}, {pipeline_mode = #tpu.pipeline_mode<synchronous>, transform_indices = @transform_5, window_bounds = array<i64: 16, 1>}, {transform_indices = @transform_6, window_bounds = array<i64: 2, 8, 32>}]} {
    %c0 = arith.constant 0 : index
    %c0_0 = arith.constant 0 : index
    %c0_1 = arith.constant 0 : index
    %0 = vector.load %arg1[%c0, %c0_0, %c0_1] : memref<2x8x32xf32, #tpu.memory_space<vmem>>, vector<2x8x32xf32>
    %1 = vector.shape_cast %0 : vector<2x8x32xf32> to vector<16x32xf32>
    %2 = tpu.transpose %1, [1, 0] : vector<16x32xf32> -> vector<32x16xf32>
    %3 = arith.truncf %2 : vector<32x16xf32> to vector<32x16xbf16>
    %cst = arith.constant 0.000000e+00 : f32
    %4 = vector.broadcast %cst : f32 to vector<16x16xf32>
    %c0_2 = arith.constant 0 : index
    %c0_3 = arith.constant 0 : index
    %5 = vector.load %arg3[%c0_2, %c0_3] : memref<2048x32xbf16, #tpu.memory_space<vmem>>, vector<512x32xbf16>
    %c0_4 = arith.constant 0 : index
    %c0_5 = arith.constant 0 : index
    %6 = vector.load %arg4[%c0_4, %c0_5] : memref<2048x1xf32, #tpu.memory_space<vmem>>, vector<512x1xf32>
    %cst_6 = arith.constant dense<0.000000e+00> : vector<512x16xf32>
    %7 = tpu.matmul %5, %3, %cst_6 {dimension_numbers = #tpu.dot_dimension_numbers<[1], [0], [0], [1], [0, 0, 1, 1], [], []>} : vector<512x32xbf16>, vector<32x16xbf16>, vector<512x16xf32> -> vector<512x16xf32>
    %8 = vector.broadcast %6 : vector<512x1xf32> to vector<512x16xf32>
    %9 = arith.addf %7, %8 : vector<512x16xf32>
    %cst_7 = arith.constant 0.000000e+00 : f32
    %10 = vector.broadcast %cst_7 : f32 to vector<512x16xf32>
    %11 = arith.maximumf %9, %10 : vector<512x16xf32>
    %c0_8 = arith.constant 0 : index
    %c0_9 = arith.constant 0 : index
    %12 = vector.load %arg5[%c0_8, %c0_9] : memref<16x2048xbf16, #tpu.memory_space<vmem>>, vector<16x512xbf16>
    %13 = arith.truncf %11 : vector<512x16xf32> to vector<512x16xbf16>
    %cst_10 = arith.constant dense<0.000000e+00> : vector<16x16xf32>
    %14 = tpu.matmul %12, %13, %cst_10 {dimension_numbers = #tpu.dot_dimension_numbers<[1], [0], [0], [1], [0, 0, 1, 1], [], []>} : vector<16x512xbf16>, vector<512x16xbf16>, vector<16x16xf32> -> vector<16x16xf32>
    %15 = arith.addf %4, %14 : vector<16x16xf32>
    %c512 = arith.constant 512 : index
    %c0_11 = arith.constant 0 : index
    %16 = vector.load %arg3[%c512, %c0_11] : memref<2048x32xbf16, #tpu.memory_space<vmem>>, vector<512x32xbf16>
    %c512_12 = arith.constant 512 : index
    %c0_13 = arith.constant 0 : index
    %17 = vector.load %arg4[%c512_12, %c0_13] : memref<2048x1xf32, #tpu.memory_space<vmem>>, vector<512x1xf32>
    %cst_14 = arith.constant dense<0.000000e+00> : vector<512x16xf32>
    %18 = tpu.matmul %16, %3, %cst_14 {dimension_numbers = #tpu.dot_dimension_numbers<[1], [0], [0], [1], [0, 0, 1, 1], [], []>} : vector<512x32xbf16>, vector<32x16xbf16>, vector<512x16xf32> -> vector<512x16xf32>
    %19 = vector.broadcast %17 : vector<512x1xf32> to vector<512x16xf32>
    %20 = arith.addf %18, %19 : vector<512x16xf32>
    %cst_15 = arith.constant 0.000000e+00 : f32
    %21 = vector.broadcast %cst_15 : f32 to vector<512x16xf32>
    %22 = arith.maximumf %20, %21 : vector<512x16xf32>
    %c0_16 = arith.constant 0 : index
    %c512_17 = arith.constant 512 : index
    %23 = vector.load %arg5[%c0_16, %c512_17] : memref<16x2048xbf16, #tpu.memory_space<vmem>>, vector<16x512xbf16>
    %24 = arith.truncf %22 : vector<512x16xf32> to vector<512x16xbf16>
    %cst_18 = arith.constant dense<0.000000e+00> : vector<16x16xf32>
    %25 = tpu.matmul %23, %24, %cst_18 {dimension_numbers = #tpu.dot_dimension_numbers<[1], [0], [0], [1], [0, 0, 1, 1], [], []>} : vector<16x512xbf16>, vector<512x16xbf16>, vector<16x16xf32> -> vector<16x16xf32>
    %26 = arith.addf %15, %25 : vector<16x16xf32>
    %c1024 = arith.constant 1024 : index
    %c0_19 = arith.constant 0 : index
    %27 = vector.load %arg3[%c1024, %c0_19] : memref<2048x32xbf16, #tpu.memory_space<vmem>>, vector<512x32xbf16>
    %c1024_20 = arith.constant 1024 : index
    %c0_21 = arith.constant 0 : index
    %28 = vector.load %arg4[%c1024_20, %c0_21] : memref<2048x1xf32, #tpu.memory_space<vmem>>, vector<512x1xf32>
    %cst_22 = arith.constant dense<0.000000e+00> : vector<512x16xf32>
    %29 = tpu.matmul %27, %3, %cst_22 {dimension_numbers = #tpu.dot_dimension_numbers<[1], [0], [0], [1], [0, 0, 1, 1], [], []>} : vector<512x32xbf16>, vector<32x16xbf16>, vector<512x16xf32> -> vector<512x16xf32>
    %30 = vector.broadcast %28 : vector<512x1xf32> to vector<512x16xf32>
    %31 = arith.addf %29, %30 : vector<512x16xf32>
    %cst_23 = arith.constant 0.000000e+00 : f32
    %32 = vector.broadcast %cst_23 : f32 to vector<512x16xf32>
    %33 = arith.maximumf %31, %32 : vector<512x16xf32>
    %c0_24 = arith.constant 0 : index
    %c1024_25 = arith.constant 1024 : index
    %34 = vector.load %arg5[%c0_24, %c1024_25] : memref<16x2048xbf16, #tpu.memory_space<vmem>>, vector<16x512xbf16>
    %35 = arith.truncf %33 : vector<512x16xf32> to vector<512x16xbf16>
    %cst_26 = arith.constant dense<0.000000e+00> : vector<16x16xf32>
    %36 = tpu.matmul %34, %35, %cst_26 {dimension_numbers = #tpu.dot_dimension_numbers<[1], [0], [0], [1], [0, 0, 1, 1], [], []>} : vector<16x512xbf16>, vector<512x16xbf16>, vector<16x16xf32> -> vector<16x16xf32>
    %37 = arith.addf %26, %36 : vector<16x16xf32>
    %c1536 = arith.constant 1536 : index
    %c0_27 = arith.constant 0 : index
    %38 = vector.load %arg3[%c1536, %c0_27] : memref<2048x32xbf16, #tpu.memory_space<vmem>>, vector<512x32xbf16>
    %c1536_28 = arith.constant 1536 : index
    %c0_29 = arith.constant 0 : index
    %39 = vector.load %arg4[%c1536_28, %c0_29] : memref<2048x1xf32, #tpu.memory_space<vmem>>, vector<512x1xf32>
    %cst_30 = arith.constant dense<0.000000e+00> : vector<512x16xf32>
    %40 = tpu.matmul %38, %3, %cst_30 {dimension_numbers = #tpu.dot_dimension_numbers<[1], [0], [0], [1], [0, 0, 1, 1], [], []>} : vector<512x32xbf16>, vector<32x16xbf16>, vector<512x16xf32> -> vector<512x16xf32>
    %41 = vector.broadcast %39 : vector<512x1xf32> to vector<512x16xf32>
    %42 = arith.addf %40, %41 : vector<512x16xf32>
    %cst_31 = arith.constant 0.000000e+00 : f32
    %43 = vector.broadcast %cst_31 : f32 to vector<512x16xf32>
    %44 = arith.maximumf %42, %43 : vector<512x16xf32>
    %c0_32 = arith.constant 0 : index
    %c1536_33 = arith.constant 1536 : index
    %45 = vector.load %arg5[%c0_32, %c1536_33] : memref<16x2048xbf16, #tpu.memory_space<vmem>>, vector<16x512xbf16>
    %46 = arith.truncf %44 : vector<512x16xf32> to vector<512x16xbf16>
    %cst_34 = arith.constant dense<0.000000e+00> : vector<16x16xf32>
    %47 = tpu.matmul %45, %46, %cst_34 {dimension_numbers = #tpu.dot_dimension_numbers<[1], [0], [0], [1], [0, 0, 1, 1], [], []>} : vector<16x512xbf16>, vector<512x16xbf16>, vector<16x16xf32> -> vector<16x16xf32>
    %48 = arith.addf %37, %47 : vector<16x16xf32>
    %c0_35 = arith.constant 0 : index
    %c0_36 = arith.constant 0 : index
    %49 = vector.load %arg6[%c0_35, %c0_36] : memref<16x1xf32, #tpu.memory_space<vmem>>, vector<16x1xf32>
    %50 = vector.broadcast %49 : vector<16x1xf32> to vector<16x16xf32>
    %51 = arith.addf %48, %50 : vector<16x16xf32>
    %c0_37 = arith.constant 0 : index
    %c0_38 = arith.constant 0 : index
    %52 = vector.load %arg2[%c0_37, %c0_38] : memref<16x2xf32, #tpu.memory_space<vmem>>, vector<16x2xf32>
    %53 = vector.extract_strided_slice %52 {offsets = [0, 0], sizes = [16, 1], strides = [1, 1]} : vector<16x2xf32> to vector<16x1xf32>
    %54 = vector.extract_strided_slice %51 {offsets = [0, 0], sizes = [16, 8], strides = [1, 1]} : vector<16x16xf32> to vector<16x8xf32>
    %55 = vector.broadcast %53 : vector<16x1xf32> to vector<16x8xf32>
    %56 = arith.mulf %55, %54 : vector<16x8xf32>
    %57 = vector.extract_strided_slice %52 {offsets = [0, 1], sizes = [16, 1], strides = [1, 1]} : vector<16x2xf32> to vector<16x1xf32>
    %58 = vector.extract_strided_slice %51 {offsets = [0, 8], sizes = [16, 8], strides = [1, 1]} : vector<16x16xf32> to vector<16x8xf32>
    %59 = vector.broadcast %57 : vector<16x1xf32> to vector<16x8xf32>
    %60 = arith.mulf %59, %58 : vector<16x8xf32>
    %61 = arith.maximumf %56, %60 : vector<16x8xf32>
    %62 = arith.subf %56, %61 : vector<16x8xf32>
    %63 = math.exp %62 : vector<16x8xf32>
    %64 = arith.subf %60, %61 : vector<16x8xf32>
    %65 = math.exp %64 : vector<16x8xf32>
    %66 = arith.addf %63, %65 : vector<16x8xf32>
    %67 = tpu.reciprocal %66 {approx = true} : vector<16x8xf32> -> vector<16x8xf32>
    %68 = arith.mulf %63, %67 : vector<16x8xf32>
    %cst_39 = arith.constant dense<0.000000e+00> : vector<8xf32>
    %69 = vector.multi_reduction <add>, %68, %cst_39 [0] : vector<16x8xf32> to vector<8xf32>
    %70 = vector.shape_cast %69 : vector<8xf32> to vector<1x8xf32>
    %71 = arith.mulf %65, %67 : vector<16x8xf32>
    %cst_40 = arith.constant dense<0.000000e+00> : vector<8xf32>
    %72 = vector.multi_reduction <add>, %71, %cst_40 [0] : vector<16x8xf32> to vector<8xf32>
    %73 = vector.shape_cast %72 : vector<8xf32> to vector<1x8xf32>
    %74 = tpu.concatenate %70, %73 in 0 : vector<1x8xf32>, vector<1x8xf32> -> vector<2x8xf32>
    %75 = tpu.transpose %74, [1, 0] : vector<2x8xf32> -> vector<8x2xf32>
    %76 = vector.extract_strided_slice %75 {offsets = [0, 0], sizes = [8, 1], strides = [1, 1]} : vector<8x2xf32> to vector<8x1xf32>
    %77 = vector.extract_strided_slice %0 {offsets = [0, 0, 0], sizes = [1, 8, 32], strides = [1, 1, 1]} : vector<2x8x32xf32> to vector<1x8x32xf32>
    %78 = vector.shape_cast %77 : vector<1x8x32xf32> to vector<8x32xf32>
    %79 = vector.broadcast %76 : vector<8x1xf32> to vector<8x32xf32>
    %80 = arith.mulf %79, %78 : vector<8x32xf32>
    %c0_41 = arith.constant 0 : index
    %c0_42 = arith.constant 0 : index
    %c0_43 = arith.constant 0 : index
    %81 = vector.load %arg7[%c0_41, %c0_42, %c0_43] : memref<2x8x32xf32, #tpu.memory_space<vmem>>, vector<1x8x32xf32>
    %82 = vector.shape_cast %81 : vector<1x8x32xf32> to vector<8x32xf32>
    %83 = vector.shape_cast %80 : vector<8x32xf32> to vector<1x8x32xf32>
    tpu.vector_store %arg7[%c0_41, %c0_42, %c0_43], %83 {strides = array<i32>} : memref<2x8x32xf32, #tpu.memory_space<vmem>>, vector<1x8x32xf32>,
    %84 = vector.extract_strided_slice %75 {offsets = [0, 1], sizes = [8, 1], strides = [1, 1]} : vector<8x2xf32> to vector<8x1xf32>
    %85 = vector.extract_strided_slice %0 {offsets = [1, 0, 0], sizes = [1, 8, 32], strides = [1, 1, 1]} : vector<2x8x32xf32> to vector<1x8x32xf32>
    %86 = vector.shape_cast %85 : vector<1x8x32xf32> to vector<8x32xf32>
    %87 = vector.broadcast %84 : vector<8x1xf32> to vector<8x32xf32>
    %88 = arith.mulf %87, %86 : vector<8x32xf32>
    %c1 = arith.constant 1 : index
    %c0_44 = arith.constant 0 : index
    %c0_45 = arith.constant 0 : index
    %89 = vector.load %arg7[%c1, %c0_44, %c0_45] : memref<2x8x32xf32, #tpu.memory_space<vmem>>, vector<1x8x32xf32>
    %90 = vector.shape_cast %89 : vector<1x8x32xf32> to vector<8x32xf32>
    %91 = vector.shape_cast %88 : vector<8x32xf32> to vector<1x8x32xf32>
    tpu.vector_store %arg7[%c1, %c0_44, %c0_45], %91 {strides = array<i32>} : memref<2x8x32xf32, #tpu.memory_space<vmem>>, vector<1x8x32xf32>,
    return
  }
  func.func @transform_0(%arg0: i32) -> (i32, i32, i32) {
    %c0_i32 = arith.constant 0 : i32
    %c0_i32_0 = arith.constant 0 : i32
    %c0_i32_1 = arith.constant 0 : i32
    return %c0_i32, %arg0, %c0_i32_0 : i32, i32, i32
  }
  func.func @transform_1(%arg0: i32) -> (i32, i32) {
    %c0_i32 = arith.constant 0 : i32
    %c0_i32_0 = arith.constant 0 : i32
    %c0_i32_1 = arith.constant 0 : i32
    return %c0_i32, %c0_i32_0 : i32, i32
  }
  func.func @transform_2(%arg0: i32) -> (i32, i32) {
    %c0_i32 = arith.constant 0 : i32
    %c0_i32_0 = arith.constant 0 : i32
    %c0_i32_1 = arith.constant 0 : i32
    return %c0_i32, %c0_i32_0 : i32, i32
  }
  func.func @transform_3(%arg0: i32) -> (i32, i32) {
    %c0_i32 = arith.constant 0 : i32
    %c0_i32_0 = arith.constant 0 : i32
    %c0_i32_1 = arith.constant 0 : i32
    return %c0_i32, %c0_i32_0 : i32, i32
  }
  func.func @transform_4(%arg0: i32) -> (i32, i32) {
    %c0_i32 = arith.constant 0 : i32
    %c0_i32_0 = arith.constant 0 : i32
    %c0_i32_1 = arith.constant 0 : i32
    return %c0_i32, %c0_i32_0 : i32, i32
  }
  func.func @transform_5(%arg0: i32) -> (i32, i32) {
    %c0_i32 = arith.constant 0 : i32
    %c0_i32_0 = arith.constant 0 : i32
    %c0_i32_1 = arith.constant 0 : i32
    return %c0_i32, %c0_i32_0 : i32, i32
  }
  func.func @transform_6(%arg0: i32) -> (i32, i32, i32) {
    %c0_i32 = arith.constant 0 : i32
    %c0_i32_0 = arith.constant 0 : i32
    %c0_i32_1 = arith.constant 0 : i32
    return %c0_i32, %arg0, %c0_i32_0 : i32, i32, i32
  }
}

</mosaic_0001>

<bundles_post_ra>
// kernel: tpu_custom_call.1
= control target key start
LH: loop header
LB: loop body
LE: loop exit
PB: predicated region body
PF: predicated region fallthrough
CT: control target
= control target key end

     0   :  { %s5768_s21 = smov 0   ;;  %s5770_s22 = smov 0   ;;  %s8361_s0 = inlined_call_operand.vmem [shape: f32[2,40,32], index: 0, kind: input, shape index: {}]   ;;  %s8362_s1 = inlined_call_operand.vmem [shape: f32[16,2], index: 1, kind: input, shape index: {}]   ;;  %s8363_s2 = inlined_call_operand.vmem [shape: bf16[2048,32], index: 2, kind: input, shape index: {}]   ;;  %s8364_s3 = inlined_call_operand.vmem [shape: f32[2048,1], index: 3, kind: input, shape index: {}]   ;;  %s8365_s4 = inlined_call_operand.vmem [shape: bf16[16,2048], index: 4, kind: input, shape index: {}]   ;;  %s8366_s5 = inlined_call_operand.vmem [shape: f32[16,1], index: 5, kind: input, shape index: {}]   ;;  %s8367_s6 = inlined_call_operand.vmem [shape: f32[2,40,32], index: 6, kind: output, shape index: {}]  }
   0x1   :  { %s5772_s23 = smov 0  }
   0x2 LB: > { %s4789_s24 = sadd.s32 4294967295, %s5727_s23   ;;  %s5785_s25 = sadd.s32 1, %s5727_s23   ;;  %s5727_s23 = sphi %s5772_s23, %s8727_s23   ;;  %s5723_s22 = sphi %s5770_s22, %s8726_s22   ;;  %s5719_s21 = sphi %s5768_s21, %s8725_s21  }
   0x3   : > { %s20_s26 = ssub.s32 %s5727_s23, %s5785_s25  ;;  %s23_s27 = sadd.s32 1, %s5723_s22 }
   0x4   : > { %p21_p0 = scmp.eq.s32.totalorder %s20_s26, 0  ;;  %p30_p1 = scmp.ne.s32.totalorder %s5723_s22, %s5719_s21 }
   0x5   : > { %p31_p2 = scmp.eq.s32.totalorder %s5727_s23, 0  ;;  %p165_p3 = scmp.eq.s32.totalorder %s4789_s24, 4 }
   0x6   : > { %s5796_s28 = scalar_select %p21_p0, %s5723_s22, %s23_s27  }
   0x7   : > { %p32_p4 = por %p31_p2, %p30_p1  ;;  %p5798_p5 = por %p165_p3, %p30_p1 }
   0x8   : > { %p4792_p6 = scmp.ge.s32.totalorder %s5727_s23, 5 }
   0xa   : > { %202 = sbr.rel (%p4792_p6) target bundleno = 21 (0x15), region = 36 }
   0xf   : > { %205 = sbr.rel (!%p32_p4) target bundleno = 21 (0x15), region = 40  ;;  %s207_s30 = sand.u32 (%p32_p4), 1, %s5723_s22  }
  0x10   : > { %s4794_s7 = sshll.u32 (%p32_p4), %s5727_s23, 3  ;;  %s4793_s8 = sshll.u32 (%p32_p4), %s207_s30, 4 }
  0x11   : > { %s211_s11 = scalar_lea.vmem (%p32_p4), %s8361_s0, %s4794_s7  ;;  %s209_s12 = scalar_lea.vmem (%p32_p4), [#allocation2], %s4793_s8 }
  0x12   : > { %v242_v0 = vld [vmem:[%s211_s11] sm:$0xff] (%p32_p4)  ;;  %v244_v1 = vld [vmem:[%s211_s11 + $0x28] sm:$0xff] (%p32_p4) }
  0x13   : > { %243 = vst [vmem:[%s209_s12] sm:$0xff] (%p32_p4), %v242_v0 }
  0x14   : > { %245 = vst [vmem:[%s209_s12 + $0x8] sm:$0xff] %v244_v1 }
  0x15 PF: > { %p4795_p7 = scmp.ge.s32.totalorder %s5727_s23, 1  ;;  %p250_p8 = scmp.lt.s32.totalorder %s5727_s23, 6 }
  0x17   : > { %p251_p9 = pnand %p4795_p7, %p250_p8 }
  0x19   : > { %254 = sbr.rel (%p251_p9) target bundleno = 3152 (0xc50), region = 78 }
  0x1e   : > { %v1404_v2 = vld [vmem:[%s8364_s3 + $0x360] sm:$0xff]  ;;  %v1406_v3 = vld [vmem:[%s8364_s3 + $0x370] sm:$0xff]  ;;  %s257_s17 = sand.u32 1, %s5719_s21   ;;  %v8368_v4 = vmov 0   ;;  %v1405_v6 = vld [vmem:[%s8364_s3 + $0x368] sm:$0xff]  ;;  %vm930_vm0 = vcmask 261120  }
  0x1f   : > { %5685 = vset.pattern.permute.xlu2 %v8368_v4  ;;  %5684 = vset.pattern.permute.xlu1 %v8368_v4  ;;  %s5819_s18 = sshll.u32 %s257_s17, 4  ;;  %v1407_v7 = vld [vmem:[%s8364_s3 + $0x378] sm:$0xff]  ;;  %v1400_v9 = vld [vmem:[%s8364_s3 + $0x340] sm:$0xff]  ;;  %v1401_v11 = vld [vmem:[%s8364_s3 + $0x348] sm:$0xff]  ;;  %s5731_s8 = smov 120   ;;  %vm4605_vm1 = vcmask 64512  }
  0x20   : > { %1646 = vperm.xlu2 %5685, %v1404_v2   ;;  %1656 = vperm.xlu1 %5684, %v1406_v3   ;;  %s5822_s19 = scalar_lea.vmem [#allocation2], %s5819_s18  ;;  %v1403_v10 = vld [vmem:[%s8364_s3 + $0x358] sm:$0xff]  ;;  %v400_v12 = vld [vmem:[%s8364_s3 + $0x70] sm:$0xff]  ;;  %v398_v16 = vld [vmem:[%s8364_s3 + $0x60] sm:$0xff]  ;;  %s5732_s9 = smov 8   ;;  %vm4625_vm2 = vcmask 130112  }
  0x21   : > { %v286_v5 = vld [vmem:[%s5822_s19] sm:$0xff]  ;;  %v287_v8 = vld [vmem:[%s5822_s19 + $0x8] sm:$0xff]  ;;  %vm4639_vm3 = vcmask 1040384   ;;  %s284_s10 = scalar_lea.vmem [#allocation3], %s5819_s18  ;;  %s5504_s11 = sshll.u32 (%p5798_p5), %s4789_s24, 3 }
  0x22   : > { %288 = vxpose.xlu0.b32.start [1/2] (short) (narrow) %v286_v5, 32  ;;  %v401_v13 = vld [vmem:[%s8364_s3 + $0x78] sm:$0xff]  ;;  %v1398_v14 = vld [vmem:[%s8364_s3 + $0x330] sm:$0xff]  ;;  %v399_v17 = vld [vmem:[%s8364_s3 + $0x68] sm:$0xff]  ;;  %s4695_s14 = scalar_lea.vmem (%p5798_p5), %s8367_s6, %s5504_s11 }
  0x23   : > { %v1399_v15 = vld [vmem:[%s8364_s3 + $0x338] sm:$0xff]  ;;  %v1396_v18 = vld [vmem:[%s8364_s3 + $0x320] sm:$0xff]  ;;  %v1397_v19 = vld [vmem:[%s8364_s3 + $0x328] sm:$0xff] }
  0x24   : > { %v396_v20 = vld [vmem:[%s8364_s3 + $0x50] sm:$0xff]  ;;  %v397_v21 = vld [vmem:[%s8364_s3 + $0x58] sm:$0xff]  ;;  %v394_v24 = vld [vmem:[%s8364_s3 + $0x40] sm:$0xff] }
  0x25   : > { %v1394_v22 = vld [vmem:[%s8364_s3 + $0x310] sm:$0xff]  ;;  %v1395_v23 = vld [vmem:[%s8364_s3 + $0x318] sm:$0xff]  ;;  %v395_v25 = vld [vmem:[%s8364_s3 + $0x48] sm:$0xff] }
  0x26   : > { %v1392_v26 = vld [vmem:[%s8364_s3 + $0x300] sm:$0xff]  ;;  %v1393_v27 = vld [vmem:[%s8364_s3 + $0x308] sm:$0xff]  ;;  %v392_v28 = vld [vmem:[%s8364_s3 + $0x30] sm:$0xff] }
  0x27   : > { %v393_v30 = vld [vmem:[%s8364_s3 + $0x38] sm:$0xff]  ;;  %v432_v31 = vld [vmem:[%s8364_s3 + $0x170] sm:$0xff]  ;;  %v390_v34 = vld [vmem:[%s8364_s3 + $0x20] sm:$0xff] }
  0x28   : > { %1651 = vperm.xlu2 %5685, %v1405_v6   ;;  %1661 = vperm.xlu1 %5684, %v1407_v7   ;;  %v433_v33 = vld [vmem:[%s8364_s3 + $0x178] sm:$0xff]  ;;  %v391_v36 = vld [vmem:[%s8364_s3 + $0x28] sm:$0xff]  ;;  %v430_v37 = vld [vmem:[%s8364_s3 + $0x160] sm:$0xff] }
  0x29   : > { %v431_v40 = vld [vmem:[%s8364_s3 + $0x168] sm:$0xff]  ;;  %v388_v41 = vld [vmem:[%s8364_s3 + $0x10] sm:$0xff]  ;;  %v389_v44 = vld [vmem:[%s8364_s3 + $0x18] sm:$0xff] }
  0x2a   : > { %289 = vxpose.xlu0.b32.end [2/2] (short) (narrow) %v287_v8, 32  ;;  %v428_v45 = vld [vmem:[%s8364_s3 + $0x150] sm:$0xff]  ;;  %v429_v48 = vld [vmem:[%s8364_s3 + $0x158] sm:$0xff]  ;;  %v386_v49 = vld [vmem:[%s8364_s3] sm:$0xff] }
  0x2b   : > { %v1402_v50 = vld [vmem:[%s8364_s3 + $0x350] sm:$0xff]  ;;  %v426_v53 = vld [vmem:[%s8364_s3 + $0x140] sm:$0xff]  ;;  %v427_v54 = vld [vmem:[%s8364_s3 + $0x148] sm:$0xff] }
  0x2c   : > { %v387_v55 = vld [vmem:[%s8364_s3 + $0x8] sm:$0xff]  ;;  %v425_v58 = vld [vmem:[%s8364_s3 + $0x138] sm:$0xff]  ;;  %v422_v59 = vld [vmem:[%s8364_s3 + $0x120] sm:$0xff] }
  0x2d   : > { %v424_v60 = vld [vmem:[%s8364_s3 + $0x130] sm:$0xff]  ;;  %v421_v0 = vld [vmem:[%s8364_s3 + $0x118] sm:$0xff]  ;;  %v423_v1 = vld [vmem:[%s8364_s3 + $0x128] sm:$0xff] }
  0x2e   : > { %v420_v63 = vld [vmem:[%s8364_s3 + $0x110] sm:$0xff]  ;;  %v419_v5 = vld [vmem:[%s8364_s3 + $0x108] sm:$0xff]  ;;  %v402_v6 = vld [vmem:[%s8364_s3 + $0x80] sm:$0xff] }
  0x2f   : > { %v418_v8 = vld [vmem:[%s8364_s3 + $0x100] sm:$0xff] }
  0x30   : > { %1626 = vperm.xlu2 %5685, %v1400_v9   ;;  %1641 = vperm.xlu1 %5684, %v1403_v10  }
  0x38   : > { %1631 = vperm.xlu1 %5684, %v1401_v11   ;;  %522 = vperm.xlu2 %5685, %v400_v12   ;;  %v404_v11 = vld [vmem:[%s8364_s3 + $0x90] sm:$0xff]  ;;  %v405_v12 = vld [vmem:[%s8364_s3 + $0x98] sm:$0xff] }
  0x40   : > { %527 = vperm.xlu1 %5684, %v401_v13   ;;  %1616 = vperm.xlu2 %5685, %v1398_v14   ;;  %v403_v14 = vld [vmem:[%s8364_s3 + $0x88] sm:$0xff] }
  0x48   : > { %1621 = vperm.xlu1 %5684, %v1399_v15   ;;  %512 = vperm.xlu2 %5685, %v398_v16  }
  0x50   : > { %517 = vperm.xlu1 %5684, %v399_v17   ;;  %1606 = vperm.xlu2 %5685, %v1396_v18   ;;  %v407_v17 = vld [vmem:[%s8364_s3 + $0xa8] sm:$0xff]  ;;  %v408_v18 = vld [vmem:[%s8364_s3 + $0xb0] sm:$0xff] }
  0x58   : > { %1611 = vperm.xlu1 %5684, %v1397_v19   ;;  %502 = vperm.xlu2 %5685, %v396_v20   ;;  %v406_v20 = vld [vmem:[%s8364_s3 + $0xa0] sm:$0xff] }
  0x60   : > { %507 = vperm.xlu1 %5684, %v397_v21   ;;  %1596 = vperm.xlu2 %5685, %v1394_v22  }
  0x68   : > { %1601 = vperm.xlu1 %5684, %v1395_v23   ;;  %492 = vperm.xlu2 %5685, %v394_v24   ;;  %v410_v23 = vld [vmem:[%s8364_s3 + $0xc0] sm:$0xff]  ;;  %v411_v24 = vld [vmem:[%s8364_s3 + $0xc8] sm:$0xff] }
  0x70   : > { %497 = vperm.xlu1 %5684, %v395_v25   ;;  %1586 = vperm.xlu2 %5685, %v1392_v26   ;;  %v409_v26 = vld [vmem:[%s8364_s3 + $0xb8] sm:$0xff] }
  0x78   : > { %1591 = vperm.xlu1 %5684, %v1393_v27   ;;  %482 = vperm.xlu2 %5685, %v392_v28  }
  0x7a   : > { %v5892_v29 = vpop.permute.xlu2 %1646 }
  0x7b   : > { %8374 = vst [vmem:[#allocation4_spill] sm:$0xff] %v5892_v29 }
  0x80   : > { %487 = vperm.xlu1 %5684, %v393_v30   ;;  %682 = vperm.xlu2 %5685, %v432_v31  }
  0x82   : > { %v5900_v32 = vpop.permute.xlu2 %1651 }
  0x83   : > { %8375 = vst [vmem:[#allocation5_spill] sm:$0xff] %v5900_v32  ;;  %v1412_v32 = vld [vmem:[%s8364_s3 + $0x3a0] sm:$0xff] }
  0x88   : > { %687 = vperm.xlu1 %5684, %v433_v33   ;;  %472 = vperm.xlu2 %5685, %v390_v34   ;;  %v413_v33 = vld [vmem:[%s8364_s3 + $0xd8] sm:$0xff]  ;;  %v414_v34 = vld [vmem:[%s8364_s3 + $0xe0] sm:$0xff] }
  0x8a   : > { %v5908_v35 = vpop.permute.xlu2 %1626 }
  0x8b   : > { %8376 = vst [vmem:[#allocation6_spill] sm:$0xff] %v5908_v35  ;;  %v1419_v35 = vld [vmem:[%s8364_s3 + $0x3d8] sm:$0xff] }
  0x90   : > { %477 = vperm.xlu1 %5684, %v391_v36   ;;  %672 = vperm.xlu2 %5685, %v430_v37   ;;  %v5507_v36 = vld [vmem:[%s8363_s2] sm:$0xff]  ;;  %v412_v37 = vld [vmem:[%s8364_s3 + $0xd0] sm:$0xff] }
  0x91   : > { %5686 = vset.pattern.permute.xlu0 %v8368_v4 }
  0x92   : > { %v5917_v38 = vpop.permute.xlu1 %1656  ;;  %v5919_v39 = vpop.permute.xlu2 %522 }
  0x93   : > { %8377 = vst [vmem:[#allocation7_spill] sm:$0xff] %v5917_v38 }
  0x98   : > { %677 = vperm.xlu1 %5684, %v431_v40   ;;  %462 = vperm.xlu2 %5685, %v388_v41   ;;  %v5536_v40 = vld [vmem:[%s8363_s2 + $0xe8] sm:$0xff] }
  0x9a   : > { %v5927_v42 = vpop.permute.xlu1 %1661  ;;  %v5929_v43 = vpop.permute.xlu2 %1616 }
  0x9b   : > { %8378 = vst [vmem:[#allocation8_spill] sm:$0xff] %v5927_v42  ;;  %v1416_v42 = vld [vmem:[%s8364_s3 + $0x3c0] sm:$0xff] }
  0x9c   : > { %8379 = vst [vmem:[#allocation9_spill] sm:$0xff] %v5929_v43  ;;  %v1410_v43 = vld [vmem:[%s8364_s3 + $0x390] sm:$0xff] }
  0xa0   : > { %467 = vperm.xlu1 %5684, %v389_v44   ;;  %662 = vperm.xlu2 %5685, %v428_v45   ;;  %v416_v45 = vld [vmem:[%s8364_s3 + $0xf0] sm:$0xff] }
  0xa2   : > { %v5937_v46 = vpop.permute.xlu1 %1641  ;;  %v5939_v47 = vpop.permute.xlu2 %512 }
  0xa3   : > { %8380 = vst [vmem:[#allocation10_spill] sm:$0xff] %v5937_v46 }
  0xa8   : > { %667 = vperm.xlu1 %5684, %v429_v48   ;;  %452 = vperm.xlu2 %5685, %v386_v49   ;;  %v417_v48 = vld [vmem:[%s8364_s3 + $0xf8] sm:$0xff]  ;;  %v415_v49 = vld [vmem:[%s8364_s3 + $0xe8] sm:$0xff] }
  0xa9   : > { %1636 = vperm.xlu0 %5686, %v1402_v50  }
  0xaa   : > { %v5950_v51 = vpop.permute.xlu1 %1631  ;;  %v5952_v52 = vpop.permute.xlu2 %1606 }
  0xab   : > { %8381 = vst [vmem:[#allocation11_spill] sm:$0xff] %v5950_v51  ;;  %v1376_v51 = vld [vmem:[%s8364_s3 + $0x280] sm:$0xff] }
  0xac   : > { %8382 = vst [vmem:[#allocation12_spill] sm:$0xff] %v5952_v52 }
  0xb0   : > { %652 = vperm.xlu1 %5684, %v426_v53   ;;  %657 = vperm.xlu2 %5685, %v427_v54   ;;  %v435_v54 = vld [vmem:[%s8364_s3 + $0x188] sm:$0xff] }
  0xb1   : > { %457 = vperm.xlu0 %5686, %v387_v55   ;;  %v436_v55 = vld [vmem:[%s8364_s3 + $0x190] sm:$0xff] }
  0xb2   : > { %v5963_v56 = vpop.permute.xlu1 %527  ;;  %v5965_v57 = vpop.permute.xlu2 %502 }
  0xb8   : > { %647 = vperm.xlu1 %5684, %v425_v58   ;;  %632 = vperm.xlu2 %5685, %v422_v59   ;;  %v5508_v58 = vld [vmem:[%s8363_s2 + $0x8] sm:$0xff]  ;;  %v434_v59 = vld [vmem:[%s8364_s3 + $0x180] sm:$0xff] }
  0xb9   : > { %642 = vperm.xlu0 %5686, %v424_v60   ;;  %v5537_v60 = vld [vmem:[%s8363_s2 + $0xf0] sm:$0xff] }
  0xba   : > { %v5976_v61 = vpop.permute.xlu1 %1621  ;;  %v5978_v62 = vpop.permute.xlu2 %1596 }
  0xbb   : > { %8383 = vst [vmem:[#allocation13_spill] sm:$0xff] %v5976_v61 }
  0xbc   : > { %8384 = vst [vmem:[#allocation14_spill] sm:$0xff] %v5978_v62 }
  0xc0   : > { %622 = vperm.xlu1 %5684, %v420_v63   ;;  %627 = vperm.xlu2 %5685, %v421_v0  }
  0xc1   : > { %637 = vperm.xlu0 %5686, %v423_v1   ;;  %v438_v1 = vld [vmem:[%s8364_s3 + $0x1a0] sm:$0xff] }
  0xc2   : > { %v5989_v2 = vpop.permute.xlu1 %517  ;;  %v5991_v3 = vpop.permute.xlu2 %492 }
  0xc6   : > { %v304_v7 = vpop.trf.xlu0 }
  0xc8   : > { %617 = vperm.xlu1 %5684, %v419_v5   ;;  %532 = vperm.xlu2 %5685, %v402_v6   ;;  %v439_v5 = vld [vmem:[%s8364_s3 + $0x1a8] sm:$0xff]  ;;  %v437_v6 = vld [vmem:[%s8364_s3 + $0x198] sm:$0xff] }
  0xc9   : > { %612 = vperm.xlu0 %5686, %v418_v8  }
  0xca   : > { %v6002_v9 = vpop.permute.xlu1 %1611  ;;  %v6004_v10 = vpop.permute.xlu2 %1586 }
  0xcb   : > { %8385 = vst [vmem:[#allocation15_spill] sm:$0xff] %v6002_v9  ;;  %v2515_v9 = vld [vmem:[%s8364_s3 + $0x4f0] sm:$0xff] }
  0xcc   : > { %8386 = vst [vmem:[#allocation16_spill] sm:$0xff] %v6004_v10 }
  0xce   : > { %v305_v13 = vpop.trf.xlu0 }
  0xcf   : > { %v6049_v31 = vpack.c.bf16 %v305_v13, %v304_v7  ;;  %v5509_v13 = vld [vmem:[%s8363_s2 + $0x10] sm:$0xff] }
  0xd0   : > { %542 = vperm.xlu1 %5684, %v404_v11   ;;  %547 = vperm.xlu2 %5685, %v405_v12   ;;  %v441_v11 = vld [vmem:[%s8364_s3 + $0x1b8] sm:$0xff]  ;;  %v442_v12 = vld [vmem:[%s8364_s3 + $0x1c0] sm:$0xff] }
  0xd1   : > { %537 = vperm.xlu0 %5686, %v403_v14   ;;  %8390 = vst [vmem:[#allocation20_spill] sm:$0xff] %v6049_v31  ;;  %v440_v14 = vld [vmem:[%s8364_s3 + $0x1b0] sm:$0xff] }
  0xd2   : > { %v6015_v15 = vpop.permute.xlu1 %507  ;;  %v6017_v16 = vpop.permute.xlu2 %482 }
  0xd6   : > { %v306_v19 = vpop.trf.xlu0 }
  0xd8   : > { %557 = vperm.xlu1 %5684, %v407_v17   ;;  %562 = vperm.xlu2 %5685, %v408_v18   ;;  %v5538_v17 = vld [vmem:[%s8363_s2 + $0xf8] sm:$0xff] }
  0xd9   : > { %552 = vperm.xlu0 %5686, %v406_v20   ;;  %v444_v20 = vld [vmem:[%s8364_s3 + $0x1d0] sm:$0xff] }
  0xda   : > { %v6028_v21 = vpop.permute.xlu1 %1601  ;;  %v6030_v22 = vpop.permute.xlu2 %682 }
  0xdb   : > { %8387 = vst [vmem:[#allocation17_spill] sm:$0xff] %v6028_v21  ;;  %v2513_v21 = vld [vmem:[%s8364_s3 + $0x4e0] sm:$0xff] }
  0xdc   : > { %8388 = vst [vmem:[#allocation18_spill] sm:$0xff] %v6030_v22 }
  0xde   : > { %v307_v25 = vpop.trf.xlu0 }
  0xdf   : > { %v6041_v27 = vpack.c.bf16 %v307_v25, %v306_v19 }
  0xe0   : > { %572 = vperm.xlu1 %5684, %v410_v23   ;;  %577 = vperm.xlu2 %5685, %v411_v24   ;;  %v445_v23 = vld [vmem:[%s8364_s3 + $0x1d8] sm:$0xff]  ;;  %v443_v24 = vld [vmem:[%s8364_s3 + $0x1c8] sm:$0xff] }
  0xe1   : > { %8389 = vst [vmem:[#allocation19_spill] sm:$0xff] %v6041_v27  ;;  %567 = vperm.xlu0 %5686, %v409_v26   ;;  %1033 = vmatpush.bf16.msra.mxu0 %v6041_v27 }
  0xe2   : > { %5651 = vmatpush.bf16.msra.mxu1 %v6041_v27  ;;  %v6045_v28 = vpop.permute.xlu1 %497  ;;  %v6047_v30 = vpop.permute.xlu2 %472 }
  0xe5   : > { %1034 = vmatpush.bf16.msra.mxu0 %v6049_v31 }
  0xe6   : > { %5652 = vmatpush.bf16.msra.mxu1 %v6049_v31 }
  0xe8   : > { %587 = vperm.xlu1 %5684, %v413_v33   ;;  %592 = vperm.xlu2 %5685, %v414_v34   ;;  %v447_v33 = vld [vmem:[%s8364_s3 + $0x1e8] sm:$0xff]  ;;  %v448_v34 = vld [vmem:[%s8364_s3 + $0x1f0] sm:$0xff] }
  0xe9   : > { %582 = vperm.xlu0 %5686, %v412_v37   ;;  %4926 = vmatmul.msk.bf16.vlgmr.msra.gmra.mxu0 %vm930_vm0, %v5507_v36  ;;  %v5510_v36 = vld [vmem:[%s8363_s2 + $0x18] sm:$0xff]  ;;  %v446_v37 = vld [vmem:[%s8364_s3 + $0x1e0] sm:$0xff] }
  0xea   : > { %2006 = vmatpush.bf16.msrb.mxu1 %v6041_v27  ;;  %v6071_v41 = vpop.permute.xlu1 %1591  ;;  %v6073_v44 = vpop.permute.xlu2 %672  ;;  %v2512_v27 = vld [vmem:[%s8364_s3 + $0x4d8] sm:$0xff] }
  0xeb   : > { %4955 = vmatmul.msk.bf16.vlgmr.msra.gmra.mxu1 %vm930_vm0, %v5536_v40  ;;  %8391 = vst [vmem:[#allocation21_spill] sm:$0xff] %v6071_v41  ;;  %v5543_v40 = vld [vmem:[%s8363_s2 + $0x100] sm:$0xff] }
  0xec   : > { %8392 = vst [vmem:[#allocation22_spill] sm:$0xff] %v6073_v44  ;;  %v1411_v44 = vld [vmem:[%s8364_s3 + $0x398] sm:$0xff]  ;;  %v2509_v41 = vld [vmem:[%s8364_s3 + $0x4c0] sm:$0xff] }
  0xee   : > { %2007 = vmatpush.bf16.msrb.mxu1 %v6049_v31 }
  0xf0   : > { %602 = vperm.xlu1 %5684, %v416_v45   ;;  %607 = vperm.xlu2 %5685, %v417_v48  }
  0xf1   : > { %597 = vperm.xlu0 %5686, %v415_v49  }
  0xf2   : > { %v6085_v50 = vpop.permute.xlu1 %487  ;;  %v6087_v53 = vpop.permute.xlu2 %462 }
  0xf8   : > { %697 = vperm.xlu1 %5684, %v435_v54   ;;  %702 = vperm.xlu2 %5685, %v436_v55   ;;  %v1360_v54 = vld [vmem:[%s8364_s3 + $0x200] sm:$0xff]  ;;  %v1361_v55 = vld [vmem:[%s8364_s3 + $0x208] sm:$0xff] }
  0xf9   : > { %692 = vperm.xlu0 %5686, %v434_v59   ;;  %4927 = vmatmul.msk.bf16.gmra.mxu0 %vm930_vm0, %v5508_v58  ;;  %v449_v58 = vld [vmem:[%s8364_s3 + $0x1f8] sm:$0xff] }
  0xfa   : > { %v6106_v63 = vpop.permute.xlu1 %687  ;;  %v6108_v0 = vpop.permute.xlu2 %662 }
  0xfb   : > { %4956 = vmatmul.msk.bf16.gmra.mxu1 %vm930_vm0, %v5537_v60  ;;  %8393 = vst [vmem:[#allocation23_spill] sm:$0xff] %v6106_v63  ;;  %v1378_v63 = vld [vmem:[%s8364_s3 + $0x290] sm:$0xff] }
  0xfc   : > { %8394 = vst [vmem:[#allocation24_spill] sm:$0xff] %v6108_v0 }
 0x100   : > { %712 = vperm.xlu1 %5684, %v438_v1   ;;  %717 = vperm.xlu2 %5685, %v439_v5   ;;  %v1391_v5 = vld [vmem:[%s8364_s3 + $0x2f8] sm:$0xff] }
 0x101   : > { %707 = vperm.xlu0 %5686, %v437_v6   ;;  %v1388_v6 = vld [vmem:[%s8364_s3 + $0x2e0] sm:$0xff] }
 0x102   : > { %v6119_v7 = vpop.permute.xlu1 %477  ;;  %v6121_v8 = vpop.permute.xlu2 %452 }
 0x108   : > { %727 = vperm.xlu1 %5684, %v441_v11   ;;  %732 = vperm.xlu2 %5685, %v442_v12   ;;  %v5511_v11 = vld [vmem:[%s8363_s2 + $0x20] sm:$0xff]  ;;  %v1390_v12 = vld [vmem:[%s8364_s3 + $0x2f0] sm:$0xff] }
 0x109   : > { %722 = vperm.xlu0 %5686, %v440_v14   ;;  %4928 = vmatmul.msk.bf16.gmra.mxu0 %vm930_vm0, %v5509_v13  ;;  %v5544_v13 = vld [vmem:[%s8363_s2 + $0x108] sm:$0xff] }
 0x10a   : > { %v6140_v18 = vpop.permute.xlu1 %677  ;;  %v6142_v19 = vpop.permute.xlu2 %657 }
 0x10b   : > { %4957 = vmatmul.msk.bf16.gmra.mxu1 %vm930_vm0, %v5538_v17  ;;  %8395 = vst [vmem:[#allocation25_spill] sm:$0xff] %v6140_v18 }
 0x10c   : > { %8396 = vst [vmem:[#allocation26_spill] sm:$0xff] %v6142_v19 }
 0x110   : > { %742 = vperm.xlu1 %5684, %v444_v20   ;;  %747 = vperm.xlu2 %5685, %v445_v23   ;;  %v1386_v23 = vld [vmem:[%s8364_s3 + $0x2d0] sm:$0xff] }
 0x111   : > { %737 = vperm.xlu0 %5686, %v443_v24   ;;  %v1387_v24 = vld [vmem:[%s8364_s3 + $0x2d8] sm:$0xff] }
 0x112   : > { %v6153_v25 = vpop.permute.xlu1 %467  ;;  %v6155_v26 = vpop.permute.xlu2 %632 }
 0x113   : > { %8397 = vst [vmem:[#allocation27_spill] sm:$0xff] %v6155_v26 }
 0x118   : > { %757 = vperm.xlu1 %5684, %v447_v33   ;;  %762 = vperm.xlu2 %5685, %v448_v34   ;;  %v1389_v33 = vld [vmem:[%s8364_s3 + $0x2e8] sm:$0xff] }
 0x119   : > { %752 = vperm.xlu0 %5686, %v446_v37   ;;  %4929 = vmatmul.msk.bf16.gmra.mxu0 %vm930_vm0, %v5510_v36 }
 0x11a   : > { %v6174_v45 = vpop.permute.xlu1 %667  ;;  %v6176_v48 = vpop.permute.xlu2 %627 }
 0x11b   : > { %5086 = vmatmul.msk.bf16.vlgmr.msrb.gmra.mxu1 %vm930_vm0, %v5543_v40  ;;  %8398 = vst [vmem:[#allocation28_spill] sm:$0xff] %v6174_v45  ;;  %v6178_v49 = vpop.permute.xlu0 %1636  ;;  %v1385_v40 = vld [vmem:[%s8364_s3 + $0x2c8] sm:$0xff] }
 0x11c   : > { %8399 = vst [vmem:[#allocation29_spill] sm:$0xff] %v6176_v48  ;;  %v5516_v45 = vld [vmem:[%s8363_s2 + $0x48] sm:$0xff] }
 0x11d   : > { %8400 = vst [vmem:[#allocation30_spill] sm:$0xff] %v6178_v49 }
 0x120   : > { %1426 = vperm.xlu1 %5684, %v1360_v54   ;;  %1431 = vperm.xlu2 %5685, %v1361_v55   ;;  %v1382_v54 = vld [vmem:[%s8364_s3 + $0x2b0] sm:$0xff]  ;;  %v5512_v55 = vld [vmem:[%s8363_s2 + $0x28] sm:$0xff] }
 0x121   : > { %767 = vperm.xlu0 %5686, %v449_v58   ;;  %v1384_v58 = vld [vmem:[%s8364_s3 + $0x2c0] sm:$0xff] }
 0x122   : > { %v6189_v59 = vpop.permute.xlu1 %652  ;;  %v6191_v60 = vpop.permute.xlu2 %532 }
 0x123   : > { %8401 = vst [vmem:[#allocation31_spill] sm:$0xff] %v6189_v59  ;;  %v6193_v1 = vpop.permute.xlu0 %457 }
 0x128   : > { %1581 = vperm.xlu1 %5684, %v1391_v5   ;;  %1566 = vperm.xlu2 %5685, %v1388_v6   ;;  %v5545_v5 = vld [vmem:[%s8363_s2 + $0x110] sm:$0xff] }
 0x129   : > { %1576 = vperm.xlu0 %5686, %v1390_v12   ;;  %4930 = vmatmul.msk.bf16.gmra.mxu0 %vm930_vm0, %v5511_v11 }
 0x12a   : > { %v6212_v14 = vpop.permute.xlu1 %647  ;;  %v6214_v17 = vpop.permute.xlu2 %547 }
 0x12b   : > { %5087 = vmatmul.msk.bf16.gmra.mxu1 %vm930_vm0, %v5544_v13  ;;  %8402 = vst [vmem:[#allocation32_spill] sm:$0xff] %v6212_v14  ;;  %v6216_v20 = vpop.permute.xlu0 %642  ;;  %v1422_v13 = vld [vmem:[%s8364_s3 + $0x3f0] sm:$0xff] }
 0x12c   : > { %8403 = vst [vmem:[#allocation33_spill] sm:$0xff] %v6216_v20 }
 0x130   : > { %1556 = vperm.xlu1 %5684, %v1386_v23   ;;  %1561 = vperm.xlu2 %5685, %v1387_v24   ;;  %v1423_v23 = vld [vmem:[%s8364_s3 + $0x3f8] sm:$0xff] }
 0x131   : > { %1571 = vperm.xlu0 %5686, %v1389_v33   ;;  %v1383_v24 = vld [vmem:[%s8364_s3 + $0x2b8] sm:$0xff] }
 0x132   : > { %v6227_v34 = vpop.permute.xlu1 %622  ;;  %v6229_v36 = vpop.permute.xlu2 %562 }
 0x133   : > { %8404 = vst [vmem:[#allocation34_spill] sm:$0xff] %v6227_v34  ;;  %v6231_v37 = vpop.permute.xlu0 %637 }
 0x134   : > { %8405 = vst [vmem:[#allocation35_spill] sm:$0xff] %v6231_v37  ;;  %v2507_v37 = vld [vmem:[%s8364_s3 + $0x4b0] sm:$0xff] }
 0x138   : > { %1551 = vperm.xlu1 %5684, %v1385_v40   ;;  %1536 = vperm.xlu2 %5685, %v1382_v54  }
 0x139   : > { %1546 = vperm.xlu0 %5686, %v1384_v58   ;;  %4931 = vmatmul.msk.bf16.gmra.mxu0 %vm930_vm0, %v5512_v55  ;;  %v1381_v55 = vld [vmem:[%s8364_s3 + $0x2a8] sm:$0xff]  ;;  %v1420_v58 = vld [vmem:[%s8364_s3 + $0x3e0] sm:$0xff] }
 0x13a   : > { %v6250_v6 = vpop.permute.xlu1 %617  ;;  %v6252_v11 = vpop.permute.xlu2 %577 }
 0x13b   : > { %5088 = vmatmul.msk.bf16.gmra.mxu1 %vm930_vm0, %v5545_v5  ;;  %8406 = vst [vmem:[#allocation36_spill] sm:$0xff] %v6250_v6  ;;  %v6254_v12 = vpop.permute.xlu0 %612  ;;  %v5513_v5 = vld [vmem:[%s8363_s2 + $0x30] sm:$0xff] }
 0x13c   : > { %8407 = vst [vmem:[#allocation37_spill] sm:$0xff] %v6254_v12 }
 0x140   : > { %1736 = vperm.xlu1 %5684, %v1422_v13   ;;  %1741 = vperm.xlu2 %5685, %v1423_v23   ;;  %v1380_v13 = vld [vmem:[%s8364_s3 + $0x2a0] sm:$0xff]  ;;  %v5546_v23 = vld [vmem:[%s8363_s2 + $0x118] sm:$0xff] }
 0x141   : > { %1541 = vperm.xlu0 %5686, %v1383_v24  }
 0x142   : > { %v6265_v33 = vpop.permute.xlu1 %542  ;;  %v6267_v40 = vpop.permute.xlu2 %592 }
 0x143   : > { %v6269_v54 = vpop.permute.xlu0 %537 }
 0x148   : > { %1531 = vperm.xlu1 %5684, %v1381_v55   ;;  %1726 = vperm.xlu2 %5685, %v1420_v58   ;;  %v1379_v55 = vld [vmem:[%s8364_s3 + $0x298] sm:$0xff]  ;;  %v1421_v58 = vld [vmem:[%s8364_s3 + $0x3e8] sm:$0xff] }
 0x149   : > { %1526 = vperm.xlu0 %5686, %v1380_v13   ;;  %4932 = vmatmul.msk.bf16.gmra.mxu0 %vm930_vm0, %v5513_v5 }
 0x14a   : > { %v6288_v24 = vpop.permute.xlu1 %557  ;;  %v6290_v4 = vpop.permute.xlu2 %607 }
 0x14b   : > { %5089 = vmatmul.msk.bf16.gmra.mxu1 %vm930_vm0, %v5546_v23  ;;  %v6292_v22 = vpop.permute.xlu0 %552 }
 0x150   : > { %1516 = vperm.xlu1 %5684, %v1378_v63   ;;  %1521 = vperm.xlu2 %5685, %v1379_v55   ;;  %v5514_v63 = vld [vmem:[%s8363_s2 + $0x38] sm:$0xff]  ;;  %v1418_v55 = vld [vmem:[%s8364_s3 + $0x3d0] sm:$0xff] }
 0x151   : > { %1731 = vperm.xlu0 %5686, %v1421_v58   ;;  %v5547_v58 = vld [vmem:[%s8363_s2 + $0x120] sm:$0xff] }
 0x152   : > { %v6303_v5 = vpop.permute.xlu1 %572  ;;  %v6305_v13 = vpop.permute.xlu2 %702 }
 0x153   : > { %8408 = vst [vmem:[#allocation38_spill] sm:$0xff] %v6305_v13  ;;  %v6307_v23 = vpop.permute.xlu0 %567 }
 0x158   : > { %1721 = vperm.xlu1 %5684, %v1419_v35   ;;  %1506 = vperm.xlu2 %5685, %v1376_v51   ;;  %v1417_v35 = vld [vmem:[%s8364_s3 + $0x3c8] sm:$0xff] }
 0x159   : > { %1716 = vperm.xlu0 %5686, %v1418_v55   ;;  %4933 = vmatmul.msk.bf16.gmra.mxu0 %vm930_vm0, %v5514_v63  ;;  %v1377_v51 = vld [vmem:[%s8364_s3 + $0x288] sm:$0xff] }
 0x15a   : > { %v6326_v49 = vpop.permute.xlu1 %587  ;;  %v6328_v46 = vpop.permute.xlu2 %717 }
 0x15b   : > { %5090 = vmatmul.msk.bf16.gmra.mxu1 %vm930_vm0, %v5547_v58  ;;  %8409 = vst [vmem:[#allocation39_spill] sm:$0xff] %v6328_v46  ;;  %v6330_v29 = vpop.permute.xlu0 %582  ;;  %v1415_v46 = vld [vmem:[%s8364_s3 + $0x3b8] sm:$0xff] }
 0x160   : > { %1706 = vperm.xlu1 %5684, %v1416_v42   ;;  %1711 = vperm.xlu2 %5685, %v1417_v35   ;;  %v5515_v42 = vld [vmem:[%s8363_s2 + $0x40] sm:$0xff] }
 0x161   : > { %1511 = vperm.xlu0 %5686, %v1377_v51   ;;  %v1414_v51 = vld [vmem:[%s8364_s3 + $0x3b0] sm:$0xff] }
 0x162   : > { %v6341_v63 = vpop.permute.xlu1 %602  ;;  %v6343_v55 = vpop.permute.xlu2 %732 }
 0x163   : > { %8410 = vst [vmem:[#allocation40_spill] sm:$0xff] %v6343_v55  ;;  %v6345_v58 = vpop.permute.xlu0 %597  ;;  %v5548_v55 = vld [vmem:[%s8363_s2 + $0x128] sm:$0xff] }
 0x166   : > { %v6356_v35 = vpop.f32.mrf.mxu0 }
 0x168   : > { %v1181_v38 = vpop.f32.mrf.mxu1  ;;  %1701 = vperm.xlu1 %5684, %v1415_v46   ;;  %1686 = vperm.xlu2 %5685, %v1412_v32   ;;  %v1413_v32 = vld [vmem:[%s8364_s3 + $0x3a8] sm:$0xff] }
 0x169   : > { %1696 = vperm.xlu0 %5686, %v1414_v51   ;;  %4934 = vmatmul.msk.bf16.gmra.mxu0 %vm930_vm0, %v5515_v42 }
 0x16a   : > { %v6366_v13 = vpop.permute.xlu1 %697  ;;  %v748_v61 = vpop.permute.xlu2 %747 }
 0x16b   : > { %5091 = vmatmul.msk.bf16.gmra.mxu1 %vm930_vm0, %v5548_v55  ;;  %8411 = vst [vmem:[#allocation41_spill] sm:$0xff] %v6366_v13  ;;  %v6368_v18 = vpop.permute.xlu0 %692 }
 0x16c   : > { %8412 = vst [vmem:[#allocation42_spill] sm:$0xff] %v6368_v18  ;;  %v1409_v18 = vld [vmem:[%s8364_s3 + $0x388] sm:$0xff] }
 0x16e   : > { %v6376_v46 = vpop.f32.mrf.mxu0 }
 0x170   : > { %v1183_v55 = vpop.f32.mrf.mxu1  ;;  %1676 = vperm.xlu1 %5684, %v1410_v43   ;;  %1681 = vperm.xlu2 %5685, %v1411_v44   ;;  %v1408_v44 = vld [vmem:[%s8364_s3 + $0x380] sm:$0xff] }
 0x171   : > { %1691 = vperm.xlu0 %5686, %v1413_v32   ;;  %v5549_v32 = vld [vmem:[%s8363_s2 + $0x130] sm:$0xff] }
 0x172   : > { %v6381_v42 = vpop.permute.xlu1 %712  ;;  %v763_v51 = vpop.permute.xlu2 %762 }
 0x173   : > { %8413 = vst [vmem:[#allocation43_spill] sm:$0xff] %v6381_v42  ;;  %v6383_v13 = vpop.permute.xlu0 %707 }
 0x174   : > { %8414 = vst [vmem:[#allocation44_spill] sm:$0xff] %v6383_v13 }
 0x176   : > { %v6394_v43 = vpop.f32.mrf.mxu0 }
 0x178   : > { %v1186_v42 = vpop.f32.mrf.mxu1  ;;  %1671 = vperm.xlu1 %5684, %v1409_v18   ;;  %2701 = vperm.xlu2 %5685, %v2515_v9   ;;  %v2514_v18 = vld [vmem:[%s8364_s3 + $0x4e8] sm:$0xff] }
 0x179   : > { %1666 = vperm.xlu0 %5686, %v1408_v44   ;;  %4935 = vmatmul.msk.bf16.gmra.mxu0 %vm930_vm0, %v5516_v45  ;;  %v2516_v45 = vld [vmem:[%s8364_s3 + $0x4f8] sm:$0xff] }
 0x17a   : > { %v6404_v13 = vpop.permute.xlu1 %727  ;;  %v6406_v52 = vpop.permute.xlu2 %1431 }
 0x17b   : > { %5092 = vmatmul.msk.bf16.gmra.mxu1 %vm930_vm0, %v5549_v32  ;;  %8415 = vst [vmem:[#allocation45_spill] sm:$0xff] %v6404_v13  ;;  %v6408_v0 = vpop.permute.xlu0 %722  ;;  %v1184_v32 = vadd.f32 %v1183_v55, %v748_v61  ;;  %v5517_v61 = vld [vmem:[%s8363_s2 + $0x50] sm:$0xff] }
 0x17c   : > { %8416 = vst [vmem:[#allocation46_spill] sm:$0xff] %v6408_v0 }
 0x17d   : > { %v1255_v59 = vmax.f32 %v1184_v32, 0.0 }
 0x17e   : > { %v6416_v9 = vpop.f32.mrf.mxu0 }
 0x180   : > { %v1188_v44 = vpop.f32.mrf.mxu1  ;;  %2691 = vperm.xlu1 %5684, %v2513_v21   ;;  %2696 = vperm.xlu2 %5685, %v2514_v18  }
 0x181   : > { %2706 = vperm.xlu0 %5686, %v2516_v45  }
 0x182   : > { %v743_v0 = vpop.permute.xlu1 %742  ;;  %v6421_v13 = vpop.permute.xlu2 %1566 }
 0x183   : > { %8417 = vst [vmem:[#allocation47_spill] sm:$0xff] %v6421_v13  ;;  %v1182_v19 = vadd.f32 %v1181_v38, %v743_v0  ;;  %v6423_v62 = vpop.permute.xlu0 %737  ;;  %v2511_v38 = vld [vmem:[%s8364_s3 + $0x4d0] sm:$0xff]  ;;  %v5550_v0 = vld [vmem:[%s8363_s2 + $0x138] sm:$0xff]  ;;  %v2541_v13 = vld [vmem:[%s8364_s3 + $0x5c0] sm:$0xff] }
 0x184   : > { %8418 = vst [vmem:[#allocation48_spill] sm:$0xff] %v6423_v62 }
 0x185   : > { %v1254_v31 = vmax.f32 %v1182_v19, 0.0 }
 0x186   : > { %v6434_v21 = vpop.f32.mrf.mxu0 }
 0x187   : > { %v6442_v55 = vpack.c.bf16 %v1255_v59, %v1254_v31  ;;  %v2510_v59 = vld [vmem:[%s8364_s3 + $0x4c8] sm:$0xff] }
 0x188   : > { %v1191_v19 = vpop.f32.mrf.mxu1  ;;  %2686 = vperm.xlu1 %5684, %v2512_v27   ;;  %2671 = vperm.xlu2 %5685, %v2509_v41   ;;  %v2508_v27 = vld [vmem:[%s8364_s3 + $0x4b8] sm:$0xff] }
 0x189   : > { %8419 = vst [vmem:[#allocation49_spill] sm:$0xff] %v6442_v55  ;;  %2681 = vperm.xlu0 %5686, %v2511_v38   ;;  %4936 = vmatmul.msk.bf16.gmra.mxu0 %vm930_vm0, %v5517_v61  ;;  %v2529_v55 = vld [vmem:[%s8364_s3 + $0x560] sm:$0xff] }
 0x18a   : > { %v758_v18 = vpop.permute.xlu1 %757  ;;  %v6446_v45 = vpop.permute.xlu2 %1561 }
 0x18b   : > { %5093 = vmatmul.msk.bf16.gmra.mxu1 %vm930_vm0, %v5550_v0  ;;  %8420 = vst [vmem:[#allocation50_spill] sm:$0xff] %v6446_v45  ;;  %v1189_v32 = vadd.f32 %v1188_v44, %v758_v18  ;;  %v753_v62 = vpop.permute.xlu0 %752  ;;  %v2519_v45 = vld [vmem:[%s8364_s3 + $0x510] sm:$0xff] }
 0x18c   : > { %v1187_v14 = vadd.f32 %v1186_v42, %v753_v62  ;;  %v1192_v42 = vadd.f32 %v1191_v19, %v763_v51  ;;  %v2531_v19 = vld [vmem:[%s8364_s3 + $0x570] sm:$0xff] }
 0x18d   : > { %v1257_v10 = vmax.f32 %v1189_v32, 0.0  ;;  %v2505_v32 = vld [vmem:[%s8364_s3 + $0x4a0] sm:$0xff] }
 0x18e   : > { %v1256_v31 = vmax.f32 %v1187_v14, 0.0  ;;  %v6454_v41 = vpop.f32.mrf.mxu0  ;;  %v2532_v14 = vld [vmem:[%s8364_s3 + $0x578] sm:$0xff] }
 0x190   : > { %v1193_v61 = vpop.f32.mrf.mxu1  ;;  %2661 = vperm.xlu1 %5684, %v2507_v37   ;;  %2666 = vperm.xlu2 %5685, %v2508_v27   ;;  %v6459_v62 = vpack.c.bf16 %v1257_v10, %v1256_v31  ;;  %v5518_v10 = vld [vmem:[%s8363_s2 + $0x58] sm:$0xff]  ;;  %v1258_v37 = vmax.f32 %v1192_v42, 0.0  ;;  %v5551_v31 = vld [vmem:[%s8363_s2 + $0x140] sm:$0xff] }
 0x191   : > { %2676 = vperm.xlu0 %5686, %v2510_v59  }
 0x192   : > { %8421 = vst [vmem:[#allocation51_spill] sm:$0xff] %v6459_v62  ;;  %v1427_v44 = vpop.permute.xlu1 %1426  ;;  %v6461_v38 = vpop.permute.xlu2 %1536 }
 0x193   : > { %v768_v0 = vpop.permute.xlu0 %767 }
 0x194   : > { %v1194_v18 = vadd.f32 %v1193_v61, %v768_v0 }
 0x196   : > { %v1259_v27 = vmax.f32 %v1194_v18, 0.0  ;;  %v6472_v51 = vpop.f32.mrf.mxu0 }
 0x198   : > { %v2009_v59 = vpop.f32.mrf.mxu1  ;;  %v6480_v61 = vpack.c.bf16 %v1259_v27, %v1258_v37  ;;  %2786 = vperm.xlu1 %5684, %v2532_v14   ;;  %2651 = vperm.xlu2 %5685, %v2505_v32   ;;  %v2530_v14 = vld [vmem:[%s8364_s3 + $0x568] sm:$0xff] }
 0x199   : > { %2781 = vperm.xlu0 %5686, %v2531_v19   ;;  %4937 = vmatmul.msk.bf16.gmra.mxu0 %vm930_vm0, %v5518_v10  ;;  %v2010_v32 = vadd.f32 %v2009_v59, %v1427_v44  ;;  %v2506_v10 = vld [vmem:[%s8364_s3 + $0x4a8] sm:$0xff]  ;;  %v2504_v59 = vld [vmem:[%s8364_s3 + $0x498] sm:$0xff] }
 0x19a   : > { %8422 = vst [vmem:[#allocation52_spill] sm:$0xff] %v6480_v61  ;;  %v6484_v42 = vpop.permute.xlu1 %1581  ;;  %v6486_v0 = vpop.permute.xlu2 %1741 }
 0x19b   : > { %5094 = vmatmul.msk.bf16.gmra.mxu1 %vm930_vm0, %v5551_v31  ;;  %8423 = vst [vmem:[#allocation53_spill] sm:$0xff] %v6484_v42  ;;  %v6488_v18 = vpop.permute.xlu0 %1576  ;;  %v2169_v31 = vmax.f32 %v2010_v32, 0.0  ;;  %v2503_v32 = vld [vmem:[%s8364_s3 + $0x490] sm:$0xff] }
 0x19c   : > { %8424 = vst [vmem:[#allocation54_spill] sm:$0xff] %v6486_v0 }
 0x19e   : > { %v6496_v37 = vpop.f32.mrf.mxu0 }
 0x1a0   : > { %v2011_v27 = vpop.f32.mrf.mxu1  ;;  %2771 = vperm.xlu1 %5684, %v2529_v55   ;;  %2776 = vperm.xlu2 %5685, %v2530_v14   ;;  %v5519_v55 = vld [vmem:[%s8363_s2 + $0x60] sm:$0xff] }
 0x1a1   : > { %v2012_v19 = vadd.f32 %v2011_v27, %v6406_v52  ;;  %2656 = vperm.xlu0 %5686, %v2506_v10   ;;  %v2527_v52 = vld [vmem:[%s8364_s3 + $0x550] sm:$0xff] }
 0x1a2   : > { %v6502_v61 = vpop.permute.xlu1 %1556  ;;  %v6504_v0 = vpop.permute.xlu2 %1726 }
 0x1a3   : > { %v2170_v62 = vmax.f32 %v2012_v19, 0.0  ;;  %8425 = vst [vmem:[#allocation55_spill] sm:$0xff] %v6502_v61  ;;  %v6506_v26 = vpop.permute.xlu0 %1571 }
 0x1a4   : > { %8426 = vst [vmem:[#allocation56_spill] sm:$0xff] %v6504_v0  ;;  %v2501_v0 = vld [vmem:[%s8364_s3 + $0x480] sm:$0xff] }
 0x1a5   : > { %v6508_v44 = vpack.c.bf16 %v2170_v62, %v2169_v31  ;;  %v5552_v62 = vld [vmem:[%s8363_s2 + $0x148] sm:$0xff] }
 0x1a6   : > { %v6519_v14 = vpop.f32.mrf.mxu0 }
 0x1a7   : > { %8427 = vst [vmem:[#allocation57_spill] sm:$0xff] %v6508_v44 }
 0x1a8   : > { %v6527_v10 = vpop.f32.mrf.mxu1  ;;  %2646 = vperm.xlu1 %5684, %v2504_v59   ;;  %2761 = vperm.xlu2 %5685, %v2527_v52   ;;  %v2502_v59 = vld [vmem:[%s8364_s3 + $0x488] sm:$0xff] }
 0x1a9   : > { %8428 = vst [vmem:[#allocation58_spill] sm:$0xff] %v6527_v10  ;;  %2641 = vperm.xlu0 %5686, %v2503_v32   ;;  %4938 = vmatmul.msk.bf16.gmra.mxu0 %vm930_vm0, %v5519_v55  ;;  %v2528_v55 = vld [vmem:[%s8364_s3 + $0x558] sm:$0xff]  ;;  %v1037_v32 = vadd.f32 %v6356_v35, %v6121_v8  ;;  %v2526_v8 = vld [vmem:[%s8364_s3 + $0x548] sm:$0xff] }
 0x1aa   : > { %v6531_v27 = vpop.permute.xlu1 %1551  ;;  %v6533_v19 = vpop.permute.xlu2 %1521  ;;  %v5520_v35 = vld [vmem:[%s8363_s2 + $0x68] sm:$0xff] }
 0x1ab   : > { %5095 = vmatmul.msk.bf16.gmra.mxu1 %vm930_vm0, %v5552_v62  ;;  %8429 = vst [vmem:[#allocation59_spill] sm:$0xff] %v6531_v27  ;;  %v6535_v31 = vpop.permute.xlu0 %1546  ;;  %v1039_v62 = vadd.f32 %v6376_v46, %v6193_v1  ;;  %v1196_v34 = vmax.f32 %v1037_v32, 0.0  ;;  %v2523_v1 = vld [vmem:[%s8364_s3 + $0x530] sm:$0xff] }
 0x1ac   : > { %8430 = vst [vmem:[#allocation60_spill] sm:$0xff] %v6535_v31  ;;  %v2547_v27 = vld [vmem:[%s8364_s3 + $0x5f0] sm:$0xff] }
 0x1ad   : > { %v1197_v6 = vmax.f32 %v1039_v62, 0.0 }
 0x1ae   : > { %v6543_v52 = vpop.f32.mrf.mxu0 }
 0x1af   : > { %v6579_v32 = vpack.c.bf16 %v1197_v6, %v1196_v34  ;;  %v2548_v34 = vld [vmem:[%s8364_s3 + $0x5f8] sm:$0xff] }
 0x1b0   : > { %v6552_v44 = vpop.f32.mrf.mxu1  ;;  %2631 = vperm.xlu1 %5684, %v2501_v0   ;;  %2636 = vperm.xlu2 %5685, %v2502_v59   ;;  %v2525_v0 = vld [vmem:[%s8364_s3 + $0x540] sm:$0xff]  ;;  %v5553_v59 = vld [vmem:[%s8363_s2 + $0x150] sm:$0xff] }
 0x1b1   : > { %8431 = vst [vmem:[#allocation61_spill] sm:$0xff] %v6552_v44  ;;  %2766 = vperm.xlu0 %5686, %v2528_v55  }
 0x1b2   : > { %v6554_v20 = vpop.permute.xlu1 %1736  ;;  %v6556_v48 = vpop.permute.xlu2 %1506  ;;  %8433 = vst [vmem:[#allocation63_spill] sm:$0xff] %v6579_v32 }
 0x1b3   : > { %8432 = vst [vmem:[#allocation62_spill] sm:$0xff] %v6554_v20  ;;  %v6558_v12 = vpop.permute.xlu0 %1541 }
 0x1b6   : > { %v6569_v46 = vpop.f32.mrf.mxu0 }
 0x1b8   : > { %v6577_v55 = vpop.f32.mrf.mxu1  ;;  %2756 = vperm.xlu1 %5684, %v2526_v8   ;;  %2741 = vperm.xlu2 %5685, %v2523_v1   ;;  %v2524_v8 = vld [vmem:[%s8364_s3 + $0x538] sm:$0xff]  ;;  %v1042_v1 = vadd.f32 %v6394_v43, %v6087_v53  ;;  %v2522_v53 = vld [vmem:[%s8364_s3 + $0x528] sm:$0xff]  ;;  %v5521_v43 = vld [vmem:[%s8363_s2 + $0x70] sm:$0xff] }
 0x1b9   : > { %2751 = vperm.xlu0 %5686, %v2525_v0   ;;  %4939 = vmatmul.msk.bf16.gmra.mxu0 %vm930_vm0, %v5520_v35  ;;  %v1044_v35 = vadd.f32 %v6416_v9, %v6153_v25  ;;  %v2545_v25 = vld [vmem:[%s8364_s3 + $0x5e0] sm:$0xff] }
 0x1ba   : > { %v6583_v62 = vpop.permute.xlu1 %1531  ;;  %v6585_v20 = vpop.permute.xlu2 %1711  ;;  %v1198_v32 = vmax.f32 %v1042_v1, 0.0 }
 0x1bb   : > { %5096 = vmatmul.msk.bf16.gmra.mxu1 %vm930_vm0, %v5553_v59  ;;  %8434 = vst [vmem:[#allocation64_spill] sm:$0xff] %v6585_v20  ;;  %v6587_v31 = vpop.permute.xlu0 %1526  ;;  %v1199_v61 = vmax.f32 %v1044_v35, 0.0 }
 0x1bd   : > { %v6631_v1 = vpack.c.bf16 %v1199_v61, %v1198_v32  ;;  %v2520_v61 = vld [vmem:[%s8364_s3 + $0x518] sm:$0xff] }
 0x1be   : > { %v6595_v6 = vpop.f32.mrf.mxu0 }
 0x1bf   : > { %8437 = vst [vmem:[#allocation67_spill] sm:$0xff] %v6631_v1 }
 0x1c0   : > { %v6604_v0 = vpop.f32.mrf.mxu1  ;;  %2861 = vperm.xlu1 %5684, %v2547_v27   ;;  %2866 = vperm.xlu2 %5685, %v2548_v34   ;;  %v2521_v27 = vld [vmem:[%s8364_s3 + $0x520] sm:$0xff]  ;;  %v5554_v34 = vld [vmem:[%s8363_s2 + $0x158] sm:$0xff] }
 0x1c1   : > { %2746 = vperm.xlu0 %5686, %v2524_v8  }
 0x1c2   : > { %v6606_v59 = vpop.permute.xlu1 %1516  ;;  %v6608_v20 = vpop.permute.xlu2 %1686 }
 0x1c3   : > { %8435 = vst [vmem:[#allocation65_spill] sm:$0xff] %v6608_v20  ;;  %v6610_v44 = vpop.permute.xlu0 %1731 }
 0x1c4   : > { %8436 = vst [vmem:[#allocation66_spill] sm:$0xff] %v6610_v44 }
 0x1c6   : > { %v6621_v9 = vpop.f32.mrf.mxu0 }
 0x1c8   : > { %v6629_v8 = vpop.f32.mrf.mxu1  ;;  %2736 = vperm.xlu1 %5684, %v2522_v53   ;;  %2851 = vperm.xlu2 %5685, %v2545_v25   ;;  %v2546_v53 = vld [vmem:[%s8364_s3 + $0x5e8] sm:$0xff]  ;;  %v1047_v25 = vadd.f32 %v6434_v21, %v6047_v30  ;;  %v2544_v30 = vld [vmem:[%s8364_s3 + $0x5d8] sm:$0xff] }
 0x1c9   : > { %2731 = vperm.xlu0 %5686, %v2521_v27   ;;  %4940 = vmatmul.msk.bf16.gmra.mxu0 %vm930_vm0, %v5521_v43  ;;  %v1049_v43 = vadd.f32 %v6454_v41, %v6119_v7  ;;  %v2517_v7 = vld [vmem:[%s8364_s3 + $0x500] sm:$0xff]  ;;  %v5522_v21 = vld [vmem:[%s8363_s2 + $0x78] sm:$0xff]  ;;  %v2543_v41 = vld [vmem:[%s8364_s3 + $0x5d0] sm:$0xff] }
 0x1ca   : > { %v6635_v35 = vpop.permute.xlu1 %1721  ;;  %v6637_v44 = vpop.permute.xlu2 %1681 }
 0x1cb   : > { %5097 = vmatmul.msk.bf16.gmra.mxu1 %vm930_vm0, %v5554_v34  ;;  %8438 = vst [vmem:[#allocation68_spill] sm:$0xff] %v6635_v35  ;;  %v6639_v20 = vpop.permute.xlu0 %1716  ;;  %v1200_v35 = vmax.f32 %v1047_v25, 0.0  ;;  %v1201_v1 = vmax.f32 %v1049_v43, 0.0 }
 0x1cc   : > { %8439 = vst [vmem:[#allocation69_spill] sm:$0xff] %v6637_v44 }
 0x1cd   : > { %8440 = vst [vmem:[#allocation70_spill] sm:$0xff] %v6639_v20  ;;  %v6683_v25 = vpack.c.bf16 %v1201_v1, %v1200_v35  ;;  %v2542_v1 = vld [vmem:[%s8364_s3 + $0x5c8] sm:$0xff] }
 0x1ce   : > { %v6647_v32 = vpop.f32.mrf.mxu0 }
 0x1cf   : > { %8443 = vst [vmem:[#allocation73_spill] sm:$0xff] %v6683_v25 }
 0x1d0   : > { %v6656_v27 = vpop.f32.mrf.mxu1  ;;  %2721 = vperm.xlu1 %5684, %v2519_v45   ;;  %2726 = vperm.xlu2 %5685, %v2520_v61   ;;  %v5555_v61 = vld [vmem:[%s8363_s2 + $0x160] sm:$0xff] }
 0x1d1   : > { %2856 = vperm.xlu0 %5686, %v2546_v53  }
 0x1d2   : > { %v6658_v34 = vpop.permute.xlu1 %1706  ;;  %v6660_v20 = vpop.permute.xlu2 %2701 }
 0x1d3   : > { %8441 = vst [vmem:[#allocation71_spill] sm:$0xff] %v6658_v34  ;;  %v6662_v44 = vpop.permute.xlu0 %1511 }
 0x1d4   : > { %8442 = vst [vmem:[#allocation72_spill] sm:$0xff] %v6660_v20 }
 0x1d6   : > { %v6673_v45 = vpop.f32.mrf.mxu0 }
 0x1d8   : > { %v6681_v53 = vpop.f32.mrf.mxu1  ;;  %2846 = vperm.xlu1 %5684, %v2544_v30   ;;  %2711 = vperm.xlu2 %5685, %v2517_v7   ;;  %v2518_v30 = vld [vmem:[%s8364_s3 + $0x508] sm:$0xff]  ;;  %v1052_v7 = vadd.f32 %v6472_v51, %v6017_v16  ;;  %v2540_v16 = vld [vmem:[%s8364_s3 + $0x5b8] sm:$0xff] }
 0x1d9   : > { %2841 = vperm.xlu0 %5686, %v2543_v41   ;;  %4941 = vmatmul.msk.bf16.gmra.mxu0 %vm930_vm0, %v5522_v21  ;;  %v1054_v21 = vadd.f32 %v6496_v37, %v6085_v50  ;;  %v2537_v50 = vld [vmem:[%s8364_s3 + $0x5a0] sm:$0xff]  ;;  %v2539_v37 = vld [vmem:[%s8364_s3 + $0x5b0] sm:$0xff] }
 0x1da   : > { %v6687_v43 = vpop.permute.xlu1 %1701  ;;  %v6689_v20 = vpop.permute.xlu2 %2696 }
 0x1db   : > { %5098 = vmatmul.msk.bf16.gmra.mxu1 %vm930_vm0, %v5555_v61  ;;  %8444 = vst [vmem:[#allocation74_spill] sm:$0xff] %v6687_v43  ;;  %v6691_v34 = vpop.permute.xlu0 %1696  ;;  %v1202_v43 = vmax.f32 %v1052_v7, 0.0 }
 0x1dc   : > { %8445 = vst [vmem:[#allocation75_spill] sm:$0xff] %v6689_v20 }
 0x1dd   : > { %8446 = vst [vmem:[#allocation76_spill] sm:$0xff] %v6691_v34  ;;  %v1203_v34 = vmax.f32 %v1054_v21, 0.0 }
 0x1de   : > { %v6699_v35 = vpop.f32.mrf.mxu0 }
 0x1df   : > { %v6735_v7 = vpack.c.bf16 %v1203_v34, %v1202_v43  ;;  %v2536_v34 = vld [vmem:[%s8364_s3 + $0x598] sm:$0xff] }
 0x1e0   : > { %v6708_v41 = vpop.f32.mrf.mxu1  ;;  %2831 = vperm.xlu1 %5684, %v2541_v13   ;;  %2836 = vperm.xlu2 %5685, %v2542_v1   ;;  %v5523_v13 = vld [vmem:[%s8363_s2 + $0x80] sm:$0xff]  ;;  %v5556_v1 = vld [vmem:[%s8363_s2 + $0x168] sm:$0xff] }
 0x1e1   : > { %2716 = vperm.xlu0 %5686, %v2518_v30   ;;  %8450 = vst [vmem:[#allocation80_spill] sm:$0xff] %v6735_v7 }
 0x1e2   : > { %v6710_v61 = vpop.permute.xlu1 %1676  ;;  %v6712_v20 = vpop.permute.xlu2 %2671 }
 0x1e3   : > { %8447 = vst [vmem:[#allocation77_spill] sm:$0xff] %v6710_v61  ;;  %v6714_v25 = vpop.permute.xlu0 %1691  ;;  %v2535_v61 = vld [vmem:[%s8364_s3 + $0x590] sm:$0xff] }
 0x1e4   : > { %8448 = vst [vmem:[#allocation78_spill] sm:$0xff] %v6712_v20 }
 0x1e5   : > { %8449 = vst [vmem:[#allocation79_spill] sm:$0xff] %v6714_v25 }
 0x1e6   : > { %v6725_v51 = vpop.f32.mrf.mxu0 }
 0x1e8   : > { %v6733_v30 = vpop.f32.mrf.mxu1  ;;  %2826 = vperm.xlu1 %5684, %v2540_v16   ;;  %2811 = vperm.xlu2 %5685, %v2537_v50   ;;  %v2538_v16 = vld [vmem:[%s8364_s3 + $0x5a8] sm:$0xff]  ;;  %v1057_v50 = vadd.f32 %v6519_v14, %v5991_v3 }
 0x1e9   : > { %2821 = vperm.xlu0 %5686, %v2539_v37   ;;  %4942 = vmatmul.msk.bf16.gmra.mxu0 %vm930_vm0, %v5523_v13  ;;  %v1059_v13 = vadd.f32 %v6543_v52, %v6045_v28  ;;  %v2534_v3 = vld [vmem:[%s8364_s3 + $0x588] sm:$0xff]  ;;  %v1374_v28 = vld [vmem:[%s8364_s3 + $0x270] sm:$0xff] }
 0x1ea   : > { %v6739_v21 = vpop.permute.xlu1 %1671  ;;  %v6741_v20 = vpop.permute.xlu2 %2666  ;;  %v1204_v7 = vmax.f32 %v1057_v50, 0.0  ;;  %v5524_v14 = vld [vmem:[%s8363_s2 + $0x88] sm:$0xff] }
 0x1eb   : > { %5099 = vmatmul.msk.bf16.gmra.mxu1 %vm930_vm0, %v5556_v1  ;;  %8451 = vst [vmem:[#allocation81_spill] sm:$0xff] %v6739_v21  ;;  %v6743_v25 = vpop.permute.xlu0 %1666  ;;  %v1205_v21 = vmax.f32 %v1059_v13, 0.0 }
 0x1ec   : > { %8452 = vst [vmem:[#allocation82_spill] sm:$0xff] %v6741_v20 }
 0x1ed   : > { %8453 = vst [vmem:[#allocation83_spill] sm:$0xff] %v6743_v25  ;;  %v6787_v50 = vpack.c.bf16 %v1205_v21, %v1204_v7  ;;  %v1373_v7 = vld [vmem:[%s8364_s3 + $0x268] sm:$0xff] }
 0x1ee   : > { %v6751_v43 = vpop.f32.mrf.mxu0 }
 0x1ef   : > { %8457 = vst [vmem:[#allocation87_spill] sm:$0xff] %v6787_v50 }
 0x1f0   : > { %v6760_v37 = vpop.f32.mrf.mxu1  ;;  %2801 = vperm.xlu1 %5684, %v2535_v61   ;;  %2806 = vperm.xlu2 %5685, %v2536_v34   ;;  %v2533_v61 = vld [vmem:[%s8364_s3 + $0x580] sm:$0xff]  ;;  %v5557_v34 = vld [vmem:[%s8363_s2 + $0x170] sm:$0xff] }
 0x1f1   : > { %2816 = vperm.xlu0 %5686, %v2538_v16  }
 0x1f2   : > { %v6762_v1 = vpop.permute.xlu1 %2691  ;;  %v6764_v20 = vpop.permute.xlu2 %2651 }
 0x1f3   : > { %8454 = vst [vmem:[#allocation84_spill] sm:$0xff] %v6762_v1  ;;  %v6766_v25 = vpop.permute.xlu0 %2706 }
 0x1f4   : > { %8455 = vst [vmem:[#allocation85_spill] sm:$0xff] %v6764_v20  ;;  %v1372_v20 = vld [vmem:[%s8364_s3 + $0x260] sm:$0xff] }
 0x1f5   : > { %8456 = vst [vmem:[#allocation86_spill] sm:$0xff] %v6766_v25 }
 0x1f6   : > { %v6777_v52 = vpop.f32.mrf.mxu0 }
 0x1f8   : > { %v6785_v16 = vpop.f32.mrf.mxu1  ;;  %2796 = vperm.xlu1 %5684, %v2534_v3   ;;  %1496 = vperm.xlu2 %5685, %v1374_v28   ;;  %v1375_v3 = vld [vmem:[%s8364_s3 + $0x278] sm:$0xff]  ;;  %v1062_v28 = vadd.f32 %v6569_v46, %v5965_v57 }
 0x1f9   : > { %2791 = vperm.xlu0 %5686, %v2533_v61   ;;  %4943 = vmatmul.msk.bf16.gmra.mxu0 %vm930_vm0, %v5524_v14  ;;  %v1064_v14 = vadd.f32 %v6595_v6, %v6015_v15  ;;  %v1371_v57 = vld [vmem:[%s8364_s3 + $0x258] sm:$0xff]  ;;  %v1368_v15 = vld [vmem:[%s8364_s3 + $0x240] sm:$0xff]  ;;  %v1370_v6 = vld [vmem:[%s8364_s3 + $0x250] sm:$0xff] }
 0x1fa   : > { %v6791_v13 = vpop.permute.xlu1 %2686  ;;  %v6793_v1 = vpop.permute.xlu2 %2776 }
 0x1fb   : > { %5100 = vmatmul.msk.bf16.gmra.mxu1 %vm930_vm0, %v5557_v34  ;;  %8458 = vst [vmem:[#allocation88_spill] sm:$0xff] %v6791_v13  ;;  %v6795_v25 = vpop.permute.xlu0 %2681  ;;  %v1207_v13 = vmax.f32 %v1064_v14, 0.0 }
 0x1fc   : > { %8459 = vst [vmem:[#allocation89_spill] sm:$0xff] %v6793_v1 }
 0x1fd   : > { %8460 = vst [vmem:[#allocation90_spill] sm:$0xff] %v6795_v25  ;;  %v1206_v25 = vmax.f32 %v1062_v28, 0.0 }
 0x1fe   : > { %v6803_v21 = vpop.f32.mrf.mxu0 }
 0x1ff   : > { %v6839_v28 = vpack.c.bf16 %v1207_v13, %v1206_v25  ;;  %v1367_v25 = vld [vmem:[%s8364_s3 + $0x238] sm:$0xff] }
 0x200   : > { %v6812_v61 = vpop.f32.mrf.mxu1  ;;  %1486 = vperm.xlu1 %5684, %v1372_v20   ;;  %1491 = vperm.xlu2 %5685, %v1373_v7   ;;  %v5525_v20 = vld [vmem:[%s8363_s2 + $0x90] sm:$0xff]  ;;  %v5558_v7 = vld [vmem:[%s8363_s2 + $0x178] sm:$0xff] }
 0x201   : > { %1501 = vperm.xlu0 %5686, %v1375_v3   ;;  %8464 = vst [vmem:[#allocation94_spill] sm:$0xff] %v6839_v28 }
 0x202   : > { %v6814_v34 = vpop.permute.xlu1 %2661  ;;  %v6816_v1 = vpop.permute.xlu2 %2761 }
 0x203   : > { %8461 = vst [vmem:[#allocation91_spill] sm:$0xff] %v6814_v34  ;;  %v6818_v50 = vpop.permute.xlu0 %2676  ;;  %v1366_v34 = vld [vmem:[%s8364_s3 + $0x230] sm:$0xff] }
 0x204   : > { %8462 = vst [vmem:[#allocation92_spill] sm:$0xff] %v6816_v1 }
 0x205   : > { %8463 = vst [vmem:[#allocation93_spill] sm:$0xff] %v6818_v50 }
 0x206   : > { %v6829_v46 = vpop.f32.mrf.mxu0 }
 0x208   : > { %v6837_v3 = vpop.f32.mrf.mxu1  ;;  %1481 = vperm.xlu1 %5684, %v1371_v57   ;;  %1466 = vperm.xlu2 %5685, %v1368_v15   ;;  %v1369_v57 = vld [vmem:[%s8364_s3 + $0x248] sm:$0xff]  ;;  %v1067_v15 = vadd.f32 %v6621_v9, %v5939_v47  ;;  %v5526_v9 = vld [vmem:[%s8363_s2 + $0x98] sm:$0xff] }
 0x209   : > { %1476 = vperm.xlu0 %5686, %v1370_v6   ;;  %4944 = vmatmul.msk.bf16.gmra.mxu0 %vm930_vm0, %v5525_v20  ;;  %v1069_v20 = vadd.f32 %v6647_v32, %v5989_v2  ;;  %v1365_v47 = vld [vmem:[%s8364_s3 + $0x228] sm:$0xff]  ;;  %v1362_v2 = vld [vmem:[%s8364_s3 + $0x210] sm:$0xff] }
 0x20a   : > { %v6843_v14 = vpop.permute.xlu1 %2786  ;;  %v6845_v1 = vpop.permute.xlu2 %2636 }
 0x20b   : > { %5101 = vmatmul.msk.bf16.gmra.mxu1 %vm930_vm0, %v5558_v7  ;;  %8465 = vst [vmem:[#allocation95_spill] sm:$0xff] %v6843_v14  ;;  %v6847_v50 = vpop.permute.xlu0 %2781 }
 0x20c   : > { %8466 = vst [vmem:[#allocation96_spill] sm:$0xff] %v6845_v1  ;;  %v1209_v1 = vmax.f32 %v1069_v20, 0.0 }
 0x20d   : > { %8467 = vst [vmem:[#allocation97_spill] sm:$0xff] %v6847_v50  ;;  %v1208_v50 = vmax.f32 %v1067_v15, 0.0 }
 0x20e   : > { %v6855_v13 = vpop.f32.mrf.mxu0 }
 0x20f   : > { %v6889_v15 = vpack.c.bf16 %v1209_v1, %v1208_v50  ;;  %v2486_v1 = vld [vmem:[%s8364_s3 + $0x408] sm:$0xff] }
 0x210   : > { %v6864_v6 = vpop.f32.mrf.mxu1  ;;  %1456 = vperm.xlu1 %5684, %v1366_v34   ;;  %1461 = vperm.xlu2 %5685, %v1367_v25   ;;  %v1364_v34 = vld [vmem:[%s8364_s3 + $0x220] sm:$0xff] }
 0x211   : > { %1471 = vperm.xlu0 %5686, %v1369_v57   ;;  %v5559_v25 = vld [vmem:[%s8363_s2 + $0x180] sm:$0xff]  ;;  %8471 = vst [vmem:[#allocation101_spill] sm:$0xff] %v6889_v15 }
 0x212   : > { %v6866_v7 = vpop.permute.xlu1 %2771  ;;  %v6868_v14 = vpop.permute.xlu2 %2741 }
 0x213   : > { %8468 = vst [vmem:[#allocation98_spill] sm:$0xff] %v6866_v7  ;;  %v6870_v28 = vpop.permute.xlu0 %2656 }
 0x214   : > { %8469 = vst [vmem:[#allocation99_spill] sm:$0xff] %v6868_v14 }
 0x215   : > { %8470 = vst [vmem:[#allocation100_spill] sm:$0xff] %v6870_v28  ;;  %v2485_v28 = vld [vmem:[%s8364_s3 + $0x400] sm:$0xff] }
 0x216   : > { %v6881_v32 = vpop.f32.mrf.mxu0 }
 0x218   : > { %v2049_v57 = vpop.f32.mrf.mxu1  ;;  %1451 = vperm.xlu1 %5684, %v1365_v47   ;;  %1436 = vperm.xlu2 %5685, %v1362_v2   ;;  %v1363_v2 = vld [vmem:[%s8364_s3 + $0x218] sm:$0xff] }
 0x219   : > { %1446 = vperm.xlu0 %5686, %v1364_v34   ;;  %4945 = vmatmul.msk.bf16.gmra.mxu0 %vm930_vm0, %v5526_v9  ;;  %v2050_v50 = vadd.f32 %v2049_v57, %v6556_v48  ;;  %v1072_v9 = vadd.f32 %v6673_v45, %v5919_v39  ;;  %v1074_v34 = vadd.f32 %v6699_v35, %v5963_v56  ;;  %v2488_v56 = vld [vmem:[%s8364_s3 + $0x418] sm:$0xff]  ;;  %v5527_v45 = vld [vmem:[%s8363_s2 + $0xa0] sm:$0xff] }
 0x21a   : > { %v6893_v20 = vpop.permute.xlu1 %2646  ;;  %v6895_v7 = vpop.permute.xlu2 %2866 }
 0x21b   : > { %5102 = vmatmul.msk.bf16.gmra.mxu1 %vm930_vm0, %v5559_v25  ;;  %8472 = vst [vmem:[#allocation102_spill] sm:$0xff] %v6893_v20  ;;  %v6897_v14 = vpop.permute.xlu0 %2641  ;;  %v2185_v20 = vmax.f32 %v2050_v50, 0.0  ;;  %v1210_v15 = vmax.f32 %v1072_v9, 0.0  ;;  %v1211_v10 = vmax.f32 %v1074_v34, 0.0  ;;  %v2491_v34 = vld [vmem:[%s8364_s3 + $0x430] sm:$0xff] }
 0x21c   : > { %8473 = vst [vmem:[#allocation103_spill] sm:$0xff] %v6895_v7 }
 0x21d   : > { %8474 = vst [vmem:[#allocation104_spill] sm:$0xff] %v6897_v14 }
 0x21e   : > { %v6906_v47 = vpop.f32.mrf.mxu0 }
 0x220   : > { %v2051_v25 = vpop.f32.mrf.mxu1  ;;  %2551 = vperm.xlu1 %5684, %v2485_v28   ;;  %2556 = vperm.xlu2 %5685, %v2486_v1   ;;  %v5560_v28 = vld [vmem:[%s8363_s2 + $0x188] sm:$0xff]  ;;  %v6941_v1 = vpack.c.bf16 %v1211_v10, %v1210_v15  ;;  %v2492_v10 = vld [vmem:[%s8364_s3 + $0x438] sm:$0xff] }
 0x221   : > { %v2052_v7 = vadd.f32 %v2051_v25, %v6662_v44  ;;  %1441 = vperm.xlu0 %5686, %v1363_v2   ;;  %v2489_v44 = vld [vmem:[%s8364_s3 + $0x420] sm:$0xff] }
 0x222   : > { %v6916_v57 = vpop.permute.xlu1 %2631  ;;  %v6918_v14 = vpop.permute.xlu2 %2851 }
 0x223   : > { %v2186_v48 = vmax.f32 %v2052_v7, 0.0  ;;  %8475 = vst [vmem:[#allocation105_spill] sm:$0xff] %v6916_v57  ;;  %v6920_v42 = vpop.permute.xlu0 %2766  ;;  %v2487_v7 = vld [vmem:[%s8364_s3 + $0x410] sm:$0xff]  ;;  %v8572_v57 = vld [vmem:[#allocation8_spill] sm:$0xff] }
 0x224   : > { %8476 = vst [vmem:[#allocation106_spill] sm:$0xff] %v6918_v14 }
 0x225   : > { %8477 = vst [vmem:[#allocation107_spill] sm:$0xff] %v6920_v42  ;;  %v6922_v39 = vpack.c.bf16 %v2186_v48, %v2185_v20  ;;  %v2490_v48 = vld [vmem:[%s8364_s3 + $0x428] sm:$0xff] }
 0x226   : > { %v6933_v35 = vpop.f32.mrf.mxu0 }
 0x228   : > { %v2054_v20 = vpop.f32.mrf.mxu1  ;;  %2566 = vperm.xlu1 %5684, %v2488_v56   ;;  %2571 = vperm.xlu2 %5685, %v2489_v44   ;;  %v1077_v56 = vadd.f32 %v6725_v51, %v6191_v60  ;;  %v1079_v44 = vadd.f32 %v6751_v43, %v6269_v54  ;;  %v2494_v54 = vld [vmem:[%s8364_s3 + $0x448] sm:$0xff] }
 0x229   : > { %4946 = vmatmul.msk.bf16.gmra.mxu0 %vm930_vm0, %v5527_v45  ;;  %2561 = vperm.xlu0 %5686, %v2487_v7   ;;  %v2055_v15 = vadd.f32 %v2054_v20, %v6606_v59  ;;  %v5528_v51 = vld [vmem:[%s8363_s2 + $0xa8] sm:$0xff] }
 0x22a   : > { %v6945_v50 = vpop.permute.xlu1 %2756  ;;  %v6947_v2 = vpop.permute.xlu2 %2726 }
 0x22b   : > { %5103 = vmatmul.msk.bf16.gmra.mxu1 %vm930_vm0, %v5560_v28  ;;  %8478 = vst [vmem:[#allocation108_spill] sm:$0xff] %v6945_v50  ;;  %v6949_v9 = vpop.permute.xlu0 %2751  ;;  %v2187_v7 = vmax.f32 %v2055_v15, 0.0  ;;  %v1213_v50 = vmax.f32 %v1079_v44, 0.0 }
 0x22c   : > { %8479 = vst [vmem:[#allocation109_spill] sm:$0xff] %v6947_v2 }
 0x22d   : > { %8480 = vst [vmem:[#allocation110_spill] sm:$0xff] %v6949_v9  ;;  %v1212_v9 = vmax.f32 %v1077_v56, 0.0 }
 0x22e   : > { %v6958_v25 = vpop.f32.mrf.mxu0 }
 0x230   : > { %v2056_v45 = vpop.f32.mrf.mxu1  ;;  %2581 = vperm.xlu1 %5684, %v2491_v34   ;;  %2586 = vperm.xlu2 %5685, %v2492_v10   ;;  %v5561_v34 = vld [vmem:[%s8363_s2 + $0x190] sm:$0xff]  ;;  %v2493_v10 = vld [vmem:[%s8364_s3 + $0x440] sm:$0xff] }
 0x231   : > { %v2057_v28 = vadd.f32 %v2056_v45, %v6533_v19  ;;  %2576 = vperm.xlu0 %5686, %v2490_v48   ;;  %v2495_v19 = vld [vmem:[%s8364_s3 + $0x450] sm:$0xff]  ;;  %v6993_v48 = vpack.c.bf16 %v1213_v50, %v1212_v9  ;;  %v3567_v50 = vld [vmem:[%s8364_s3 + $0x6f8] sm:$0xff] }
 0x232   : > { %v6968_v20 = vpop.permute.xlu1 %2861  ;;  %v6970_v14 = vpop.permute.xlu2 %2711 }
 0x233   : > { %v2188_v59 = vmax.f32 %v2057_v28, 0.0  ;;  %8481 = vst [vmem:[#allocation111_spill] sm:$0xff] %v6968_v20  ;;  %v6972_v42 = vpop.permute.xlu0 %2746  ;;  %v3566_v28 = vld [vmem:[%s8364_s3 + $0x6f0] sm:$0xff] }
 0x234   : > { %8482 = vst [vmem:[#allocation112_spill] sm:$0xff] %v6970_v14 }
 0x235   : > { %8483 = vst [vmem:[#allocation113_spill] sm:$0xff] %v6972_v42  ;;  %v6974_v60 = vpack.c.bf16 %v2188_v59, %v2187_v7  ;;  %v2496_v59 = vld [vmem:[%s8364_s3 + $0x458] sm:$0xff] }
 0x236   : > { %v6985_v43 = vpop.f32.mrf.mxu0 }
 0x238   : > { %v2059_v15 = vpop.f32.mrf.mxu1  ;;  %2596 = vperm.xlu1 %5684, %v2494_v54   ;;  %2601 = vperm.xlu2 %5685, %v2495_v19   ;;  %v1082_v54 = vadd.f32 %v6777_v52, %v6265_v33  ;;  %v1084_v19 = vadd.f32 %v6803_v21, %v6214_v17  ;;  %v2500_v17 = vld [vmem:[%s8364_s3 + $0x478] sm:$0xff]  ;;  %v5529_v52 = vld [vmem:[%s8363_s2 + $0xb0] sm:$0xff] }
 0x239   : > { %4947 = vmatmul.msk.bf16.gmra.mxu0 %vm930_vm0, %v5528_v51  ;;  %2591 = vperm.xlu0 %5686, %v2493_v10   ;;  %v2060_v9 = vadd.f32 %v2059_v15, %v6587_v31 }
 0x23a   : > { %v6997_v56 = vpop.permute.xlu1 %2736  ;;  %v6999_v44 = vpop.permute.xlu2 %2836  ;;  %v1214_v20 = vmax.f32 %v1082_v54, 0.0  ;;  %v1215_v42 = vmax.f32 %v1084_v19, 0.0 }
 0x23b   : > { %5104 = vmatmul.msk.bf16.gmra.mxu1 %vm930_vm0, %v5561_v34  ;;  %8484 = vst [vmem:[#allocation114_spill] sm:$0xff] %v6997_v56  ;;  %v7001_v45 = vpop.permute.xlu0 %2731  ;;  %v2189_v10 = vmax.f32 %v2060_v9, 0.0 }
 0x23c   : > { %8485 = vst [vmem:[#allocation115_spill] sm:$0xff] %v6999_v44 }
 0x23d   : > { %8486 = vst [vmem:[#allocation116_spill] sm:$0xff] %v7001_v45  ;;  %v8565_v45 = vld [vmem:[#allocation44_spill] sm:$0xff] }
 0x23e   : > { %v7010_v7 = vpop.f32.mrf.mxu0 }
 0x240   : > { %v2061_v51 = vpop.f32.mrf.mxu1  ;;  %3752 = vperm.xlu1 %5684, %v3566_v28   ;;  %3757 = vperm.xlu2 %5685, %v3567_v50   ;;  %v5562_v28 = vld [vmem:[%s8363_s2 + $0x198] sm:$0xff]  ;;  %v2499_v50 = vld [vmem:[%s8364_s3 + $0x470] sm:$0xff] }
 0x241   : > { %v2062_v34 = vadd.f32 %v2061_v51, %v6583_v62  ;;  %2606 = vperm.xlu0 %5686, %v2496_v59   ;;  %v3564_v62 = vld [vmem:[%s8364_s3 + $0x6e0] sm:$0xff]  ;;  %v7045_v59 = vpack.c.bf16 %v1215_v42, %v1214_v20  ;;  %v3551_v42 = vld [vmem:[%s8364_s3 + $0x678] sm:$0xff] }
 0x242   : > { %v7020_v15 = vpop.permute.xlu1 %2721  ;;  %v7022_v44 = vpop.permute.xlu2 %2811 }
 0x243   : > { %v2190_v31 = vmax.f32 %v2062_v34, 0.0  ;;  %8487 = vst [vmem:[#allocation117_spill] sm:$0xff] %v7020_v15  ;;  %v7024_v56 = vpop.permute.xlu0 %2856  ;;  %v3550_v34 = vld [vmem:[%s8364_s3 + $0x670] sm:$0xff] }
 0x244   : > { %8488 = vst [vmem:[#allocation118_spill] sm:$0xff] %v7022_v44 }
 0x245   : > { %8489 = vst [vmem:[#allocation119_spill] sm:$0xff] %v7024_v56  ;;  %v7026_v33 = vpack.c.bf16 %v2190_v31, %v2189_v10  ;;  %v3565_v31 = vld [vmem:[%s8364_s3 + $0x6e8] sm:$0xff] }
 0x246   : > { %v7037_v21 = vpop.f32.mrf.mxu0 }
 0x248   : > { %v2064_v9 = vpop.f32.mrf.mxu1  ;;  %2626 = vperm.xlu1 %5684, %v2500_v17   ;;  %3742 = vperm.xlu2 %5685, %v3564_v62   ;;  %v1087_v17 = vadd.f32 %v6829_v46, %v6292_v22  ;;  %v1089_v62 = vadd.f32 %v6855_v13, %v6288_v24  ;;  %v2498_v24 = vld [vmem:[%s8364_s3 + $0x468] sm:$0xff]  ;;  %v5530_v46 = vld [vmem:[%s8363_s2 + $0xb8] sm:$0xff] }
 0x249   : > { %4948 = vmatmul.msk.bf16.gmra.mxu0 %vm930_vm0, %v5529_v52  ;;  %2621 = vperm.xlu0 %5686, %v2499_v50   ;;  %v2065_v20 = vadd.f32 %v2064_v9, %v6461_v38 }
 0x24a   : > { %v7049_v54 = vpop.permute.xlu1 %2846  ;;  %v7051_v19 = vpop.permute.xlu2 %2806  ;;  %v1217_v56 = vmax.f32 %v1089_v62, 0.0 }
 0x24b   : > { %5105 = vmatmul.msk.bf16.gmra.mxu1 %vm930_vm0, %v5562_v28  ;;  %8490 = vst [vmem:[#allocation120_spill] sm:$0xff] %v7049_v54  ;;  %v7053_v51 = vpop.permute.xlu0 %2841  ;;  %v2191_v50 = vmax.f32 %v2065_v20, 0.0  ;;  %v1216_v54 = vmax.f32 %v1087_v17, 0.0 }
 0x24c   : > { %8491 = vst [vmem:[#allocation121_spill] sm:$0xff] %v7051_v19 }
 0x24d   : > { %8492 = vst [vmem:[#allocation122_spill] sm:$0xff] %v7053_v51 }
 0x24e   : > { %v7062_v10 = vpop.f32.mrf.mxu0 }
 0x250   : > { %v2066_v52 = vpop.f32.mrf.mxu1  ;;  %3672 = vperm.xlu1 %5684, %v3550_v34   ;;  %3677 = vperm.xlu2 %5685, %v3551_v42   ;;  %v5563_v34 = vld [vmem:[%s8363_s2 + $0x1a0] sm:$0xff] }
 0x251   : > { %v2067_v28 = vadd.f32 %v2066_v52, %v6558_v12  ;;  %3747 = vperm.xlu0 %5686, %v3565_v31   ;;  %v3562_v12 = vld [vmem:[%s8364_s3 + $0x6d0] sm:$0xff]  ;;  %v2497_v42 = vld [vmem:[%s8364_s3 + $0x460] sm:$0xff]  ;;  %v7097_v31 = vpack.c.bf16 %v1217_v56, %v1216_v54  ;;  %v3549_v56 = vld [vmem:[%s8364_s3 + $0x668] sm:$0xff] }
 0x252   : > { %v7072_v9 = vpop.permute.xlu1 %2831  ;;  %v7074_v51 = vpop.permute.xlu2 %1496 }
 0x253   : > { %v2192_v38 = vmax.f32 %v2067_v28, 0.0  ;;  %8493 = vst [vmem:[#allocation123_spill] sm:$0xff] %v7072_v9  ;;  %v7076_v44 = vpop.permute.xlu0 %2716 }
 0x254   : > { %8494 = vst [vmem:[#allocation124_spill] sm:$0xff] %v7076_v44  ;;  %v8571_v44 = vld [vmem:[#allocation5_spill] sm:$0xff] }
 0x255   : > { %v7078_v22 = vpack.c.bf16 %v2192_v38, %v2191_v50  ;;  %v3548_v50 = vld [vmem:[%s8364_s3 + $0x660] sm:$0xff]  ;;  %v3563_v38 = vld [vmem:[%s8364_s3 + $0x6d8] sm:$0xff] }
 0x256   : > { %v1111_v13 = vpop.f32.mrf.mxu0 }
 0x257   : > { %v1112_v52 = vadd.f32 %v1111_v13, %v6341_v63  ;;  %v1094_v63 = vadd.f32 %v6906_v47, %v6307_v23  ;;  %v3546_v23 = vld [vmem:[%s8364_s3 + $0x650] sm:$0xff] }
 0x258   : > { %v7095_v20 = vpop.f32.mrf.mxu1  ;;  %2616 = vperm.xlu1 %5684, %v2498_v24   ;;  %3732 = vperm.xlu2 %5685, %v3562_v12   ;;  %v1092_v24 = vadd.f32 %v6881_v32, %v6229_v36  ;;  %v5531_v32 = vld [vmem:[%s8363_s2 + $0xc0] sm:$0xff] }
 0x259   : > { %4949 = vmatmul.msk.bf16.gmra.mxu0 %vm930_vm0, %v5530_v46  ;;  %2611 = vperm.xlu0 %5686, %v2497_v42   ;;  %v1226_v12 = vmax.f32 %v1112_v52, 0.0  ;;  %v5564_v52 = vld [vmem:[%s8363_s2 + $0x1a8] sm:$0xff] }
 0x25a   : > { %v7101_v17 = vpop.permute.xlu1 %2826  ;;  %v1492_v62 = vpop.permute.xlu2 %1491 }
 0x25b   : > { %5106 = vmatmul.msk.bf16.gmra.mxu1 %vm930_vm0, %v5563_v34  ;;  %8495 = vst [vmem:[#allocation125_spill] sm:$0xff] %v7101_v17  ;;  %v7104_v28 = vpop.permute.xlu0 %2821  ;;  %v1218_v17 = vmax.f32 %v1092_v24, 0.0 }
 0x25c   : > { %8496 = vst [vmem:[#allocation126_spill] sm:$0xff] %v7104_v28  ;;  %v1219_v28 = vmax.f32 %v1094_v63, 0.0 }
 0x25e   : > { %v1113_v54 = vpop.f32.mrf.mxu0 }
 0x25f   : > { %v1114_v46 = vadd.f32 %v1113_v54, %v6290_v4  ;;  %v3561_v4 = vld [vmem:[%s8364_s3 + $0x6c8] sm:$0xff]  ;;  %v7149_v54 = vpack.c.bf16 %v1219_v28, %v1218_v17  ;;  %v3583_v17 = vld [vmem:[%s8364_s3 + $0x778] sm:$0xff] }
 0x260   : > { %v7120_v13 = vpop.f32.mrf.mxu1  ;;  %3662 = vperm.xlu1 %5684, %v3548_v50   ;;  %3667 = vperm.xlu2 %5685, %v3549_v56   ;;  %v3560_v50 = vld [vmem:[%s8364_s3 + $0x6c0] sm:$0xff] }
 0x261   : > { %v1227_v34 = vmax.f32 %v1114_v46, 0.0  ;;  %3737 = vperm.xlu0 %5686, %v3563_v38   ;;  %v3547_v46 = vld [vmem:[%s8364_s3 + $0x658] sm:$0xff] }
 0x262   : > { %v7122_v42 = vpop.permute.xlu1 %2801  ;;  %v7124_v9 = vpop.permute.xlu2 %1466 }
 0x263   : > { %8497 = vst [vmem:[#allocation127_spill] sm:$0xff] %v7122_v42  ;;  %v7126_v19 = vpack.c.bf16 %v1227_v34, %v1226_v12  ;;  %v7128_v36 = vpop.permute.xlu0 %2816  ;;  %v3582_v12 = vld [vmem:[%s8364_s3 + $0x770] sm:$0xff]  ;;  %v1097_v34 = vadd.f32 %v6933_v35, %v6303_v5 }
 0x264   : > { %8498 = vst [vmem:[#allocation128_spill] sm:$0xff] %v7128_v36  ;;  %v3598_v35 = vld [vmem:[%s8364_s3 + $0x7f0] sm:$0xff] }
 0x265   : > { %v1220_v36 = vmax.f32 %v1097_v34, 0.0 }
 0x266   : > { %v7139_v47 = vpop.f32.mrf.mxu0 }
 0x268   : > { %v7147_v56 = vpop.f32.mrf.mxu1  ;;  %3727 = vperm.xlu1 %5684, %v3561_v4   ;;  %3652 = vperm.xlu2 %5685, %v3546_v23   ;;  %v1099_v4 = vadd.f32 %v6958_v25, %v6252_v11  ;;  %v3559_v11 = vld [vmem:[%s8364_s3 + $0x6b8] sm:$0xff] }
 0x269   : > { %4950 = vmatmul.msk.bf16.gmra.mxu0 %vm930_vm0, %v5531_v32  ;;  %3722 = vperm.xlu0 %5686, %v3560_v50   ;;  %v2045_v32 = vadd.f32 %v6837_v3, %v7074_v51  ;;  %v5532_v3 = vld [vmem:[%s8363_s2 + $0xc8] sm:$0xff]  ;;  %v2042_v51 = vadd.f32 %v6812_v61, %v1492_v62 }
 0x26a   : > { %v7153_v38 = vpop.permute.xlu1 %2796  ;;  %v7155_v24 = vpop.permute.xlu2 %1461  ;;  %v1221_v42 = vmax.f32 %v1099_v4, 0.0 }
 0x26b   : > { %5107 = vmatmul.msk.bf16.gmra.mxu1 %vm930_vm0, %v5564_v52  ;;  %8499 = vst [vmem:[#allocation129_spill] sm:$0xff] %v7153_v38  ;;  %v7157_v63 = vpop.permute.xlu0 %2791  ;;  %v2183_v25 = vmax.f32 %v2045_v32, 0.0  ;;  %v2182_v61 = vmax.f32 %v2042_v51, 0.0  ;;  %v1104_v51 = vadd.f32 %v7010_v7, %v6326_v49  ;;  %v3581_v49 = vld [vmem:[%s8364_s3 + $0x768] sm:$0xff]  ;;  %v3556_v7 = vld [vmem:[%s8364_s3 + $0x6a0] sm:$0xff] }
 0x26c   : > { %8500 = vst [vmem:[#allocation130_spill] sm:$0xff] %v7157_v63 }
 0x26e   : > { %v7165_v28 = vpop.f32.mrf.mxu0 }
 0x270   : > { %v7174_v23 = vpop.f32.mrf.mxu1  ;;  %3832 = vperm.xlu1 %5684, %v3582_v12   ;;  %3837 = vperm.xlu2 %5685, %v3583_v17  }
 0x271   : > { %3657 = vperm.xlu0 %5686, %v3547_v46   ;;  %v7202_v46 = vpack.c.bf16 %v1221_v42, %v1220_v36 }
 0x272   : > { %v1487_v52 = vpop.permute.xlu1 %1486  ;;  %v7178_v50 = vpop.permute.xlu2 %1436 }
 0x273   : > { %v1502_v38 = vpop.permute.xlu0 %1501  ;;  %v2040_v63 = vadd.f32 %v6785_v16, %v1487_v52  ;;  %v5565_v16 = vld [vmem:[%s8363_s2 + $0x1b0] sm:$0xff] }
 0x274   : > { %v2047_v5 = vadd.f32 %v6864_v6, %v1502_v38  ;;  %v3558_v6 = vld [vmem:[%s8364_s3 + $0x6b0] sm:$0xff] }
 0x275   : > { %v2181_v34 = vmax.f32 %v2040_v63, 0.0 }
 0x276   : > { %v2184_v12 = vmax.f32 %v2047_v5, 0.0  ;;  %v7192_v17 = vpop.f32.mrf.mxu0 }
 0x277   : > { %v2243_v36 = vpack.c.bf16 %v2182_v61, %v2181_v34 }
 0x278   : > { %v7200_v38 = vpop.f32.mrf.mxu1  ;;  %3717 = vperm.xlu1 %5684, %v3559_v11   ;;  %3912 = vperm.xlu2 %5685, %v3598_v35   ;;  %v2244_v4 = vpack.c.bf16 %v2184_v12, %v2183_v25  ;;  %v3544_v11 = vld [vmem:[%s8364_s3 + $0x640] sm:$0xff]  ;;  %v3545_v35 = vld [vmem:[%s8364_s3 + $0x648] sm:$0xff] }
 0x279   : > { %4951 = vmatmul.msk.bf16.gmra.mxu0 %vm930_vm0, %v5532_v3  ;;  %3712 = vperm.xlu0 %5686, %v3558_v6   ;;  %v2030_v6 = vadd.f32 %v6681_v53, %v7124_v9  ;;  %v5533_v53 = vld [vmem:[%s8363_s2 + $0xd0] sm:$0xff] }
 0x27a   : > { %2289 = vmatpush.bf16.msrb.mxu0 %v2244_v4  ;;  %v1482_v62 = vpop.permute.xlu1 %1481  ;;  %v7206_v32 = vpop.permute.xlu2 %2556 }
 0x27b   : > { %5108 = vmatmul.msk.bf16.gmra.mxu1 %vm930_vm0, %v5565_v16  ;;  %v2037_v52 = vadd.f32 %v6760_v37, %v1482_v62  ;;  %v1477_v5 = vpop.permute.xlu0 %1476  ;;  %v3599_v37 = vld [vmem:[%s8364_s3 + $0x7f8] sm:$0xff]  ;;  %v1223_v62 = vmax.f32 %v1104_v51, 0.0  ;;  %v2177_v9 = vmax.f32 %v2030_v6, 0.0 }
 0x27c   : > { %v2035_v42 = vadd.f32 %v6733_v30, %v1477_v5  ;;  %v1102_v30 = vadd.f32 %v6985_v43, %v6330_v29  ;;  %v2027_v5 = vadd.f32 %v6656_v27, %v7155_v24 }
 0x27d   : > { %v2180_v63 = vmax.f32 %v2037_v52, 0.0 }
 0x27e   : > { %v2179_v3 = vmax.f32 %v2035_v42, 0.0  ;;  %v7216_v25 = vpop.f32.mrf.mxu0  ;;  %2290 = vmatpush.bf16.msrb.mxu0 %v2243_v36  ;;  %v1222_v61 = vmax.f32 %v1102_v30, 0.0  ;;  %v3580_v36 = vld [vmem:[%s8364_s3 + $0x760] sm:$0xff]  ;;  %v2176_v27 = vmax.f32 %v2027_v5, 0.0 }
 0x280   : > { %v2081_v12 = vpop.f32.mrf.mxu1  ;;  %3642 = vperm.xlu1 %5684, %v3544_v11   ;;  %3647 = vperm.xlu2 %5685, %v3545_v35   ;;  %v2242_v16 = vpack.c.bf16 %v2180_v63, %v2179_v3  ;;  %v7250_v11 = vpack.c.bf16 %v1223_v62, %v1222_v61  ;;  %v3596_v61 = vld [vmem:[%s8364_s3 + $0x7e0] sm:$0xff]  ;;  %v3597_v62 = vld [vmem:[%s8364_s3 + $0x7e8] sm:$0xff] }
 0x281   : > { %3917 = vperm.xlu0 %5686, %v3599_v37  }
 0x282   : > { %2291 = vmatpush.bf16.msrb.mxu0 %v2242_v16  ;;  %v1457_v34 = vpop.permute.xlu1 %1456  ;;  %v7227_v4 = vpop.permute.xlu2 %2571 }
 0x283   : > { %v1472_v52 = vpop.permute.xlu0 %1471  ;;  %v2025_v29 = vadd.f32 %v6629_v8, %v1457_v34 }
 0x284   : > { %v2032_v43 = vadd.f32 %v6708_v41, %v1472_v52  ;;  %v5566_v41 = vld [vmem:[%s8363_s2 + $0x1b8] sm:$0xff] }
 0x285   : > { %v2175_v35 = vmax.f32 %v2025_v29, 0.0 }
 0x286   : > { %v2178_v42 = vmax.f32 %v2032_v43, 0.0  ;;  %v7242_v8 = vpop.f32.mrf.mxu0 }
 0x287   : > { %v2240_v6 = vpack.c.bf16 %v2176_v27, %v2175_v35 }
 0x288   : > { %v2084_v63 = vpop.f32.mrf.mxu1  ;;  %3827 = vperm.xlu1 %5684, %v3581_v49   ;;  %3702 = vperm.xlu2 %5685, %v3556_v7   ;;  %v2241_v3 = vpack.c.bf16 %v2178_v42, %v2177_v9  ;;  %v1109_v49 = vadd.f32 %v7062_v10, %v6345_v58  ;;  %v8502_v9 = vld [vmem:[#allocation53_spill] sm:$0xff]  ;;  %v8503_v42 = vld [vmem:[#allocation58_spill] sm:$0xff] }
 0x289   : > { %4952 = vmatmul.msk.bf16.gmra.mxu0 %vm930_vm0, %v5533_v53  ;;  %3822 = vperm.xlu0 %5686, %v3580_v36   ;;  %v2085_v52 = vadd.f32 %v2084_v63, %v6488_v18  ;;  %v2082_v53 = vadd.f32 %v2081_v12, %v6506_v26  ;;  %v8504_v36 = vld [vmem:[#allocation47_spill] sm:$0xff] }
 0x28a   : > { %2292 = vmatpush.bf16.msrb.mxu0 %v2241_v3  ;;  %v1452_v24 = vpop.permute.xlu1 %1451  ;;  %v7254_v37 = vpop.permute.xlu2 %2586  ;;  %v2080_v63 = vadd.f32 %v7200_v38, %v8504_v36  ;;  %v1225_v10 = vmax.f32 %v1109_v49, 0.0  ;;  %v8506_v3 = vld [vmem:[#allocation50_spill] sm:$0xff]  ;;  %v3543_v38 = vld [vmem:[%s8364_s3 + $0x638] sm:$0xff]  ;;  %v8511_v36 = vld [vmem:[#allocation37_spill] sm:$0xff] }
 0x28b   : > { %5109 = vmatmul.msk.bf16.gmra.mxu1 %vm930_vm0, %v5566_v41  ;;  %8501 = vst [vmem:[#allocation131_spill] sm:$0xff] %v7254_v37  ;;  %v2022_v30 = vadd.f32 %v6604_v0, %v1452_v24  ;;  %v1447_v51 = vpop.permute.xlu0 %1446  ;;  %v1107_v0 = vadd.f32 %v7037_v21, %v6267_v40  ;;  %v2015_v41 = vadd.f32 %v8503_v42, %v7178_v50  ;;  %v2199_v35 = vmax.f32 %v2085_v52, 0.0  ;;  %v8510_v42 = vld [vmem:[#allocation60_spill] sm:$0xff] }
 0x28c   : > { %v2020_v16 = vadd.f32 %v6577_v55, %v1447_v51  ;;  %v3557_v55 = vld [vmem:[%s8364_s3 + $0x6a8] sm:$0xff]  ;;  %v2077_v27 = vadd.f32 %v7174_v23, %v8506_v3  ;;  %v2198_v24 = vmax.f32 %v2082_v53, 0.0  ;;  %v8509_v53 = vld [vmem:[#allocation59_spill] sm:$0xff] }
 0x28d   : > { %v2174_v34 = vmax.f32 %v2022_v30, 0.0  ;;  %v1224_v26 = vmax.f32 %v1107_v0, 0.0  ;;  %v8507_v30 = vld [vmem:[#allocation61_spill] sm:$0xff]  ;;  %v2171_v23 = vmax.f32 %v2015_v41, 0.0  ;;  %v3542_v0 = vld [vmem:[%s8364_s3 + $0x630] sm:$0xff]  ;;  %v2070_v41 = vadd.f32 %v7095_v20, %v8510_v42 }
 0x28e   : > { %v2173_v29 = vmax.f32 %v2020_v16, 0.0  ;;  %v7265_v43 = vpop.f32.mrf.mxu0  ;;  %2293 = vmatpush.bf16.msrb.mxu0 %v2240_v6  ;;  %v3578_v16 = vld [vmem:[%s8364_s3 + $0x750] sm:$0xff]  ;;  %v5534_v6 = vld [vmem:[%s8363_s2 + $0xd8] sm:$0xff]  ;;  %v8515_v3 = vld [vmem:[#allocation29_spill] sm:$0xff] }
 0x290   : > { %v2086_v7 = vpop.f32.mrf.mxu1  ;;  %3902 = vperm.xlu1 %5684, %v3596_v61   ;;  %3907 = vperm.xlu2 %5685, %v3597_v62   ;;  %v2239_v18 = vpack.c.bf16 %v2174_v34, %v2173_v29  ;;  %v8508_v34 = vld [vmem:[#allocation55_spill] sm:$0xff]  ;;  %v2197_v62 = vmax.f32 %v2080_v63, 0.0  ;;  %v1117_v63 = vadd.f32 %v7139_v47, %v8511_v36  ;;  %v1124_v47 = vadd.f32 %v7216_v25, %v8515_v3 }
 0x291   : > { %v2087_v5 = vadd.f32 %v2086_v7, %v8502_v9  ;;  %3707 = vperm.xlu0 %5686, %v3557_v55   ;;  %v2075_v61 = vadd.f32 %v7147_v56, %v8508_v34  ;;  %v5567_v55 = vld [vmem:[%s8363_s2 + $0x1c0] sm:$0xff]  ;;  %v7304_v7 = vpack.c.bf16 %v1225_v10, %v1224_v26  ;;  %v2072_v9 = vadd.f32 %v7120_v13, %v8509_v53 }
 0x292   : > { %2294 = vmatpush.bf16.msrb.mxu0 %v2239_v18  ;;  %v7280_v40 = vpop.permute.xlu1 %2551  ;;  %v7282_v58 = vpop.permute.xlu2 %2601  ;;  %v2196_v56 = vmax.f32 %v2077_v27, 0.0  ;;  %v8516_v27 = vld [vmem:[#allocation33_spill] sm:$0xff] }
 0x293   : > { %8505 = vst [vmem:[#allocation53_spill] sm:$0xff] %v7282_v58  ;;  %v2200_v21 = vmax.f32 %v2087_v5, 0.0  ;;  %v1442_v12 = vpop.permute.xlu0 %1441  ;;  %v2251_v5 = vpack.c.bf16 %v2198_v24, %v2197_v62 }
 0x294   : > { %v2017_v51 = vadd.f32 %v8507_v30, %v1442_v12  ;;  %v8514_v12 = vld [vmem:[#allocation34_spill] sm:$0xff]  ;;  %v2194_v30 = vmax.f32 %v2072_v9, 0.0  ;;  %v8520_v9 = vld [vmem:[#allocation32_spill] sm:$0xff] }
 0x295   : > { %v2252_v50 = vpack.c.bf16 %v2200_v21, %v2199_v35  ;;  %v2195_v35 = vmax.f32 %v2075_v61, 0.0  ;;  %v8512_v21 = vld [vmem:[#allocation36_spill] sm:$0xff]  ;;  %v1122_v20 = vadd.f32 %v7192_v17, %v8514_v12  ;;  %v8518_v61 = vld [vmem:[#allocation35_spill] sm:$0xff] }
 0x296   : > { %v2172_v52 = vmax.f32 %v2017_v51, 0.0  ;;  %v1131_v29 = vpop.f32.mrf.mxu0  ;;  %v1119_v26 = vadd.f32 %v7165_v28, %v8512_v21  ;;  %v1228_v28 = vmax.f32 %v1117_v63, 0.0  ;;  %v1129_v17 = vadd.f32 %v7265_v43, %v8518_v61  ;;  %v8522_v43 = vld [vmem:[#allocation21_spill] sm:$0xff]  ;;  %v8528_v61 = vld [vmem:[#allocation31_spill] sm:$0xff] }
 0x297   : > { %2303 = vmatpush.bf16.msra.mxu3 %v2252_v50  ;;  %v1132_v24 = vadd.f32 %v1131_v29, %v8516_v27  ;;  %v2250_v51 = vpack.c.bf16 %v2196_v56, %v2195_v35  ;;  %v2193_v50 = vmax.f32 %v2070_v41, 0.0  ;;  %v3579_v29 = vld [vmem:[%s8364_s3 + $0x758] sm:$0xff]  ;;  %v8526_v27 = vld [vmem:[#allocation20_spill] sm:$0xff] }
 0x298   : > { %v2089_v49 = vpop.f32.mrf.mxu1  ;;  %3637 = vperm.xlu1 %5684, %v3543_v38   ;;  %3812 = vperm.xlu2 %5685, %v3578_v16   ;;  %v2238_v18 = vpack.c.bf16 %v2172_v52, %v2171_v23  ;;  %v3554_v38 = vld [vmem:[%s8364_s3 + $0x690] sm:$0xff]  ;;  %v1229_v16 = vmax.f32 %v1119_v26, 0.0  ;;  %v8519_v23 = vld [vmem:[#allocation16_spill] sm:$0xff]  ;;  %v3555_v52 = vld [vmem:[%s8364_s3 + $0x698] sm:$0xff]  ;;  %v1233_v63 = vmax.f32 %v1129_v17, 0.0 }
 0x299   : > { %4953 = vmatmul.msk.bf16.gmra.mxu0 %vm930_vm0, %v5534_v6  ;;  %3632 = vperm.xlu0 %5686, %v3542_v0   ;;  %v8517_v6 = vld [vmem:[#allocation27_spill] sm:$0xff]  ;;  %v2090_v25 = vadd.f32 %v2089_v49, %v8519_v23  ;;  %v1231_v0 = vmax.f32 %v1124_v47, 0.0  ;;  %v1234_v53 = vmax.f32 %v1132_v24, 0.0  ;;  %v2249_v42 = vpack.c.bf16 %v2194_v30, %v2193_v50  ;;  %v3576_v23 = vld [vmem:[%s8364_s3 + $0x740] sm:$0xff] }
 0x29a   : > { %v7316_v13 = vpop.permute.xlu1 %2566  ;;  %v7318_v10 = vpop.permute.xlu2 %3757  ;;  %2295 = vmatpush.bf16.msrb.mxu0 %v2238_v18  ;;  %v1127_v34 = vadd.f32 %v7242_v8, %v8517_v6  ;;  %v8523_v18 = vld [vmem:[#allocation19_spill] sm:$0xff]  ;;  %v7349_v3 = vpack.c.bf16 %v1229_v16, %v1228_v28  ;;  %v3540_v28 = vld [vmem:[%s8364_s3 + $0x620] sm:$0xff] }
 0x29b   : > { %5110 = vmatmul.msk.bf16.gmra.mxu1 %vm930_vm0, %v5567_v55  ;;  %2304 = vmatpush.bf16.msra.mxu3 %v2251_v5  ;;  %8513 = vst [vmem:[#allocation58_spill] sm:$0xff] %v7318_v10  ;;  %v1230_v55 = vmax.f32 %v1122_v20, 0.0  ;;  %v8521_v5 = vld [vmem:[#allocation57_spill] sm:$0xff]  ;;  %v2201_v35 = vmax.f32 %v2090_v25, 0.0  ;;  %v3595_v30 = vld [vmem:[%s8364_s3 + $0x7d8] sm:$0xff]  ;;  %v8529_v25 = vld [vmem:[#allocation14_spill] sm:$0xff] }
 0x29c   : > { %v1232_v36 = vmax.f32 %v1127_v34, 0.0  ;;  %v3594_v34 = vld [vmem:[%s8364_s3 + $0x7d0] sm:$0xff] }
 0x29d   : > { %v7347_v20 = vpack.c.bf16 %v1231_v0, %v1230_v55  ;;  %v3577_v55 = vld [vmem:[%s8364_s3 + $0x748] sm:$0xff] }
 0x29e   : > { %v1133_v62 = vpop.f32.mrf.mxu0  ;;  %2296 = vmatpush.bf16.msrb.mxu0 %v8521_v5  ;;  %v7369_v16 = vpack.c.bf16 %v1233_v63, %v1232_v36  ;;  %v5577_v36 = vld [vmem:[%s8365_s4 + $0x4c] sm:$0xf0] }
 0x29f   : > { %2305 = vmatpush.bf16.msra.mxu3 %v2250_v51  ;;  %v1134_v8 = vadd.f32 %v1133_v62, %v8520_v9  ;;  %v5535_v51 = vld [vmem:[%s8363_s2 + $0xe0] sm:$0xff] }
 0x2a0   : > { %v2091_v56 = vpop.f32.mrf.mxu1  ;;  %3692 = vperm.xlu1 %5684, %v3554_v38   ;;  %3697 = vperm.xlu2 %5685, %v3555_v52   ;;  %v5568_v38 = vld [vmem:[%s8363_s2 + $0x1c8] sm:$0xff] }
 0x2a1   : > { %v2092_v49 = vadd.f32 %v2091_v56, %v8522_v43  ;;  %v1235_v41 = vmax.f32 %v1134_v8, 0.0  ;;  %3817 = vperm.xlu0 %5686, %v3579_v29   ;;  %v8532_v56 = vld [vmem:[#allocation17_spill] sm:$0xff] }
 0x2a2   : > { %4182 = vmatpush.bf16.msra.mxu0 %v8523_v18  ;;  %v7343_v26 = vpop.permute.xlu1 %2581  ;;  %v7351_v47 = vpop.permute.xlu2 %3742 }
 0x2a3   : > { %v2202_v21 = vmax.f32 %v2092_v49, 0.0  ;;  %2306 = vmatpush.bf16.msra.mxu3 %v2249_v42  ;;  %8524 = vst [vmem:[#allocation47_spill] sm:$0xff] %v7343_v26  ;;  %v7345_v12 = vpack.c.bf16 %v1235_v41, %v1234_v53  ;;  %v8531_v53 = vld [vmem:[#allocation26_spill] sm:$0xff] }
 0x2a4   : > { %8525 = vst [vmem:[#allocation50_spill] sm:$0xff] %v7351_v47 }
 0x2a5   : > { %v7354_v24 = vpack.c.bf16 %v2202_v21, %v2201_v35  ;;  %v3553_v21 = vld [vmem:[%s8364_s3 + $0x688] sm:$0xff] }
 0x2a6   : > { %4183 = vmatpush.bf16.msra.mxu0 %v8526_v27  ;;  %v1136_v50 = vpop.f32.mrf.mxu0 }
 0x2a7   : > { %2307 = vmatpush.bf16.msra.mxu3 %v7078_v22  ;;  %v1137_v17 = vadd.f32 %v1136_v50, %v8528_v61  ;;  %v3592_v50 = vld [vmem:[%s8364_s3 + $0x7c0] sm:$0xff] }
 0x2a8   : > { %v2094_v6 = vpop.f32.mrf.mxu1  ;;  %3897 = vperm.xlu1 %5684, %v3595_v30   ;;  %3622 = vperm.xlu2 %5685, %v3540_v28   ;;  %v5569_v28 = vld [vmem:[%s8363_s2 + $0x1d0] sm:$0xff]  ;;  %v8536_v61 = vld [vmem:[#allocation24_spill] sm:$0xff] }
 0x2a9   : > { %4954 = vmatmul.msk.bf16.gmra.mxu0 %vm930_vm0, %v5535_v51  ;;  %3892 = vperm.xlu0 %5686, %v3594_v34   ;;  %v2095_v62 = vadd.f32 %v2094_v6, %v8529_v25  ;;  %v1236_v0 = vmax.f32 %v1137_v17, 0.0  ;;  %v8537_v25 = vld [vmem:[#allocation12_spill] sm:$0xff] }
 0x2aa   : > { %v7376_v22 = vpop.permute.xlu1 %2596  ;;  %v7384_v52 = vpop.permute.xlu2 %3677 }
 0x2ab   : > { %5111 = vmatmul.msk.bf16.gmra.mxu1 %vm930_vm0, %v5568_v38  ;;  %8527 = vst [vmem:[#allocation61_spill] sm:$0xff] %v7376_v22  ;;  %2308 = vmatpush.bf16.msra.mxu3 %v7026_v33  ;;  %v3541_v33 = vld [vmem:[%s8364_s3 + $0x628] sm:$0xff]  ;;  %v2203_v49 = vmax.f32 %v2095_v62, 0.0  ;;  %v8573_v22 = vld [vmem:[#allocation4_spill] sm:$0xff] }
 0x2ac   : > { %8530 = vst [vmem:[#allocation55_spill] sm:$0xff] %v7384_v52 }
 0x2ae   : > { %v1138_v29 = vpop.f32.mrf.mxu0 }
 0x2af   : > { %2309 = vmatpush.bf16.msra.mxu3 %v6974_v60  ;;  %v1139_v9 = vadd.f32 %v1138_v29, %v8531_v53  ;;  %v5120_v60 = vld [vmem:[%s8365_s4 + $0x10] sm:$0xf]  ;;  %v8538_v53 = vld [vmem:[#allocation28_spill] sm:$0xff] }
 0x2b0   : > { %v2096_v8 = vpop.f32.mrf.mxu1  ;;  %3802 = vperm.xlu1 %5684, %v3576_v23   ;;  %3807 = vperm.xlu2 %5685, %v3577_v55   ;;  %v5121_v30 = vor.u32 %v5577_v36, %v5120_v60  ;;  %v3538_v23 = vld [vmem:[%s8364_s3 + $0x610] sm:$0xff]  ;;  %v3539_v55 = vld [vmem:[%s8364_s3 + $0x618] sm:$0xff] }
 0x2b1   : > { %v2097_v5 = vadd.f32 %v2096_v8, %v8532_v56  ;;  %v1237_v43 = vmax.f32 %v1139_v9, 0.0  ;;  %3627 = vperm.xlu0 %5686, %v3541_v33   ;;  %v3593_v33 = vld [vmem:[%s8364_s3 + $0x7c8] sm:$0xff]  ;;  %v8539_v56 = vld [vmem:[#allocation15_spill] sm:$0xff] }
 0x2b2   : > { %v7395_v41 = vpop.permute.xlu1 %3752  ;;  %v7420_v6 = vpop.permute.xlu2 %3732 }
 0x2b3   : > { %v2204_v42 = vmax.f32 %v2097_v5, 0.0  ;;  %8533 = vst [vmem:[#allocation59_spill] sm:$0xff] %v7395_v41  ;;  %2310 = vmatpush.bf16.msra.mxu3 %v6922_v39  ;;  %v7404_v63 = vpack.c.bf16 %v1237_v43, %v1236_v0  ;;  %v3552_v39 = vld [vmem:[%s8364_s3 + $0x680] sm:$0xff] }
 0x2b4   : > { %8534 = vst [vmem:[#allocation60_spill] sm:$0xff] %v7420_v6  ;;  %v8557_v6 = vld [vmem:[#allocation42_spill] sm:$0xff]  ;;  %v3584_v41 = vld [vmem:[%s8364_s3 + $0x780] sm:$0xff] }
 0x2b5   : > { %v7406_v35 = vpack.c.bf16 %v2204_v42, %v2203_v49 }
 0x2b6   : > { %v1141_v51 = vpop.f32.mrf.mxu0 }
 0x2b7   : > { %v1142_v17 = vadd.f32 %v1141_v51, %v8536_v61  ;;  %v5570_v61 = vld [vmem:[%s8363_s2 + $0x1d8] sm:$0xff] }
 0x2b8   : > { %v2099_v38 = vpop.f32.mrf.mxu1  ;;  %3687 = vperm.xlu1 %5684, %v3553_v21   ;;  %3882 = vperm.xlu2 %5685, %v3592_v50   ;;  %v3575_v50 = vld [vmem:[%s8364_s3 + $0x738] sm:$0xff] }
 0x2b9   : > { %2297 = vmatmul.bf16.vlgmr.msrb.gmra.mxu0 %v5121_v30  ;;  %3682 = vperm.xlu0 %5686, %v3552_v39   ;;  %v2100_v62 = vadd.f32 %v2099_v38, %v8537_v25  ;;  %v1238_v0 = vmax.f32 %v1142_v17, 0.0  ;;  %v7444_v30 = vpop.permute.xlu0 %2561  ;;  %v3590_v39 = vld [vmem:[%s8364_s3 + $0x7b0] sm:$0xff] }
 0x2ba   : > { %v7423_v34 = vpop.permute.xlu1 %2626  ;;  %v7438_v42 = vpop.permute.xlu2 %3667 }
 0x2bb   : > { %5112 = vmatmul.msk.bf16.gmra.mxu1 %vm930_vm0, %v5569_v28  ;;  %8535 = vst [vmem:[#allocation37_spill] sm:$0xff] %v7423_v34  ;;  %v2205_v49 = vmax.f32 %v2100_v62, 0.0  ;;  %v5615_v28 = vld [vmem:[%s8363_s2 + $0x300] sm:$0xff] }
 0x2bc   : > { %8540 = vst [vmem:[#allocation36_spill] sm:$0xff] %v7438_v42 }
 0x2be   : > { %v1143_v29 = vpop.f32.mrf.mxu0 }
 0x2bf   : > { %v1144_v9 = vadd.f32 %v1143_v29, %v8538_v53  ;;  %v8544_v29 = vld [vmem:[#allocation22_spill] sm:$0xff] }
 0x2c0   : > { %v2101_v8 = vpop.f32.mrf.mxu1  ;;  %3612 = vperm.xlu1 %5684, %v3538_v23   ;;  %3617 = vperm.xlu2 %5685, %v3539_v55   ;;  %v3574_v23 = vld [vmem:[%s8364_s3 + $0x730] sm:$0xff] }
 0x2c1   : > { %v2102_v5 = vadd.f32 %v2101_v8, %v8539_v56  ;;  %v1239_v43 = vmax.f32 %v1144_v9, 0.0  ;;  %3887 = vperm.xlu0 %5686, %v3593_v33   ;;  %v7473_v53 = vpop.permute.xlu0 %2576  ;;  %v8546_v9 = vld [vmem:[#allocation9_spill] sm:$0xff] }
 0x2c2   : > { %v7440_v36 = vpop.permute.xlu1 %3672  ;;  %v7467_v62 = vpop.permute.xlu2 %3652  ;;  %8545 = vst [vmem:[#allocation27_spill] sm:$0xff] %v7473_v53  ;;  %v3537_v56 = vld [vmem:[%s8364_s3 + $0x608] sm:$0xff] }
 0x2c3   : > { %v2206_v60 = vmax.f32 %v2102_v5, 0.0  ;;  %8541 = vst [vmem:[#allocation34_spill] sm:$0xff] %v7440_v36  ;;  %v7442_v21 = vpack.c.bf16 %v1239_v43, %v1238_v0  ;;  %v3536_v0 = vld [vmem:[%s8364_s3 + $0x600] sm:$0xff]  ;;  %v8547_v5 = vld [vmem:[#allocation25_spill] sm:$0xff] }
 0x2c4   : > { %8543 = vst [vmem:[#allocation33_spill] sm:$0xff] %v7467_v62 }
 0x2c5   : > { %v7446_v51 = vpack.c.bf16 %v2206_v60, %v2205_v49  ;;  %v3591_v60 = vld [vmem:[%s8364_s3 + $0x7b8] sm:$0xff] }
 0x2c6   : > { %v1146_v38 = vpop.f32.mrf.mxu0 }
 0x2c7   : > { %v1147_v55 = vadd.f32 %v1146_v38, %v8544_v29 }
 0x2c8   : > { %v2104_v17 = vpop.f32.mrf.mxu1  ;;  %3797 = vperm.xlu1 %5684, %v3575_v50   ;;  %3872 = vperm.xlu2 %5685, %v3590_v39   ;;  %v8548_v50 = vld [vmem:[#allocation13_spill] sm:$0xff] }
 0x2c9   : > { %5454 = vmatmul.msk.bf16.vlgmr.msra.gmra.mxu0 %vm930_vm0, %v5615_v28  ;;  %3792 = vperm.xlu0 %5686, %v3574_v23   ;;  %v2105_v8 = vadd.f32 %v2104_v17, %v8546_v9  ;;  %v1240_v38 = vmax.f32 %v1147_v55, 0.0 }
 0x2ca   : > { %v7465_v25 = vpop.permute.xlu1 %2616  ;;  %v7496_v55 = vpop.permute.xlu2 %3837 }
 0x2cb   : > { %5113 = vmatmul.msk.bf16.gmra.mxu1 %vm930_vm0, %v5570_v61  ;;  %8542 = vst [vmem:[#allocation29_spill] sm:$0xff] %v7465_v25  ;;  %v2207_v61 = vmax.f32 %v2105_v8, 0.0  ;;  %v3588_v8 = vld [vmem:[%s8364_s3 + $0x7a0] sm:$0xff]  ;;  %v8610_v25 = vld [vmem:[#allocation74_spill] sm:$0xff] }
 0x2cc   : > { %8550 = vst [vmem:[#allocation16_spill] sm:$0xff] %v7496_v55 }
 0x2ce   : > { %v1148_v33 = vpop.f32.mrf.mxu0 }
 0x2cf   : > { %v1149_v43 = vadd.f32 %v1148_v33, %v8547_v5  ;;  %v3573_v33 = vld [vmem:[%s8364_s3 + $0x728] sm:$0xff]  ;;  %v5571_v5 = vld [vmem:[%s8363_s2 + $0x1e0] sm:$0xff] }
 0x2d0   : > { %v2106_v49 = vpop.f32.mrf.mxu1  ;;  %3602 = vperm.xlu1 %5684, %v3536_v0   ;;  %3607 = vperm.xlu2 %5685, %v3537_v56   ;;  %v5616_v0 = vld [vmem:[%s8363_s2 + $0x308] sm:$0xff] }
 0x2d1   : > { %v2107_v28 = vadd.f32 %v2106_v49, %v8548_v50  ;;  %v1241_v39 = vmax.f32 %v1149_v43, 0.0  ;;  %3877 = vperm.xlu0 %5686, %v3591_v60   ;;  %v3572_v49 = vld [vmem:[%s8364_s3 + $0x720] sm:$0xff]  ;;  %v7511_v60 = vpop.permute.xlu0 %2591 }
 0x2d2   : > { %v7484_v23 = vpop.permute.xlu1 %3662  ;;  %8551 = vst [vmem:[#allocation32_spill] sm:$0xff] %v7511_v60 }
 0x2d3   : > { %v2208_v17 = vmax.f32 %v2107_v28, 0.0  ;;  %8549 = vst [vmem:[#allocation35_spill] sm:$0xff] %v7484_v23  ;;  %v7486_v29 = vpack.c.bf16 %v1241_v39, %v1240_v38  ;;  %v3570_v28 = vld [vmem:[%s8364_s3 + $0x710] sm:$0xff]  ;;  %v3571_v39 = vld [vmem:[%s8364_s3 + $0x718] sm:$0xff] }
 0x2d5   : > { %v7488_v9 = vpack.c.bf16 %v2208_v17, %v2207_v61  ;;  %v3589_v17 = vld [vmem:[%s8364_s3 + $0x7a8] sm:$0xff] }
 0x2d6   : > { %v7498_v56 = vpop.f32.mrf.mxu0 }
 0x2d8   : > { %v7506_v43 = vpop.f32.mrf.mxu1  ;;  %3787 = vperm.xlu1 %5684, %v3573_v33   ;;  %3862 = vperm.xlu2 %5685, %v3588_v8   ;;  %v7530_v33 = vpop.permute.xlu2 %3912 }
 0x2d9   : > { %5455 = vmatmul.msk.bf16.gmra.mxu0 %vm930_vm0, %v5616_v0  ;;  %3782 = vperm.xlu0 %5686, %v3572_v49   ;;  %8553 = vst [vmem:[#allocation21_spill] sm:$0xff] %v7530_v33  ;;  %v7532_v0 = vpop.permute.xlu0 %2606  ;;  %v5617_v49 = vld [vmem:[%s8363_s2 + $0x310] sm:$0xff]  ;;  %v3568_v33 = vld [vmem:[%s8364_s3 + $0x700] sm:$0xff] }
 0x2da   : > { %v7515_v50 = vpop.permute.xlu1 %3727  ;;  %8554 = vst [vmem:[#allocation19_spill] sm:$0xff] %v7532_v0 }
 0x2db   : > { %5114 = vmatmul.msk.bf16.gmra.mxu1 %vm930_vm0, %v5571_v5  ;;  %8552 = vst [vmem:[#allocation57_spill] sm:$0xff] %v7515_v50  ;;  %v3587_v5 = vld [vmem:[%s8364_s3 + $0x798] sm:$0xff] }
 0x2de   : > { %v7520_v38 = vpop.f32.mrf.mxu0 }
 0x2e0   : > { %v7525_v61 = vpop.f32.mrf.mxu1  ;;  %3772 = vperm.xlu1 %5684, %v3570_v28   ;;  %3777 = vperm.xlu2 %5685, %v3571_v39   ;;  %v5572_v28 = vld [vmem:[%s8363_s2 + $0x1e8] sm:$0xff] }
 0x2e1   : > { %3867 = vperm.xlu0 %5686, %v3589_v17   ;;  %v3586_v17 = vld [vmem:[%s8364_s3 + $0x790] sm:$0xff]  ;;  %v7560_v10 = vpop.permute.xlu0 %2621 }
 0x2e2   : > { %v7534_v8 = vpop.permute.xlu1 %3832  ;;  %8558 = vst [vmem:[#allocation14_spill] sm:$0xff] %v7560_v10 }
 0x2e3   : > { %8555 = vst [vmem:[#allocation20_spill] sm:$0xff] %v7534_v8  ;;  %v7554_v8 = vpop.permute.xlu2 %3647 }
 0x2e6   : > { %v1156_v55 = vpop.f32.mrf.mxu0 }
 0x2e7   : > { %v1157_v47 = vadd.f32 %v1156_v55, %v8557_v6 }
 0x2e8   : > { %v7548_v39 = vpop.f32.mrf.mxu1  ;;  %3857 = vperm.xlu1 %5684, %v3587_v5   ;;  %3762 = vperm.xlu2 %5685, %v3568_v33   ;;  %v3585_v33 = vld [vmem:[%s8364_s3 + $0x788] sm:$0xff] }
 0x2e9   : > { %5456 = vmatmul.msk.bf16.gmra.mxu0 %vm930_vm0, %v5617_v49  ;;  %3852 = vperm.xlu0 %5686, %v3586_v17   ;;  %v1244_v5 = vmax.f32 %v1157_v47, 0.0  ;;  %v8559_v49 = vld [vmem:[#allocation41_spill] sm:$0xff] }
 0x2ea   : > { %v7557_v50 = vpop.permute.xlu1 %3717  ;;  %v3569_v17 = vld [vmem:[%s8364_s3 + $0x708] sm:$0xff] }
 0x2eb   : > { %5115 = vmatmul.msk.bf16.gmra.mxu1 %vm930_vm0, %v5572_v28  ;;  %8556 = vst [vmem:[#allocation31_spill] sm:$0xff] %v7557_v50  ;;  %v7576_v42 = vpop.permute.xlu2 %3702  ;;  %v4524_v47 = vld [vmem:[%s8366_s5 + $0x8] sm:$0xff] }
 0x2ec   : > { %8560 = vst [vmem:[#allocation26_spill] sm:$0xff] %v7576_v42  ;;  %v4537_v42 = vld [vmem:[%s8362_s1] sm:$0xff] }
 0x2ee   : > { %v1158_v62 = vpop.f32.mrf.mxu0 }
 0x2ef   : > { %v1159_v23 = vadd.f32 %v1158_v62, %v8559_v49  ;;  %v5618_v62 = vld [vmem:[%s8363_s2 + $0x318] sm:$0xff]  ;;  %v7584_v49 = vpop.permute.xlu0 %3747 }
 0x2f0   : > { %v2116_v28 = vpop.f32.mrf.mxu1  ;;  %3842 = vperm.xlu1 %5684, %v3584_v41   ;;  %3847 = vperm.xlu2 %5685, %v3585_v33   ;;  %8561 = vst [vmem:[#allocation17_spill] sm:$0xff] %v7584_v49 }
 0x2f1   : > { %v1245_v6 = vmax.f32 %v1159_v23, 0.0  ;;  %3767 = vperm.xlu0 %5686, %v3569_v17   ;;  %v5573_v23 = vld [vmem:[%s8363_s2 + $0x1f0] sm:$0xff] }
 0x2f2   : > { %v7572_v55 = vpop.permute.xlu1 %3642 }
 0x2f3   : > { %v7574_v50 = vpack.c.bf16 %v1245_v6, %v1244_v5  ;;  %v4523_v5 = vld [vmem:[%s8366_s5] sm:$0xff]  ;;  %v8563_v6 = vld [vmem:[#allocation38_spill] sm:$0xff]  ;;  %v7600_v36 = vpop.permute.xlu2 %3907 }
 0x2f4   : > { %8564 = vst [vmem:[#allocation12_spill] sm:$0xff] %v7600_v36 }
 0x2f6   : > { %v1161_v41 = vpop.f32.mrf.mxu0 }
 0x2f7   : > { %v1162_v49 = vadd.f32 %v1161_v41, %v8563_v6  ;;  %v5619_v41 = vld [vmem:[%s8363_s2 + $0x320] sm:$0xff] }
 0x2f8   : > { %v2119_v33 = vpop.f32.mrf.mxu1  ;;  %4532 = vperm.xlu1 %5684, %v4524_v47   ;;  %v7603_v47 = vpop.permute.xlu0 %2611 }
 0x2f9   : > { %5457 = vmatmul.msk.bf16.gmra.mxu0 %vm930_vm0, %v5618_v62  ;;  %4527 = vperm.xlu0 %5686, %v4523_v5   ;;  %8566 = vst [vmem:[#allocation28_spill] sm:$0xff] %v7603_v47  ;;  %v1246_v62 = vmax.f32 %v1162_v49, 0.0  ;;  %v8570_v49 = vld [vmem:[#allocation7_spill] sm:$0xff]  ;;  %v2120_v58 = vadd.f32 %v2119_v33, %v8573_v22  ;;  %v8577_v47 = vld [vmem:[#allocation10_spill] sm:$0xff] }
 0x2fa   : > { %v7594_v17 = vpop.permute.xlu1 %3827  ;;  %v2117_v34 = vadd.f32 %v2116_v28, %v8577_v47 }
 0x2fb   : > { %5116 = vmatmul.msk.bf16.gmra.mxu1 %vm930_vm0, %v5573_v23  ;;  %8562 = vst [vmem:[#allocation24_spill] sm:$0xff] %v7594_v17  ;;  %v7617_v36 = vpop.permute.xlu2 %3812  ;;  %v2213_v22 = vmax.f32 %v2120_v58, 0.0 }
 0x2fc   : > { %8568 = vst [vmem:[#allocation22_spill] sm:$0xff] %v7617_v36 }
 0x2fe   : > { %v1163_v52 = vpop.f32.mrf.mxu0 }
 0x2ff   : > { %v1164_v2 = vadd.f32 %v1163_v52, %v8565_v45  ;;  %v5574_v45 = vld [vmem:[%s8363_s2 + $0x1f8] sm:$0xff] }
 0x300   : > { %v2121_v15 = vpop.f32.mrf.mxu1  ;;  %4541 = vperm.xlu1 %5684, %v4537_v42  }
 0x301   : > { %v1247_v23 = vmax.f32 %v1164_v2, 0.0  ;;  %v7620_v2 = vpop.permute.xlu0 %3737  ;;  %v2122_v14 = vadd.f32 %v2121_v15, %v8571_v44  ;;  %v5620_v44 = vld [vmem:[%s8363_s2 + $0x328] sm:$0xff]  ;;  %v8578_v15 = vld [vmem:[#allocation30_spill] sm:$0xff] }
 0x302   : > { %v7605_v5 = vpop.permute.xlu1 %3902  ;;  %8569 = vst [vmem:[#allocation9_spill] sm:$0xff] %v7620_v2 }
 0x303   : > { %8567 = vst [vmem:[#allocation15_spill] sm:$0xff] %v7605_v5  ;;  %v7607_v17 = vpack.c.bf16 %v1247_v23, %v1246_v62  ;;  %v7631_v36 = vpop.permute.xlu2 %3697 }
 0x304   : > { %8574 = vst [vmem:[#allocation25_spill] sm:$0xff] %v7631_v36 }
 0x306   : > { %v7612_v6 = vpop.f32.mrf.mxu0 }
 0x308   : > { %v2124_v52 = vpop.f32.mrf.mxu1 }
 0x309   : > { %5458 = vmatmul.msk.bf16.gmra.mxu0 %vm930_vm0, %v5619_v41  ;;  %v2125_v62 = vadd.f32 %v2124_v52, %v8570_v49  ;;  %v2214_v52 = vmax.f32 %v2122_v14, 0.0  ;;  %v8580_v14 = vld [vmem:[#allocation6_spill] sm:$0xff] }
 0x30a   : > { %v7623_v42 = vpop.permute.xlu1 %3637 }
 0x30b   : > { %5117 = vmatmul.msk.bf16.gmra.mxu1 %vm930_vm0, %v5574_v45  ;;  %v2215_v41 = vmax.f32 %v2125_v62, 0.0  ;;  %v7635_v45 = vpop.permute.xlu0 %3722  ;;  %v2259_v36 = vpack.c.bf16 %v2214_v52, %v2213_v22  ;;  %v7652_v58 = vpop.permute.xlu2 %3622 }
 0x30c   : > { %8576 = vst [vmem:[#allocation42_spill] sm:$0xff] %v7635_v45  ;;  %v2212_v45 = vmax.f32 %v2117_v34, 0.0 }
 0x30e   : > { %v7626_v23 = vpop.f32.mrf.mxu0 }
 0x310   : > { %v2126_v5 = vpop.f32.mrf.mxu1 }
 0x311   : > { %v2127_v60 = vadd.f32 %v2126_v5, %v8572_v57  ;;  %v2115_v57 = vadd.f32 %v7548_v39, %v8578_v15  ;;  %v8579_v5 = vld [vmem:[#allocation11_spill] sm:$0xff] }
 0x312   : > { %v7633_v2 = vpop.permute.xlu1 %3692  ;;  %v2112_v62 = vadd.f32 %v7525_v61, %v8579_v5  ;;  %v5575_v5 = vld [vmem:[%s8365_s4 + $0x14] sm:$0xf] }
 0x313   : > { %v2216_v0 = vmax.f32 %v2127_v60, 0.0  ;;  %8575 = vst [vmem:[#allocation13_spill] sm:$0xff] %v7633_v2  ;;  %v2211_v28 = vmax.f32 %v2115_v57, 0.0  ;;  %v7654_v15 = vpop.permute.xlu0 %3657  ;;  %v8583_v2 = vld [vmem:[#allocation83_spill] sm:$0xff] }
 0x314   : > { %v2210_v39 = vmax.f32 %v2112_v62, 0.0  ;;  %8582 = vst [vmem:[#allocation38_spill] sm:$0xff] %v7654_v15 }
 0x315   : > { %v2260_v49 = vpack.c.bf16 %v2216_v0, %v2215_v41  ;;  %v2110_v0 = vadd.f32 %v7506_v43, %v8580_v14  ;;  %v2258_v41 = vpack.c.bf16 %v2212_v45, %v2211_v28  ;;  %v5122_v45 = vld [vmem:[%s8365_s4 + $0x50] sm:$0xf0] }
 0x316   : > { %v7643_v33 = vpop.f32.mrf.mxu0  ;;  %v5621_v14 = vld [vmem:[%s8363_s2 + $0x330] sm:$0xff] }
 0x317   : > { %2317 = vmatpush.bf16.msra.mxu2 %v2260_v49  ;;  %v2209_v49 = vmax.f32 %v2110_v0, 0.0  ;;  %v7673_v0 = vpop.permute.xlu2 %3807 }
 0x318   : > { %v2129_v60 = vpop.f32.mrf.mxu1  ;;  %8586 = vst [vmem:[#allocation7_spill] sm:$0xff] %v7673_v0  ;;  %v8601_v0 = vld [vmem:[#allocation80_spill] sm:$0xff] }
 0x319   : > { %5459 = vmatmul.msk.bf16.gmra.mxu0 %vm930_vm0, %v5620_v44  ;;  %v2130_v61 = vadd.f32 %v2129_v60, %v8583_v2  ;;  %v8584_v44 = vld [vmem:[#allocation81_spill] sm:$0xff]  ;;  %v2257_v43 = vpack.c.bf16 %v2210_v39, %v2209_v49  ;;  %v5125_v2 = vor.u32 %v5575_v5, %v5122_v45 }
 0x31a   : > { %v7650_v47 = vpop.permute.xlu1 %3897  ;;  %v8588_v49 = vld [vmem:[#allocation77_spill] sm:$0xff] }
 0x31b   : > { %2318 = vmatpush.bf16.msra.mxu2 %v2259_v36  ;;  %8581 = vst [vmem:[#allocation41_spill] sm:$0xff] %v7650_v47  ;;  %v2217_v57 = vmax.f32 %v2130_v61, 0.0  ;;  %2311 = vmatmul.bf16.vlgmr.msra.gmra.mxu3 %v5125_v2 }
 0x31e   : > { %v7657_v34 = vpop.f32.mrf.mxu0 }
 0x31f   : > { %2319 = vmatpush.bf16.msra.mxu2 %v2258_v41  ;;  %v7678_v41 = vpop.permute.xlu0 %3712 }
 0x320   : > { %v2131_v52 = vpop.f32.mrf.mxu1  ;;  %8587 = vst [vmem:[#allocation5_spill] sm:$0xff] %v7678_v41 }
 0x321   : > { %v2132_v22 = vadd.f32 %v2131_v52, %v8584_v44 }
 0x322   : > { %v7666_v62 = vpop.permute.xlu1 %3802 }
 0x323   : > { %v2218_v36 = vmax.f32 %v2132_v22, 0.0  ;;  %2320 = vmatpush.bf16.msra.mxu2 %v2257_v43  ;;  %8585 = vst [vmem:[#allocation44_spill] sm:$0xff] %v7666_v62  ;;  %v5578_v22 = vld [vmem:[%s8365_s4 + $0x54] sm:$0xf0] }
 0x325   : > { %v7668_v60 = vpack.c.bf16 %v2218_v36, %v2217_v57  ;;  %v7694_v57 = vpop.permute.xlu2 %3882 }
 0x326   : > { %v7676_v28 = vpop.f32.mrf.mxu0  ;;  %8590 = vst [vmem:[#allocation4_spill] sm:$0xff] %v7694_v57 }
 0x327   : > { %2321 = vmatpush.bf16.msra.mxu2 %v7488_v9  ;;  %v5128_v9 = vld [vmem:[%s8365_s4 + $0x18] sm:$0xf]  ;;  %v7697_v45 = vpop.permute.xlu0 %3917 }
 0x328   : > { %v2134_v39 = vpop.f32.mrf.mxu1  ;;  %v5129_v5 = vor.u32 %v5578_v22, %v5128_v9  ;;  %8592 = vst [vmem:[#allocation10_spill] sm:$0xff] %v7697_v45  ;;  %v8594_v22 = vld [vmem:[#allocation94_spill] sm:$0xff] }
 0x329   : > { %5460 = vmatmul.msk.bf16.gmra.mxu0 %vm930_vm0, %v5621_v14  ;;  %v2135_v61 = vadd.f32 %v2134_v39, %v8588_v49  ;;  %v5622_v39 = vld [vmem:[%s8363_s2 + $0x338] sm:$0xff] }
 0x32a   : > { %v7683_v52 = vpop.permute.xlu1 %3687 }
 0x32b   : > { %2322 = vmatpush.bf16.msra.mxu2 %v7446_v51  ;;  %8589 = vst [vmem:[#allocation8_spill] sm:$0xff] %v7683_v52  ;;  %v8591_v51 = vld [vmem:[#allocation69_spill] sm:$0xff]  ;;  %v2219_v2 = vmax.f32 %v2135_v61, 0.0 }
 0x32d   : > { %v3618_v61 = vpop.permute.xlu2 %3617 }
 0x32e   : > { %v7686_v44 = vpop.f32.mrf.mxu0 }
 0x32f   : > { %2323 = vmatpush.bf16.msra.mxu2 %v7406_v35 }
 0x330   : > { %v2136_v43 = vpop.f32.mrf.mxu1 }
 0x331   : > { %v2137_v36 = vadd.f32 %v2136_v43, %v8591_v51  ;;  %v8593_v43 = vld [vmem:[#allocation101_spill] sm:$0xff] }
 0x332   : > { %v3613_v9 = vpop.permute.xlu1 %3612 }
 0x333   : > { %v2220_v35 = vmax.f32 %v2137_v36, 0.0  ;;  %2324 = vmatpush.bf16.msra.mxu2 %v7354_v24  ;;  %v7711_v24 = vpop.permute.xlu0 %3822 }
 0x334   : > { %8595 = vst [vmem:[#allocation30_spill] sm:$0xff] %v7711_v24  ;;  %v8603_v24 = vld [vmem:[#allocation23_spill] sm:$0xff] }
 0x335   : > { %v7701_v14 = vpack.c.bf16 %v2220_v35, %v2219_v2  ;;  %v8598_v35 = vld [vmem:[#allocation87_spill] sm:$0xff] }
 0x336   : > { %2325 = vmatmul.bf16.vlgmr.msra.gmra.mxu2 %v5129_v5  ;;  %v7706_v49 = vpop.f32.mrf.mxu0  ;;  %v8599_v5 = vld [vmem:[#allocation79_spill] sm:$0xff] }
 0x337   : > { %2365 = vmatpush.bf16.msrb.mxu2 %v6941_v1  ;;  %v8596_v1 = vld [vmem:[#allocation65_spill] sm:$0xff] }
 0x338   : > { %v2139_v57 = vpop.f32.mrf.mxu1 }
 0x339   : > { %5461 = vmatmul.msk.bf16.gmra.mxu0 %vm930_vm0, %v5622_v39  ;;  %v2140_v51 = vadd.f32 %v2139_v57, %v8596_v1  ;;  %v7721_v39 = vpop.permute.xlu2 %3872  ;;  %v1154_v57 = vadd.f32 %v7520_v38, %v8603_v24  ;;  %v5541_v38 = vld [vmem:[%s8365_s4 + $0x3c] sm:$0xf0] }
 0x33a   : > { %v7718_v62 = vpop.permute.xlu1 %3797  ;;  %8602 = vst [vmem:[#allocation83_spill] sm:$0xff] %v7721_v39 }
 0x33b   : > { %2366 = vmatpush.bf16.msrb.mxu2 %v8593_v43  ;;  %v2221_v45 = vmax.f32 %v2140_v51, 0.0  ;;  %8600 = vst [vmem:[#allocation6_spill] sm:$0xff] %v7718_v62  ;;  %v7727_v1 = vpop.permute.xlu0 %3707 }
 0x33c   : > { %8604 = vst [vmem:[#allocation81_spill] sm:$0xff] %v7727_v1 }
 0x33e   : > { %v7714_v36 = vpop.f32.mrf.mxu0 }
 0x33f   : > { %2367 = vmatpush.bf16.msrb.mxu2 %v8594_v22  ;;  %8597 = vst [vmem:[#allocation11_spill] sm:$0xff] %v7714_v36 }
 0x340   : > { %v2141_v2 = vpop.f32.mrf.mxu1 }
 0x341   : > { %v2142_v47 = vadd.f32 %v2141_v2, %v8599_v5  ;;  %v8606_v2 = vld [vmem:[#allocation18_spill] sm:$0xff]  ;;  %v1243_v5 = vmax.f32 %v1154_v57, 0.0  ;;  %v3608_v62 = vpop.permute.xlu2 %3607 }
 0x342   : > { %v1152_v51 = vadd.f32 %v7498_v56, %v8606_v2  ;;  %v3603_v24 = vpop.permute.xlu1 %3602  ;;  %v8609_v2 = vld [vmem:[#allocation63_spill] sm:$0xff] }
 0x343   : > { %2368 = vmatpush.bf16.msrb.mxu2 %v8598_v35  ;;  %v2222_v43 = vmax.f32 %v2142_v47, 0.0  ;;  %v8605_v35 = vld [vmem:[#allocation73_spill] sm:$0xff]  ;;  %v8607_v47 = vld [vmem:[#allocation67_spill] sm:$0xff]  ;;  %v3633_v15 = vpop.permute.xlu0 %3632 }
 0x345   : > { %v7723_v22 = vpack.c.bf16 %v2222_v43, %v2221_v45  ;;  %v1242_v45 = vmax.f32 %v1152_v51, 0.0 }
 0x346   : > { %v4185_v36 = vpop.f32.mrf.mxu0 }
 0x347   : > { %2369 = vmatpush.bf16.msrb.mxu2 %v8601_v0  ;;  %v5136_v0 = vld [vmem:[%s8365_s4] sm:$0xf]  ;;  %v4186_v43 = vadd.f32 %v4185_v36, %v3603_v24  ;;  %v1287_v39 = vpack.c.bf16 %v1243_v5, %v1242_v45 }
 0x348   : > { %v2144_v41 = vpop.f32.mrf.mxu1  ;;  %v5137_v56 = vor.u32 %v5541_v38, %v5136_v0 }
 0x349   : > { %v4345_v37 = vmax.f32 %v4186_v43, 0.0 }
 0x34b   : > { %2370 = vmatpush.bf16.msrb.mxu2 %v8605_v35  ;;  %v8608_v35 = vld [vmem:[#allocation76_spill] sm:$0xff] }
 0x34c   : > { %v2145_v1 = vadd.f32 %v2144_v41, %v8608_v35 }
 0x34e   : > { %v4187_v52 = vpop.f32.mrf.mxu0  ;;  %v2223_v53 = vmax.f32 %v2145_v1, 0.0 }
 0x34f   : > { %2371 = vmatpush.bf16.msrb.mxu2 %v8607_v47  ;;  %v4188_v47 = vadd.f32 %v4187_v52, %v3608_v62  ;;  %v7750_v62 = vpop.permute.xlu0 %3817 }
 0x350   : > { %v2146_v57 = vpop.f32.mrf.mxu1 }
 0x351   : > { %v2147_v10 = vadd.f32 %v2146_v57, %v8610_v25  ;;  %v4346_v26 = vmax.f32 %v4188_v47, 0.0 }
 0x353   : > { %2372 = vmatpush.bf16.msrb.mxu2 %v8609_v2  ;;  %v2224_v51 = vmax.f32 %v2147_v10, 0.0  ;;  %v7742_v36 = vpack.c.bf16 %v4346_v26, %v4345_v37 }
 0x355   : > { %v7745_v41 = vpack.c.bf16 %v2224_v51, %v2223_v53 }
 0x356   : > { %2373 = vmatmul.bf16.vlgmr.msrb.gmra.mxu2 %v5137_v56  ;;  %v4190_v5 = vpop.f32.mrf.mxu0 }
 0x357   : > { %2393 = vmatpush.bf16.msra.mxu2 %v1287_v39  ;;  %v4191_v25 = vadd.f32 %v4190_v5, %v3613_v9  ;;  %v7756_v53 = vpop.permute.xlu0 %3892 }
 0x358   : > { %v7747_v0 = vpop.f32.mrf.mxu1 }
 0x359   : > { %v4347_v37 = vmax.f32 %v4191_v25, 0.0 }
 0x35b   : > { %2394 = vmatpush.bf16.msra.mxu2 %v7486_v29 }
 0x35e   : > { %v4192_v52 = vpop.f32.mrf.mxu0 }
 0x35f   : > { %2395 = vmatpush.bf16.msra.mxu2 %v7442_v21  ;;  %v4193_v10 = vadd.f32 %v4192_v52, %v3618_v61 }
 0x360   : > { %v2151_v39 = vpop.f32.mrf.mxu1 }
 0x361   : > { %v4348_v26 = vmax.f32 %v4193_v10, 0.0 }
 0x363   : > { %2396 = vmatpush.bf16.msra.mxu2 %v7404_v63  ;;  %v7754_v29 = vpack.c.bf16 %v4348_v26, %v4347_v37  ;;  %v5144_v63 = vld [vmem:[%s8365_s4 + $0x8] sm:$0xf] }
 0x366   : > { %v4195_v1 = vpop.f32.mrf.mxu0 }
 0x367   : > { %2397 = vmatpush.bf16.msra.mxu2 %v7345_v12  ;;  %v5542_v12 = vld [vmem:[%s8365_s4 + $0x44] sm:$0xf0]  ;;  %v4196_v61 = vadd.f32 %v4195_v1, %v7652_v58 }
 0x368   : > { %v2154_v21 = vpop.f32.mrf.mxu1  ;;  %v5145_v9 = vor.u32 %v5542_v12, %v5144_v63  ;;  %v5580_v1 = vld [vmem:[%s8363_s2 + $0x208] sm:$0xff]  ;;  %v8611_v63 = vld [vmem:[#allocation62_spill] sm:$0xff] }
 0x369   : > { %v4349_v24 = vmax.f32 %v4196_v61, 0.0  ;;  %v8612_v61 = vld [vmem:[#allocation66_spill] sm:$0xff] }
 0x36b   : > { %2398 = vmatpush.bf16.msra.mxu2 %v7369_v16  ;;  %v3628_v16 = vpop.permute.xlu0 %3627 }
 0x36e   : > { %v4197_v38 = vpop.f32.mrf.mxu0 }
 0x36f   : > { %2399 = vmatpush.bf16.msra.mxu2 %v7347_v20  ;;  %v4198_v20 = vadd.f32 %v4197_v38, %v3628_v16  ;;  %v8613_v38 = vld [vmem:[#allocation54_spill] sm:$0xff] }
 0x370   : > { %v2156_v45 = vpop.f32.mrf.mxu1 }
 0x371   : > { %v4350_v43 = vmax.f32 %v4198_v20, 0.0 }
 0x373   : > { %2400 = vmatpush.bf16.msra.mxu2 %v7349_v3  ;;  %v7770_v35 = vpack.c.bf16 %v4350_v43, %v4349_v24  ;;  %v5579_v3 = vld [vmem:[%s8363_s2 + $0x200] sm:$0xff] }
 0x376   : > { %2401 = vmatmul.bf16.vlgmr.msra.gmra.mxu2 %v5145_v9  ;;  %v4200_v56 = vpop.f32.mrf.mxu0 }
 0x377   : > { %3131 = vmatpush.bf16.msrb.mxu2 %v8523_v18  ;;  %v4201_v58 = vadd.f32 %v4200_v56, %v3633_v15  ;;  %v8614_v56 = vld [vmem:[#allocation56_spill] sm:$0xff] }
 0x378   : > { %v2159_v57 = vpop.f32.mrf.mxu1 }
 0x379   : > { %v4351_v5 = vmax.f32 %v4201_v58, 0.0 }
 0x37b   : > { %3132 = vmatpush.bf16.msrb.mxu2 %v8526_v27 }
 0x37e   : > { %v4202_v2 = vpop.f32.mrf.mxu0 }
 0x37f   : > { %v4203_v51 = vadd.f32 %v4202_v2, %v7623_v42 }
 0x380   : > { %v2161_v47 = vpop.f32.mrf.mxu1 }
 0x381   : > { %v4352_v25 = vmax.f32 %v4203_v51, 0.0  ;;  %v2162_v16 = vadd.f32 %v2161_v47, %v8612_v61  ;;  %v8615_v51 = vld [vmem:[#allocation68_spill] sm:$0xff] }
 0x383   : > { %v7777_v52 = vpack.c.bf16 %v4352_v25, %v4351_v5  ;;  %v2157_v5 = vadd.f32 %v2156_v45, %v8615_v51  ;;  %v2230_v25 = vmax.f32 %v2162_v16, 0.0 }
 0x386   : > { %5278 = vmatmul.msk.bf16.vlgmr.msrb.gmra.mxu2 %vm930_vm0, %v5579_v3  ;;  %v4205_v10 = vpop.f32.mrf.mxu0 }
 0x387   : > { %v4206_v26 = vadd.f32 %v4205_v10, %v7572_v55  ;;  %v2160_v55 = vadd.f32 %v2159_v57, %v8614_v56  ;;  %v8622_v56 = vld [vmem:[#allocation51_spill] sm:$0xff] }
 0x388   : > { %v2164_v37 = vpop.f32.mrf.mxu1 }
 0x389   : > { %v2165_v15 = vadd.f32 %v2164_v37, %v8611_v63  ;;  %v4353_v24 = vmax.f32 %v4206_v26, 0.0  ;;  %v8616_v37 = vld [vmem:[#allocation70_spill] sm:$0xff]  ;;  %v2229_v63 = vmax.f32 %v2160_v55, 0.0  ;;  %v8618_v26 = vld [vmem:[#allocation71_spill] sm:$0xff]  ;;  %v8623_v55 = vld [vmem:[#allocation45_spill] sm:$0xff] }
 0x38b   : > { %v2231_v3 = vmax.f32 %v2165_v15, 0.0  ;;  %v5581_v15 = vld [vmem:[%s8363_s2 + $0x210] sm:$0xff] }
 0x38e   : > { %v4207_v12 = vpop.f32.mrf.mxu0 }
 0x38f   : > { %v4208_v42 = vadd.f32 %v4207_v12, %v7554_v8  ;;  %v8617_v8 = vld [vmem:[#allocation64_spill] sm:$0xff]  ;;  %v2228_v12 = vmax.f32 %v2157_v5, 0.0 }
 0x390   : > { %v2166_v9 = vpop.f32.mrf.mxu1  ;;  %v2152_v47 = vadd.f32 %v2151_v39, %v8617_v8  ;;  %v5576_v39 = vld [vmem:[%s8365_s4 + $0x1c] sm:$0xf] }
 0x391   : > { %v2167_v20 = vadd.f32 %v2166_v9, %v8613_v38  ;;  %v4354_v43 = vmax.f32 %v4208_v42, 0.0  ;;  %v2267_v9 = vpack.c.bf16 %v2230_v25, %v2229_v63  ;;  %v2150_v42 = vadd.f32 %v7747_v0, %v8618_v26  ;;  %v5582_v0 = vld [vmem:[%s8363_s2 + $0x218] sm:$0xff] }
 0x392   : > { %v2226_v45 = vmax.f32 %v2152_v47, 0.0  ;;  %v5130_v38 = vld [vmem:[%s8365_s4 + $0x58] sm:$0xf0] }
 0x393   : > { %v2232_v58 = vmax.f32 %v2167_v20, 0.0  ;;  %v7789_v2 = vpack.c.bf16 %v4354_v43, %v4353_v24  ;;  %v2225_v16 = vmax.f32 %v2150_v42, 0.0  ;;  %v5133_v20 = vor.u32 %v5576_v39, %v5130_v38  ;;  %v5583_v43 = vld [vmem:[%s8363_s2 + $0x220] sm:$0xff]  ;;  %v8627_v8 = vld [vmem:[#allocation43_spill] sm:$0xff] }
 0x395   : > { %v2268_v10 = vpack.c.bf16 %v2232_v58, %v2231_v3  ;;  %v1174_v3 = vadd.f32 %v7657_v34, %v8623_v55  ;;  %v1167_v34 = vadd.f32 %v7612_v6, %v8627_v8  ;;  %v5146_v6 = vld [vmem:[%s8365_s4 + $0x48] sm:$0xf0] }
 0x396   : > { %5279 = vmatmul.msk.bf16.gmra.mxu2 %vm930_vm0, %v5580_v1  ;;  %v2155_v1 = vadd.f32 %v2154_v21, %v8616_v37  ;;  %v2265_v21 = vpack.c.bf16 %v2226_v45, %v2225_v16  ;;  %v8626_v37 = vld [vmem:[#allocation39_spill] sm:$0xff]  ;;  %v5587_v16 = vld [vmem:[%s8363_s2 + $0x240] sm:$0xff] }
 0x397   : > { %2331 = vmatpush.bf16.msrb.mxu3 %v2268_v10  ;;  %v8625_v10 = vld [vmem:[#allocation49_spill] sm:$0xff]  ;;  %v5586_v45 = vld [vmem:[%s8363_s2 + $0x238] sm:$0xff] }
 0x398   : > { %v2227_v57 = vmax.f32 %v2155_v1, 0.0  ;;  %v1251_v1 = vmax.f32 %v1174_v3, 0.0 }
 0x39a   : > { %v2266_v61 = vpack.c.bf16 %v2228_v12, %v2227_v57 }
 0x39b   : > { %2332 = vmatpush.bf16.msrb.mxu3 %v2267_v9 }
 0x39f   : > { %2333 = vmatpush.bf16.msrb.mxu3 %v2266_v61 }
 0x3a3   : > { %2334 = vmatpush.bf16.msrb.mxu3 %v2265_v21 }
 0x3a6   : > { %5280 = vmatmul.msk.bf16.gmra.mxu2 %vm930_vm0, %v5581_v15 }
 0x3a7   : > { %2335 = vmatpush.bf16.msrb.mxu3 %v7745_v41 }
 0x3ab   : > { %2336 = vmatpush.bf16.msrb.mxu3 %v7723_v22  ;;  %v2312_v22 = vpop.f32.mrf.mxu3 }
 0x3ac   : > { %v2313_v41 = vadd.f32 %v2312_v22, %v7706_v49 }
 0x3af   : > { %2337 = vmatpush.bf16.msrb.mxu3 %v7701_v14 }
 0x3b3   : > { %2338 = vmatpush.bf16.msrb.mxu3 %v7668_v60  ;;  %v8621_v60 = vld [vmem:[#allocation40_spill] sm:$0xff]  ;;  %v7904_v3 = vpop.f32.mrf.mxu3 }
 0x3b4   : > { %v1177_v49 = vadd.f32 %v7676_v28, %v8621_v60  ;;  %v5585_v28 = vld [vmem:[%s8363_s2 + $0x230] sm:$0xff]  ;;  %v8628_v60 = vld [vmem:[#allocation27_spill] sm:$0xff] }
 0x3b6   : > { %5281 = vmatmul.msk.bf16.gmra.mxu2 %vm930_vm0, %v5582_v0  ;;  %2339 = vmatmul.bf16.vlgmr.msrb.gmra.mxu3 %v5133_v20  ;;  %v1252_v25 = vmax.f32 %v1177_v49, 0.0 }
 0x3b7   : > { %2379 = vmatpush.bf16.msra.mxu3 %v7126_v19  ;;  %v5584_v19 = vld [vmem:[%s8363_s2 + $0x228] sm:$0xff] }
 0x3b9   : > { %v2326_v14 = vpop.f32.mrf.mxu2 }
 0x3ba   : > { %v7817_v24 = vadd.f32 %v2326_v14, %v2313_v41 }
 0x3bb   : > { %2380 = vmatpush.bf16.msra.mxu3 %v7304_v7 }
 0x3bf   : > { %2381 = vmatpush.bf16.msra.mxu3 %v7250_v11  ;;  %v5539_v11 = vld [vmem:[%s8365_s4 + $0x4] sm:$0xf] }
 0x3c1   : > { %v7847_v51 = vpop.f32.mrf.mxu2 }
 0x3c3   : > { %2382 = vmatpush.bf16.msra.mxu3 %v7202_v46  ;;  %v5138_v46 = vld [vmem:[%s8365_s4 + $0x40] sm:$0xf0] }
 0x3c4   : > { %v5141_v7 = vor.u32 %v5539_v11, %v5138_v46 }
 0x3c6   : > { %5282 = vmatmul.msk.bf16.gmra.mxu2 %vm930_vm0, %v5583_v43 }
 0x3c7   : > { %2383 = vmatpush.bf16.msra.mxu3 %v7149_v54 }
 0x3cb   : > { %2384 = vmatpush.bf16.msra.mxu3 %v7097_v31  ;;  %v8619_v31 = vld [vmem:[#allocation52_spill] sm:$0xff] }
 0x3cf   : > { %2385 = vmatpush.bf16.msra.mxu3 %v7045_v59  ;;  %v8620_v59 = vld [vmem:[#allocation48_spill] sm:$0xff] }
 0x3d0   : > { %v1179_v54 = vadd.f32 %v7686_v44, %v8620_v59  ;;  %v1169_v44 = vadd.f32 %v7626_v23, %v8626_v37  ;;  %v5540_v23 = vld [vmem:[%s8365_s4 + $0xc] sm:$0xf]  ;;  %v8630_v37 = vld [vmem:[#allocation131_spill] sm:$0xff] }
 0x3d1   : > { %v5149_v15 = vor.u32 %v5540_v23, %v5146_v6 }
 0x3d2   : > { %v1253_v58 = vmax.f32 %v1179_v54, 0.0  ;;  %v1249_v12 = vmax.f32 %v1169_v44, 0.0 }
 0x3d3   : > { %2386 = vmatpush.bf16.msra.mxu3 %v6993_v48  ;;  %v8624_v48 = vld [vmem:[#allocation46_spill] sm:$0xff] }
 0x3d4   : > { %v1172_v5 = vadd.f32 %v7643_v33, %v8624_v48  ;;  %v1292_v63 = vpack.c.bf16 %v1253_v58, %v1252_v25  ;;  %v1248_v33 = vmax.f32 %v1167_v34, 0.0 }
 0x3d6   : > { %5283 = vmatmul.msk.bf16.gmra.mxu2 %vm930_vm0, %v5584_v19  ;;  %2387 = vmatmul.bf16.vlgmr.msra.gmra.mxu3 %v5141_v7  ;;  %v1250_v47 = vmax.f32 %v1172_v5, 0.0  ;;  %v1290_v42 = vpack.c.bf16 %v1249_v12, %v1248_v33  ;;  %v8629_v5 = vld [vmem:[#allocation47_spill] sm:$0xff]  ;;  %v5592_v12 = vld [vmem:[%s8363_s2 + $0x268] sm:$0xff] }
 0x3d7   : > { %2407 = vmatpush.bf16.msrb.mxu3 %v8619_v31 }
 0x3d8   : > { %v1291_v9 = vpack.c.bf16 %v1251_v1, %v1250_v47  ;;  %v5591_v1 = vld [vmem:[%s8363_s2 + $0x260] sm:$0xff] }
 0x3d9   : > { %v2374_v26 = vpop.f32.mrf.mxu2 }
 0x3db   : > { %2408 = vmatpush.bf16.msrb.mxu3 %v8622_v56 }
 0x3df   : > { %2409 = vmatpush.bf16.msrb.mxu3 %v8625_v10 }
 0x3e1   : > { %v7867_v57 = vpop.f32.mrf.mxu2 }
 0x3e3   : > { %2410 = vmatpush.bf16.msrb.mxu3 %v1292_v63 }
 0x3e6   : > { %5284 = vmatmul.msk.bf16.gmra.mxu2 %vm930_vm0, %v5585_v28 }
 0x3e7   : > { %2411 = vmatpush.bf16.msrb.mxu3 %v1291_v9 }
 0x3eb   : > { %2412 = vmatpush.bf16.msrb.mxu3 %v1290_v42 }
 0x3ef   : > { %2413 = vmatpush.bf16.msrb.mxu3 %v7607_v17 }
 0x3f3   : > { %2414 = vmatpush.bf16.msrb.mxu3 %v7574_v50  ;;  %v5588_v50 = vld [vmem:[%s8363_s2 + $0x248] sm:$0xff] }
 0x3f6   : > { %2415 = vmatmul.bf16.vlgmr.msrb.gmra.mxu3 %v5149_v15  ;;  %5285 = vmatmul.msk.bf16.gmra.mxu2 %vm930_vm0, %v5586_v45  ;;  %v5593_v15 = vld [vmem:[%s8363_s2 + $0x270] sm:$0xff] }
 0x3f9   : > { %v2402_v17 = vpop.f32.mrf.mxu2 }
 0x401   : > { %v7874_v61 = vpop.f32.mrf.mxu2 }
 0x406   : > { %5286 = vmatmul.msk.bf16.gmra.mxu2 %vm930_vm0, %v5587_v16 }
 0x409   : > { %v3134_v21 = vpop.f32.mrf.mxu2 }
 0x40a   : > { %v3135_v0 = vadd.f32 %v3134_v21, %v7280_v40 }
 0x40c   : > { %v3294_v20 = vmax.f32 %v3135_v0, 0.0  ;;  %v5594_v0 = vld [vmem:[%s8363_s2 + $0x278] sm:$0xff] }
 0x411   : > { %v3136_v39 = vpop.f32.mrf.mxu2 }
 0x412   : > { %v3137_v38 = vadd.f32 %v3136_v39, %v7206_v32  ;;  %v5589_v32 = vld [vmem:[%s8363_s2 + $0x250] sm:$0xff] }
 0x414   : > { %v3295_v22 = vmax.f32 %v3137_v38, 0.0 }
 0x416   : > { %5287 = vmatmul.msk.bf16.gmra.mxu2 %vm930_vm0, %v5588_v50  ;;  %v7886_v41 = vpack.c.bf16 %v3295_v22, %v3294_v20  ;;  %v8631_v20 = vld [vmem:[#allocation14_spill] sm:$0xff] }
 0x419   : > { %v3139_v14 = vpop.f32.mrf.mxu2 }
 0x41a   : > { %v3140_v43 = vadd.f32 %v3139_v14, %v7444_v30 }
 0x41c   : > { %v3296_v40 = vmax.f32 %v3140_v43, 0.0  ;;  %v8632_v43 = vld [vmem:[#allocation29_spill] sm:$0xff] }
 0x421   : > { %v3141_v19 = vpop.f32.mrf.mxu2 }
 0x422   : > { %v3142_v11 = vadd.f32 %v3141_v19, %v7316_v13  ;;  %v5590_v13 = vld [vmem:[%s8363_s2 + $0x258] sm:$0xff] }
 0x424   : > { %v3297_v46 = vmax.f32 %v3142_v11, 0.0  ;;  %v8633_v11 = vld [vmem:[#allocation37_spill] sm:$0xff] }
 0x426   : > { %5288 = vmatmul.msk.bf16.gmra.mxu2 %vm930_vm0, %v5589_v32  ;;  %v7894_v7 = vpack.c.bf16 %v3297_v46, %v3296_v40  ;;  %v5595_v40 = vld [vmem:[%s8363_s2 + $0x280] sm:$0xff] }
 0x427   : > { %v8634_v46 = vld [vmem:[#allocation28_spill] sm:$0xff] }
 0x429   : > { %v3144_v31 = vpop.f32.mrf.mxu2 }
 0x42a   : > { %v3145_v59 = vadd.f32 %v3144_v31, %v7227_v4 }
 0x42c   : > { %v3298_v30 = vmax.f32 %v3145_v59, 0.0 }
 0x431   : > { %v3146_v54 = vpop.f32.mrf.mxu2 }
 0x432   : > { %v3147_v49 = vadd.f32 %v3146_v54, %v8628_v60 }
 0x434   : > { %v3299_v56 = vmax.f32 %v3147_v49, 0.0 }
 0x436   : > { %5289 = vmatmul.msk.bf16.gmra.mxu2 %vm930_vm0, %v5590_v13  ;;  %v7902_v55 = vpack.c.bf16 %v3299_v56, %v3298_v30  ;;  %v8636_v30 = vld [vmem:[#allocation53_spill] sm:$0xff] }
 0x439   : > { %v3149_v58 = vpop.f32.mrf.mxu2  ;;  %v2340_v48 = vpop.f32.mrf.mxu3 }
 0x43a   : > { %v3150_v25 = vadd.f32 %v3149_v58, %v8629_v5  ;;  %v2341_v4 = vadd.f32 %v2340_v48, %v7817_v24  ;;  %v8637_v5 = vld [vmem:[#allocation61_spill] sm:$0xff] }
 0x43c   : > { %v3300_v63 = vmax.f32 %v3150_v25, 0.0  ;;  %v2375_v33 = vadd.f32 %v2374_v26, %v2341_v4 }
 0x441   : > { %v3151_v10 = vpop.f32.mrf.mxu2  ;;  %v7916_v9 = vpop.f32.mrf.mxu3 }
 0x442   : > { %v3152_v44 = vadd.f32 %v3151_v10, %v8630_v37  ;;  %v8638_v37 = vld [vmem:[#allocation32_spill] sm:$0xff] }
 0x444   : > { %v3301_v28 = vmax.f32 %v3152_v44, 0.0 }
 0x446   : > { %5290 = vmatmul.msk.bf16.gmra.mxu2 %vm930_vm0, %v5591_v1  ;;  %v3365_v8 = vpack.c.bf16 %v3301_v28, %v3300_v63 }
 0x449   : > { %v3154_v34 = vpop.f32.mrf.mxu2 }
 0x44a   : > { %v3155_v44 = vadd.f32 %v3154_v34, %v8638_v37  ;;  %v5600_v37 = vld [vmem:[%s8363_s2 + $0x2a8] sm:$0xff] }
 0x451   : > { %v3156_v47 = vpop.f32.mrf.mxu2 }
 0x452   : > { %v3157_v25 = vadd.f32 %v3156_v47, %v8637_v5  ;;  %v5596_v47 = vld [vmem:[%s8363_s2 + $0x288] sm:$0xff] }
 0x454   : > { %v3303_v63 = vmax.f32 %v3157_v25, 0.0 }
 0x456   : > { %5291 = vmatmul.msk.bf16.gmra.mxu2 %vm930_vm0, %v5592_v12  ;;  %v3302_v12 = vmax.f32 %v3155_v44, 0.0 }
 0x459   : > { %v3159_v24 = vpop.f32.mrf.mxu2  ;;  %v2388_v42 = vpop.f32.mrf.mxu3 }
 0x45a   : > { %v2389_v23 = vadd.f32 %v2388_v42, %v2375_v33  ;;  %v3160_v56 = vadd.f32 %v3159_v24, %v8636_v30  ;;  %v8639_v33 = vld [vmem:[#allocation105_spill] sm:$0xff]  ;;  %v8646_v30 = vld [vmem:[#allocation82_spill] sm:$0xff] }
 0x45c   : > { %v2403_v26 = vadd.f32 %v2402_v17, %v2389_v23  ;;  %v8635_v17 = vld [vmem:[#allocation19_spill] sm:$0xff]  ;;  %v3304_v1 = vmax.f32 %v3160_v56, 0.0 }
 0x461   : > { %v3161_v6 = vpop.f32.mrf.mxu2  ;;  %v7923_v16 = vpop.f32.mrf.mxu3 }
 0x462   : > { %v3162_v60 = vadd.f32 %v3161_v6, %v8635_v17  ;;  %v8640_v6 = vld [vmem:[#allocation96_spill] sm:$0xff] }
 0x464   : > { %v3305_v4 = vmax.f32 %v3162_v60, 0.0  ;;  %v8645_v60 = vld [vmem:[#allocation91_spill] sm:$0xff] }
 0x466   : > { %5292 = vmatmul.msk.bf16.gmra.mxu2 %vm930_vm0, %v5593_v15  ;;  %v3367_v28 = vpack.c.bf16 %v3305_v4, %v3304_v1  ;;  %v3366_v15 = vpack.c.bf16 %v3303_v63, %v3302_v12  ;;  %v5601_v63 = vld [vmem:[%s8363_s2 + $0x2b0] sm:$0xff] }
 0x469   : > { %v3164_v45 = vpop.f32.mrf.mxu2 }
 0x46a   : > { %v3165_v31 = vadd.f32 %v3164_v45, %v8634_v46 }
 0x46c   : > { %v3306_v58 = vmax.f32 %v3165_v31, 0.0  ;;  %v5598_v31 = vld [vmem:[%s8363_s2 + $0x298] sm:$0xff] }
 0x471   : > { %v3166_v21 = vpop.f32.mrf.mxu2 }
 0x472   : > { %v3167_v19 = vadd.f32 %v3166_v21, %v8632_v43 }
 0x474   : > { %v3307_v49 = vmax.f32 %v3167_v19, 0.0 }
 0x476   : > { %5293 = vmatmul.msk.bf16.gmra.mxu2 %vm930_vm0, %v5594_v0  ;;  %v3368_v10 = vpack.c.bf16 %v3307_v49, %v3306_v58  ;;  %v5599_v58 = vld [vmem:[%s8363_s2 + $0x2a0] sm:$0xff] }
 0x479   : > { %v2416_v39 = vpop.f32.mrf.mxu3  ;;  %v3169_v38 = vpop.f32.mrf.mxu2 }
 0x47a   : > { %v7929_v50 = vadd.f32 %v2416_v39, %v2403_v26  ;;  %v3170_v22 = vadd.f32 %v3169_v38, %v8631_v20  ;;  %v8641_v26 = vld [vmem:[#allocation104_spill] sm:$0xff]  ;;  %v8642_v20 = vld [vmem:[#allocation102_spill] sm:$0xff] }
 0x47c   : > { %v3308_v59 = vmax.f32 %v3170_v22, 0.0 }
 0x481   : > { %v3171_v14 = vpop.f32.mrf.mxu2 }
 0x482   : > { %v3172_v32 = vadd.f32 %v3171_v14, %v8633_v11  ;;  %v5597_v14 = vld [vmem:[%s8363_s2 + $0x290] sm:$0xff]  ;;  %v8643_v11 = vld [vmem:[#allocation85_spill] sm:$0xff] }
 0x484   : > { %v3309_v54 = vmax.f32 %v3172_v32, 0.0 }
 0x486   : > { %v3369_v13 = vpack.c.bf16 %v3309_v54, %v3308_v59  ;;  %5294 = vmatmul.msk.bf16.gmra.mxu2 %vm930_vm0, %v5595_v40 }
 0x488   : > { %3414 = vmatpush.bf16.msra.mxu2 %v3369_v13 }
 0x489   : > { %v3174_v48 = vpop.f32.mrf.mxu2 }
 0x48a   : > { %v3175_v42 = vadd.f32 %v3174_v48, %v8639_v33  ;;  %v5602_v33 = vld [vmem:[%s8363_s2 + $0x2b8] sm:$0xff] }
 0x48c   : > { %3415 = vmatpush.bf16.msra.mxu2 %v3368_v10  ;;  %v3310_v45 = vmax.f32 %v3175_v42, 0.0 }
 0x490   : > { %3416 = vmatpush.bf16.msra.mxu2 %v3367_v28 }
 0x491   : > { %v3176_v23 = vpop.f32.mrf.mxu2 }
 0x492   : > { %v3177_v24 = vadd.f32 %v3176_v23, %v8640_v6  ;;  %v8647_v23 = vld [vmem:[#allocation72_spill] sm:$0xff] }
 0x494   : > { %v3311_v21 = vmax.f32 %v3177_v24, 0.0  ;;  %3417 = vmatpush.bf16.msra.mxu2 %v3366_v15  ;;  %v8648_v15 = vld [vmem:[#allocation75_spill] sm:$0xff] }
 0x496   : > { %5295 = vmatmul.msk.bf16.gmra.mxu2 %vm930_vm0, %v5596_v47  ;;  %v7949_v34 = vpack.c.bf16 %v3311_v21, %v3310_v45  ;;  %v8649_v45 = vld [vmem:[#allocation86_spill] sm:$0xff] }
 0x498   : > { %3418 = vmatpush.bf16.msra.mxu2 %v3365_v8 }
 0x499   : > { %v3179_v0 = vpop.f32.mrf.mxu2 }
 0x49a   : > { %v3180_v39 = vadd.f32 %v3179_v0, %v8641_v26  ;;  %v5603_v0 = vld [vmem:[%s8363_s2 + $0x2c0] sm:$0xff] }
 0x49b   : > { %v8650_v26 = vld [vmem:[#allocation84_spill] sm:$0xff] }
 0x49c   : > { %3419 = vmatpush.bf16.msra.mxu2 %v7902_v55  ;;  %v3312_v43 = vmax.f32 %v3180_v39, 0.0 }
 0x4a0   : > { %3420 = vmatpush.bf16.msra.mxu2 %v7894_v7  ;;  %v8644_v7 = vld [vmem:[#allocation100_spill] sm:$0xff] }
 0x4a1   : > { %v3181_v38 = vpop.f32.mrf.mxu2 }
 0x4a2   : > { %v3182_v22 = vadd.f32 %v3181_v38, %v8642_v20 }
 0x4a4   : > { %v3313_v19 = vmax.f32 %v3182_v22, 0.0  ;;  %3421 = vmatpush.bf16.msra.mxu2 %v7886_v41  ;;  %v8651_v22 = vld [vmem:[#allocation88_spill] sm:$0xff] }
 0x4a6   : > { %5296 = vmatmul.msk.bf16.gmra.mxu2 %vm930_vm0, %v5597_v14  ;;  %v7960_v8 = vpack.c.bf16 %v3313_v19, %v3312_v43 }
 0x4a9   : > { %v3184_v55 = vpop.f32.mrf.mxu2 }
 0x4aa   : > { %v3185_v32 = vadd.f32 %v3184_v55, %v8643_v11  ;;  %v8652_v55 = vld [vmem:[#allocation90_spill] sm:$0xff] }
 0x4ac   : > { %v3314_v59 = vmax.f32 %v3185_v32, 0.0 }
 0x4b1   : > { %v3186_v40 = vpop.f32.mrf.mxu2 }
 0x4b2   : > { %v3187_v46 = vadd.f32 %v3186_v40, %v8644_v7  ;;  %v8653_v7 = vld [vmem:[#allocation93_spill] sm:$0xff] }
 0x4b4   : > { %v3315_v54 = vmax.f32 %v3187_v46, 0.0 }
 0x4b6   : > { %5297 = vmatmul.msk.bf16.gmra.mxu2 %vm930_vm0, %v5598_v31  ;;  %v3372_v17 = vpack.c.bf16 %v3315_v54, %v3314_v59  ;;  %v8654_v54 = vld [vmem:[#allocation78_spill] sm:$0xff] }
 0x4b9   : > { %v3189_v41 = vpop.f32.mrf.mxu2 }
 0x4ba   : > { %v3190_v49 = vadd.f32 %v3189_v41, %v8645_v60 }
 0x4bc   : > { %v3316_v48 = vmax.f32 %v3190_v49, 0.0 }
 0x4c1   : > { %v3191_v13 = vpop.f32.mrf.mxu2 }
 0x4c2   : > { %v3192_v56 = vadd.f32 %v3191_v13, %v8646_v30 }
 0x4c4   : > { %v3317_v5 = vmax.f32 %v3192_v56, 0.0  ;;  %v8655_v56 = vld [vmem:[#allocation112_spill] sm:$0xff] }
 0x4c6   : > { %5298 = vmatmul.msk.bf16.gmra.mxu2 %vm930_vm0, %v5599_v58  ;;  %v3373_v25 = vpack.c.bf16 %v3317_v5, %v3316_v48  ;;  %v8656_v5 = vld [vmem:[#allocation124_spill] sm:$0xff] }
 0x4c9   : > { %v3194_v4 = vpop.f32.mrf.mxu2 }
 0x4ca   : > { %v3195_v41 = vadd.f32 %v3194_v4, %v8654_v54  ;;  %v5608_v54 = vld [vmem:[%s8363_s2 + $0x2e8] sm:$0xff] }
 0x4cc   : > { %v3318_v30 = vmax.f32 %v3195_v41, 0.0 }
 0x4d1   : > { %v3196_v10 = vpop.f32.mrf.mxu2 }
 0x4d2   : > { %v3197_v46 = vadd.f32 %v3196_v10, %v8653_v7  ;;  %v5604_v10 = vld [vmem:[%s8363_s2 + $0x2c8] sm:$0xff] }
 0x4d4   : > { %v3319_v49 = vmax.f32 %v3197_v46, 0.0 }
 0x4d6   : > { %5299 = vmatmul.msk.bf16.gmra.mxu2 %vm930_vm0, %v5600_v37 }
 0x4d9   : > { %v3199_v44 = vpop.f32.mrf.mxu2 }
 0x4da   : > { %v3200_v11 = vadd.f32 %v3199_v44, %v8652_v55  ;;  %v3374_v44 = vpack.c.bf16 %v3319_v49, %v3318_v30  ;;  %v8662_v55 = vld [vmem:[#allocation113_spill] sm:$0xff]  ;;  %v5609_v49 = vld [vmem:[%s8363_s2 + $0x2f0] sm:$0xff] }
 0x4dc   : > { %v3320_v60 = vmax.f32 %v3200_v11, 0.0 }
 0x4e1   : > { %v3201_v1 = vpop.f32.mrf.mxu2 }
 0x4e2   : > { %v3202_v14 = vadd.f32 %v3201_v1, %v8651_v22 }
 0x4e4   : > { %v3321_v31 = vmax.f32 %v3202_v14, 0.0  ;;  %v8661_v14 = vld [vmem:[#allocation99_spill] sm:$0xff] }
 0x4e6   : > { %5300 = vmatmul.msk.bf16.gmra.mxu2 %vm930_vm0, %v5601_v63  ;;  %v3375_v13 = vpack.c.bf16 %v3321_v31, %v3320_v60 }
 0x4e9   : > { %v3204_v28 = vpop.f32.mrf.mxu2 }
 0x4ea   : > { %v3205_v39 = vadd.f32 %v3204_v28, %v8650_v26 }
 0x4ec   : > { %v3322_v32 = vmax.f32 %v3205_v39, 0.0  ;;  %v5606_v39 = vld [vmem:[%s8363_s2 + $0x2d8] sm:$0xff] }
 0x4f1   : > { %v3206_v12 = vpop.f32.mrf.mxu2 }
 0x4f2   : > { %v3207_v47 = vadd.f32 %v3206_v12, %v8648_v15  ;;  %v8657_v12 = vld [vmem:[#allocation117_spill] sm:$0xff] }
 0x4f4   : > { %v3323_v43 = vmax.f32 %v3207_v47, 0.0 }
 0x4f6   : > { %5301 = vmatmul.msk.bf16.gmra.mxu2 %vm930_vm0, %v5602_v33  ;;  %v3376_v59 = vpack.c.bf16 %v3323_v43, %v3322_v32  ;;  %v5607_v32 = vld [vmem:[%s8363_s2 + $0x2e0] sm:$0xff] }
 0x4f9   : > { %v3209_v42 = vpop.f32.mrf.mxu2 }
 0x4fa   : > { %v3210_v6 = vadd.f32 %v3209_v42, %v8647_v23  ;;  %v8658_v23 = vld [vmem:[#allocation109_spill] sm:$0xff] }
 0x4fc   : > { %v3324_v38 = vmax.f32 %v3210_v6, 0.0 }
 0x501   : > { %v3211_v24 = vpop.f32.mrf.mxu2 }
 0x502   : > { %v3212_v21 = vadd.f32 %v3211_v24, %v8649_v45  ;;  %v5605_v24 = vld [vmem:[%s8363_s2 + $0x2d0] sm:$0xff]  ;;  %v8659_v45 = vld [vmem:[#allocation116_spill] sm:$0xff] }
 0x504   : > { %v3325_v20 = vmax.f32 %v3212_v21, 0.0 }
 0x506   : > { %v3377_v19 = vpack.c.bf16 %v3325_v20, %v3324_v38  ;;  %5302 = vmatmul.msk.bf16.gmra.mxu2 %vm930_vm0, %v5603_v0 }
 0x508   : > { %3428 = vmatpush.bf16.msra.mxu3 %v3377_v19 }
 0x509   : > { %v3214_v40 = vpop.f32.mrf.mxu2 }
 0x50a   : > { %v3215_v58 = vadd.f32 %v3214_v40, %v8655_v56  ;;  %v5610_v56 = vld [vmem:[%s8363_s2 + $0x2f8] sm:$0xff] }
 0x50c   : > { %3429 = vmatpush.bf16.msra.mxu3 %v3376_v59  ;;  %v3326_v1 = vmax.f32 %v3215_v58, 0.0 }
 0x510   : > { %3430 = vmatpush.bf16.msra.mxu3 %v3375_v13 }
 0x511   : > { %v3216_v48 = vpop.f32.mrf.mxu2 }
 0x512   : > { %v3217_v37 = vadd.f32 %v3216_v48, %v8656_v5  ;;  %v8663_v48 = vld [vmem:[#allocation97_spill] sm:$0xff] }
 0x514   : > { %v3327_v63 = vmax.f32 %v3217_v37, 0.0  ;;  %3431 = vmatpush.bf16.msra.mxu3 %v3374_v44  ;;  %v8664_v44 = vld [vmem:[#allocation89_spill] sm:$0xff] }
 0x516   : > { %5303 = vmatmul.msk.bf16.gmra.mxu2 %vm930_vm0, %v5604_v10  ;;  %v8004_v4 = vpack.c.bf16 %v3327_v63, %v3326_v1  ;;  %v8665_v1 = vld [vmem:[#allocation95_spill] sm:$0xff] }
 0x518   : > { %3432 = vmatpush.bf16.msra.mxu3 %v3373_v25 }
 0x519   : > { %v3219_v28 = vpop.f32.mrf.mxu2 }
 0x51a   : > { %v3220_v33 = vadd.f32 %v3219_v28, %v8657_v12  ;;  %v8666_v28 = vld [vmem:[#allocation98_spill] sm:$0xff] }
 0x51c   : > { %3433 = vmatpush.bf16.msra.mxu3 %v3372_v17  ;;  %v3328_v15 = vmax.f32 %v3220_v33, 0.0 }
 0x520   : > { %3434 = vmatpush.bf16.msra.mxu3 %v7960_v8  ;;  %v8660_v8 = vld [vmem:[#allocation114_spill] sm:$0xff] }
 0x521   : > { %v3221_v42 = vpop.f32.mrf.mxu2 }
 0x522   : > { %v3222_v6 = vadd.f32 %v3221_v42, %v8658_v23  ;;  %v8667_v23 = vld [vmem:[#allocation107_spill] sm:$0xff] }
 0x524   : > { %v3329_v47 = vmax.f32 %v3222_v6, 0.0  ;;  %3435 = vmatpush.bf16.msra.mxu3 %v7949_v34 }
 0x526   : > { %5304 = vmatmul.msk.bf16.gmra.mxu2 %vm930_vm0, %v5605_v24  ;;  %v8014_v25 = vpack.c.bf16 %v3329_v47, %v3328_v15  ;;  %v8668_v47 = vld [vmem:[#allocation92_spill] sm:$0xff] }
 0x529   : > { %v3224_v17 = vpop.f32.mrf.mxu2 }
 0x52a   : > { %v3225_v21 = vadd.f32 %v3224_v17, %v8659_v45 }
 0x52c   : > { %v3330_v38 = vmax.f32 %v3225_v21, 0.0 }
 0x531   : > { %v3226_v0 = vpop.f32.mrf.mxu2 }
 0x532   : > { %v3227_v26 = vadd.f32 %v3226_v0, %v8660_v8  ;;  %v8669_v0 = vld [vmem:[#allocation108_spill] sm:$0xff] }
 0x534   : > { %v3331_v20 = vmax.f32 %v3227_v26, 0.0 }
 0x536   : > { %5305 = vmatmul.msk.bf16.gmra.mxu2 %vm930_vm0, %v5606_v39  ;;  %v3380_v22 = vpack.c.bf16 %v3331_v20, %v3330_v38  ;;  %v8670_v38 = vld [vmem:[#allocation110_spill] sm:$0xff] }
 0x539   : > { %v3229_v34 = vpop.f32.mrf.mxu2 }
 0x53a   : > { %v3230_v43 = vadd.f32 %v3229_v34, %v8661_v14 }
 0x53c   : > { %v3332_v40 = vmax.f32 %v3230_v43, 0.0 }
 0x541   : > { %v3231_v19 = vpop.f32.mrf.mxu2 }
 0x542   : > { %v3232_v11 = vadd.f32 %v3231_v19, %v8662_v55  ;;  %v8671_v55 = vld [vmem:[#allocation130_spill] sm:$0xff] }
 0x544   : > { %v3333_v7 = vmax.f32 %v3232_v11, 0.0 }
 0x546   : > { %5306 = vmatmul.msk.bf16.gmra.mxu2 %vm930_vm0, %v5607_v32  ;;  %v3381_v46 = vpack.c.bf16 %v3333_v7, %v3332_v40  ;;  %v8672_v40 = vld [vmem:[#allocation129_spill] sm:$0xff] }
 0x549   : > { %v3234_v31 = vpop.f32.mrf.mxu2 }
 0x54a   : > { %v3235_v20 = vadd.f32 %v3234_v31, %v8670_v38  ;;  %v8673_v31 = vld [vmem:[#allocation127_spill] sm:$0xff]  ;;  %v5312_v38 = vld [vmem:[%s8365_s4 + $0x20] sm:$0xf] }
 0x54c   : > { %v3334_v19 = vmax.f32 %v3235_v20, 0.0  ;;  %v5613_v20 = vld [vmem:[%s8365_s4 + $0x5c] sm:$0xf0] }
 0x551   : > { %v3236_v59 = vpop.f32.mrf.mxu2 }
 0x552   : > { %v3237_v8 = vadd.f32 %v3236_v59, %v8669_v0  ;;  %v5314_v0 = vld [vmem:[%s8365_s4 + $0x60] sm:$0xf0] }
 0x554   : > { %v3335_v14 = vmax.f32 %v3237_v8, 0.0 }
 0x556   : > { %5307 = vmatmul.msk.bf16.gmra.mxu2 %vm930_vm0, %v5608_v54  ;;  %v3382_v54 = vpack.c.bf16 %v3335_v14, %v3334_v19  ;;  %v5320_v14 = vld [vmem:[%s8365_s4 + $0x28] sm:$0xf] }
 0x559   : > { %v3239_v41 = vpop.f32.mrf.mxu2 }
 0x55a   : > { %v3240_v17 = vadd.f32 %v3239_v41, %v8668_v47 }
 0x55c   : > { %v3336_v34 = vmax.f32 %v3240_v17, 0.0 }
 0x561   : > { %v3241_v60 = vpop.f32.mrf.mxu2 }
 0x562   : > { %v3242_v6 = vadd.f32 %v3241_v60, %v8667_v23 }
 0x564   : > { %v3337_v26 = vmax.f32 %v3242_v6, 0.0 }
 0x566   : > { %5308 = vmatmul.msk.bf16.gmra.mxu2 %vm930_vm0, %v5609_v49  ;;  %v3383_v43 = vpack.c.bf16 %v3337_v26, %v3336_v34  ;;  %v5313_v34 = vor.u32 %v5613_v20, %v5312_v38 }
 0x569   : > { %v3244_v13 = vpop.f32.mrf.mxu2 }
 0x56a   : > { %v3245_v12 = vadd.f32 %v3244_v13, %v8666_v28 }
 0x56c   : > { %v3338_v45 = vmax.f32 %v3245_v12, 0.0 }
 0x571   : > { %v3246_v30 = vpop.f32.mrf.mxu2 }
 0x572   : > { %v3247_v10 = vadd.f32 %v3246_v30, %v8664_v44 }
 0x574   : > { %v3339_v24 = vmax.f32 %v3247_v10, 0.0  ;;  %v8675_v10 = vld [vmem:[#allocation118_spill] sm:$0xff] }
 0x576   : > { %5309 = vmatmul.msk.bf16.gmra.mxu2 %vm930_vm0, %v5610_v56  ;;  %v3384_v39 = vpack.c.bf16 %v3339_v24, %v3338_v45  ;;  %v8674_v56 = vld [vmem:[#allocation121_spill] sm:$0xff] }
 0x577   : > { %v8678_v24 = vld [vmem:[#allocation125_spill] sm:$0xff] }
 0x579   : > { %v3249_v58 = vpop.f32.mrf.mxu2 }
 0x57a   : > { %v3250_v5 = vadd.f32 %v3249_v58, %v8663_v48 }
 0x57c   : > { %v3340_v33 = vmax.f32 %v3250_v5, 0.0 }
 0x581   : > { %v3251_v37 = vpop.f32.mrf.mxu2 }
 0x582   : > { %v3252_v63 = vadd.f32 %v3251_v37, %v8665_v1 }
 0x584   : > { %v3341_v42 = vmax.f32 %v3252_v63, 0.0 }
 0x586   : > { %v3385_v15 = vpack.c.bf16 %v3341_v42, %v3340_v33  ;;  %3422 = vmatmul.bf16.vlgmr.msra.gmra.mxu2 %v5313_v34 }
 0x588   : > { %3442 = vmatpush.bf16.msrb.mxu3 %v3385_v15 }
 0x589   : > { %v3254_v21 = vpop.f32.mrf.mxu2 }
 0x58a   : > { %v3255_v11 = vadd.f32 %v3254_v21, %v8671_v55  ;;  %v5611_v21 = vld [vmem:[%s8365_s4 + $0x24] sm:$0xf] }
 0x58b   : > { %v5317_v8 = vor.u32 %v5611_v21, %v5314_v0 }
 0x58c   : > { %3443 = vmatpush.bf16.msrb.mxu3 %v3384_v39  ;;  %v3342_v41 = vmax.f32 %v3255_v11, 0.0 }
 0x58d   : > { %3436 = vmatmul.bf16.vlgmr.msra.gmra.mxu3 %v5317_v8 }
 0x590   : > { %3444 = vmatpush.bf16.msrb.mxu3 %v3383_v43  ;;  %v5614_v43 = vld [vmem:[%s8365_s4 + $0x64] sm:$0xf0] }
 0x591   : > { %v3256_v32 = vpop.f32.mrf.mxu2  ;;  %v5321_v19 = vor.u32 %v5614_v43, %v5320_v14  ;;  %v8687_v14 = vld [vmem:[#allocation55_spill] sm:$0xff] }
 0x592   : > { %v3257_v7 = vadd.f32 %v3256_v32, %v8672_v40  ;;  %v4210_v32 = vpop.f32.mrf.mxu0 }
 0x594   : > { %v3343_v60 = vmax.f32 %v3257_v7, 0.0  ;;  %3445 = vmatpush.bf16.msrb.mxu3 %v3382_v54 }
 0x596   : > { %v8050_v59 = vpack.c.bf16 %v3343_v60, %v3342_v41  ;;  %v8679_v60 = vld [vmem:[#allocation111_spill] sm:$0xff] }
 0x598   : > { %3446 = vmatpush.bf16.msrb.mxu3 %v3381_v46  ;;  %v8676_v46 = vld [vmem:[#allocation128_spill] sm:$0xff] }
 0x599   : > { %v3259_v49 = vpop.f32.mrf.mxu2 }
 0x59a   : > { %v3260_v13 = vadd.f32 %v3259_v49, %v8673_v31  ;;  %v4212_v7 = vpop.f32.mrf.mxu0 }
 0x59c   : > { %3447 = vmatpush.bf16.msrb.mxu3 %v3380_v22  ;;  %v3344_v48 = vmax.f32 %v3260_v13, 0.0  ;;  %v8680_v13 = vld [vmem:[#allocation119_spill] sm:$0xff] }
 0x5a0   : > { %3448 = vmatpush.bf16.msrb.mxu3 %v8014_v25  ;;  %v8677_v25 = vld [vmem:[#allocation126_spill] sm:$0xff] }
 0x5a1   : > { %v3261_v30 = vpop.f32.mrf.mxu2 }
 0x5a2   : > { %v3262_v58 = vadd.f32 %v3261_v30, %v8674_v56  ;;  %v4215_v41 = vpop.f32.mrf.mxu0  ;;  %v8681_v56 = vld [vmem:[#allocation103_spill] sm:$0xff] }
 0x5a4   : > { %v3345_v5 = vmax.f32 %v3262_v58, 0.0  ;;  %3449 = vmatpush.bf16.msrb.mxu3 %v8004_v4 }
 0x5a6   : > { %v8056_v37 = vpack.c.bf16 %v3345_v5, %v3344_v48  ;;  %v8682_v48 = vld [vmem:[#allocation106_spill] sm:$0xff] }
 0x5a7   : > { %3450 = vmatmul.bf16.vlgmr.msrb.gmra.mxu3 %v5321_v19  ;;  %v8688_v19 = vld [vmem:[#allocation34_spill] sm:$0xff] }
 0x5a9   : > { %v3264_v44 = vpop.f32.mrf.mxu2 }
 0x5aa   : > { %v3265_v1 = vadd.f32 %v3264_v44, %v8675_v10 }
 0x5ac   : > { %v3346_v22 = vmax.f32 %v3265_v1, 0.0  ;;  %v8683_v1 = vld [vmem:[#allocation120_spill] sm:$0xff] }
 0x5b1   : > { %v3266_v63 = vpop.f32.mrf.mxu2 }
 0x5b2   : > { %v3267_v28 = vadd.f32 %v3266_v63, %v8676_v46 }
 0x5b4   : > { %v3347_v12 = vmax.f32 %v3267_v28, 0.0 }
 0x5b6   : > { %v3388_v33 = vpack.c.bf16 %v3347_v12, %v3346_v22  ;;  %v8684_v22 = vld [vmem:[#allocation122_spill] sm:$0xff] }
 0x5b9   : > { %v3269_v42 = vpop.f32.mrf.mxu2 }
 0x5ba   : > { %v3270_v23 = vadd.f32 %v3269_v42, %v8677_v25  ;;  %v4217_v25 = vpop.f32.mrf.mxu0 }
 0x5bc   : > { %v3348_v47 = vmax.f32 %v3270_v23, 0.0  ;;  %v8685_v23 = vld [vmem:[#allocation115_spill] sm:$0xff] }
 0x5c1   : > { %v3271_v6 = vpop.f32.mrf.mxu2 }
 0x5c2   : > { %v3272_v15 = vadd.f32 %v3271_v6, %v8678_v24  ;;  %v4220_v34 = vpop.f32.mrf.mxu0 }
 0x5c4   : > { %v3349_v17 = vmax.f32 %v3272_v15, 0.0 }
 0x5c6   : > { %v3389_v4 = vpack.c.bf16 %v3349_v17, %v3348_v47  ;;  %v8686_v47 = vld [vmem:[#allocation123_spill] sm:$0xff] }
 0x5c9   : > { %v3274_v45 = vpop.f32.mrf.mxu2 }
 0x5ca   : > { %v3275_v17 = vadd.f32 %v3274_v45, %v8686_v47  ;;  %v5612_v45 = vld [vmem:[%s8365_s4 + $0x2c] sm:$0xf]  ;;  %v3683_v47 = vpop.permute.xlu0 %3682 }
 0x5cc   : > { %v3350_v38 = vmax.f32 %v3275_v17, 0.0 }
 0x5d1   : > { %v3276_v26 = vpop.f32.mrf.mxu2 }
 0x5d2   : > { %v3277_v6 = vadd.f32 %v3276_v26, %v8685_v23  ;;  %v5322_v26 = vld [vmem:[%s8365_s4 + $0x68] sm:$0xf0] }
 0x5d4   : > { %v3351_v0 = vmax.f32 %v3277_v6, 0.0 }
 0x5d6   : > { %v3390_v20 = vpack.c.bf16 %v3351_v0, %v3350_v38  ;;  %v8693_v0 = vld [vmem:[#allocation8_spill] sm:$0xff]  ;;  %v5632_v38 = vld [vmem:[%s8363_s2 + $0x388] sm:$0xff] }
 0x5d9   : > { %v3279_v39 = vpop.f32.mrf.mxu2 }
 0x5da   : > { %v3280_v12 = vadd.f32 %v3279_v39, %v8684_v22  ;;  %v4222_v39 = vpop.f32.mrf.mxu0 }
 0x5db   : > { %v4223_v43 = vadd.f32 %v4222_v39, %v8687_v14  ;;  %v8694_v14 = vld [vmem:[#allocation13_spill] sm:$0xff] }
 0x5dc   : > { %v3352_v21 = vmax.f32 %v3280_v12, 0.0  ;;  %v5630_v12 = vld [vmem:[%s8363_s2 + $0x378] sm:$0xff] }
 0x5e1   : > { %v3281_v55 = vpop.f32.mrf.mxu2 }
 0x5e2   : > { %v3282_v63 = vadd.f32 %v3281_v55, %v8683_v1  ;;  %v4221_v55 = vadd.f32 %v4220_v34, %v8688_v19 }
 0x5e4   : > { %v3353_v24 = vmax.f32 %v3282_v63, 0.0  ;;  %v5627_v63 = vld [vmem:[%s8363_s2 + $0x360] sm:$0xff] }
 0x5e6   : > { %v3391_v8 = vpack.c.bf16 %v3353_v24, %v3352_v21  ;;  %v5631_v24 = vld [vmem:[%s8363_s2 + $0x380] sm:$0xff] }
 0x5e9   : > { %v3284_v11 = vpop.f32.mrf.mxu2 }
 0x5ea   : > { %v3285_v5 = vadd.f32 %v3284_v11, %v8682_v48  ;;  %v5325_v11 = vor.u32 %v5612_v45, %v5322_v26  ;;  %v8695_v26 = vld [vmem:[#allocation25_spill] sm:$0xff] }
 0x5ec   : > { %v3354_v42 = vmax.f32 %v3285_v5, 0.0 }
 0x5f1   : > { %v3286_v40 = vpop.f32.mrf.mxu2 }
 0x5f2   : > { %v3287_v30 = vadd.f32 %v3286_v40, %v8680_v13  ;;  %v8689_v40 = vld [vmem:[#allocation36_spill] sm:$0xff] }
 0x5f4   : > { %v3355_v46 = vmax.f32 %v3287_v30, 0.0 }
 0x5f6   : > { %v3392_v15 = vpack.c.bf16 %v3355_v46, %v3354_v42  ;;  %v5628_v46 = vld [vmem:[%s8363_s2 + $0x368] sm:$0xff] }
 0x5f9   : > { %v3289_v54 = vpop.f32.mrf.mxu2 }
 0x5fa   : > { %v3290_v49 = vadd.f32 %v3289_v54, %v8679_v60  ;;  %v4218_v54 = vadd.f32 %v4217_v25, %v8689_v40  ;;  %v4359_v60 = vmax.f32 %v4221_v55, 0.0  ;;  %v5633_v55 = vld [vmem:[%s8363_s2 + $0x390] sm:$0xff] }
 0x5fc   : > { %v3356_v44 = vmax.f32 %v3290_v49, 0.0  ;;  %v8691_v49 = vld [vmem:[#allocation38_spill] sm:$0xff]  ;;  %v4358_v13 = vmax.f32 %v4218_v54, 0.0 }
 0x601   : > { %v3291_v31 = vpop.f32.mrf.mxu2 }
 0x602   : > { %v3292_v58 = vadd.f32 %v3291_v31, %v8681_v56  ;;  %v4213_v31 = vadd.f32 %v4212_v7, %v8691_v49  ;;  %v8692_v56 = vld [vmem:[#allocation33_spill] sm:$0xff] }
 0x603   : > { %v8697_v49 = vld [vmem:[#allocation81_spill] sm:$0xff] }
 0x604   : > { %v3357_v10 = vmax.f32 %v3292_v58, 0.0  ;;  %v4211_v58 = vadd.f32 %v4210_v32, %v8692_v56  ;;  %v4356_v5 = vmax.f32 %v4213_v31, 0.0  ;;  %v8117_v32 = vpop.f32.mrf.mxu3 }
 0x606   : > { %v3393_v28 = vpack.c.bf16 %v3357_v10, %v3356_v44  ;;  %v4355_v10 = vmax.f32 %v4211_v58, 0.0 }
 0x608   : > { %3456 = vmatpush.bf16.msra.mxu3 %v3393_v28  ;;  %v5629_v28 = vld [vmem:[%s8363_s2 + $0x370] sm:$0xff] }
 0x60c   : > { %3457 = vmatpush.bf16.msra.mxu3 %v3392_v15 }
 0x610   : > { %3458 = vmatpush.bf16.msra.mxu3 %v3391_v8  ;;  %v3437_v7 = vpop.f32.mrf.mxu3 }
 0x614   : > { %3459 = vmatpush.bf16.msra.mxu3 %v3390_v20 }
 0x618   : > { %3460 = vmatpush.bf16.msra.mxu3 %v3389_v4  ;;  %v4360_v4 = vmax.f32 %v4223_v43, 0.0 }
 0x61a   : > { %v4420_v30 = vpack.c.bf16 %v4360_v4, %v4359_v60 }
 0x61c   : > { %3461 = vmatpush.bf16.msra.mxu3 %v3388_v33  ;;  %v8690_v33 = vld [vmem:[#allocation35_spill] sm:$0xff] }
 0x620   : > { %3462 = vmatpush.bf16.msra.mxu3 %v8056_v37  ;;  %v4216_v37 = vadd.f32 %v4215_v41, %v8690_v33  ;;  %v8696_v33 = vld [vmem:[#allocation26_spill] sm:$0xff] }
 0x622   : > { %v4357_v48 = vmax.f32 %v4216_v37, 0.0 }
 0x624   : > { %3463 = vmatpush.bf16.msra.mxu3 %v8050_v59  ;;  %v4419_v44 = vpack.c.bf16 %v4358_v13, %v4357_v48  ;;  %v4418_v59 = vpack.c.bf16 %v4356_v5, %v4355_v10  ;;  %v5634_v13 = vld [vmem:[%s8363_s2 + $0x398] sm:$0xff]  ;;  %v8698_v5 = vld [vmem:[#allocation5_spill] sm:$0xff] }
 0x627   : > { %3464 = vmatmul.bf16.vlgmr.msra.gmra.mxu3 %v5325_v11 }
 0x628   : > { %5653 = vmatpush.bf16.msrb.mxu3 %v8523_v18  ;;  %v5623_v18 = vld [vmem:[%s8363_s2 + $0x340] sm:$0xff] }
 0x62c   : > { %5654 = vmatpush.bf16.msrb.mxu3 %v8526_v27  ;;  %v5624_v27 = vld [vmem:[%s8363_s2 + $0x348] sm:$0xff] }
 0x630   : > { %4465 = vmatpush.bf16.msra.mxu3 %v4420_v30 }
 0x634   : > { %4466 = vmatpush.bf16.msra.mxu3 %v4419_v44 }
 0x637   : > { %5462 = vmatmul.msk.bf16.vlgmr.msrb.gmra.mxu3 %vm930_vm0, %v5623_v18 }
 0x638   : > { %4467 = vmatpush.bf16.msra.mxu3 %v4418_v59  ;;  %v8699_v59 = vld [vmem:[#allocation31_spill] sm:$0xff] }
 0x63c   : > { %4468 = vmatpush.bf16.msra.mxu3 %v7789_v2  ;;  %v5625_v2 = vld [vmem:[%s8363_s2 + $0x350] sm:$0xff] }
 0x640   : > { %4469 = vmatpush.bf16.msra.mxu3 %v7777_v52  ;;  %v5626_v52 = vld [vmem:[%s8363_s2 + $0x358] sm:$0xff] }
 0x644   : > { %4470 = vmatpush.bf16.msra.mxu3 %v7770_v35  ;;  %v8123_v35 = vpop.f32.mrf.mxu3 }
 0x647   : > { %5463 = vmatmul.msk.bf16.gmra.mxu3 %vm930_vm0, %v5624_v27  ;;  %v5635_v27 = vld [vmem:[%s8363_s2 + $0x3a0] sm:$0xff] }
 0x648   : > { %4471 = vmatpush.bf16.msra.mxu3 %v7754_v29  ;;  %v3423_v29 = vpop.f32.mrf.mxu2 }
 0x649   : > { %v3438_v41 = vadd.f32 %v3437_v7, %v3423_v29 }
 0x64c   : > { %4472 = vmatpush.bf16.msra.mxu3 %v7742_v36  ;;  %v3451_v36 = vpop.f32.mrf.mxu3 }
 0x64d   : > { %v3452_v1 = vadd.f32 %v3451_v36, %v3438_v41  ;;  %v5636_v36 = vld [vmem:[%s8363_s2 + $0x3a8] sm:$0xff] }
 0x654   : > { %v8141_v22 = vpop.f32.mrf.mxu3 }
 0x657   : > { %5464 = vmatmul.msk.bf16.gmra.mxu3 %vm930_vm0, %v5625_v2 }
 0x667   : > { %5465 = vmatmul.msk.bf16.gmra.mxu3 %vm930_vm0, %v5626_v52 }
 0x677   : > { %5466 = vmatmul.msk.bf16.gmra.mxu3 %vm930_vm0, %v5627_v63 }
 0x687   : > { %5467 = vmatmul.msk.bf16.gmra.mxu3 %vm930_vm0, %v5628_v46 }
 0x697   : > { %5468 = vmatmul.msk.bf16.gmra.mxu3 %vm930_vm0, %v5629_v28 }
 0x6a7   : > { %5469 = vmatmul.msk.bf16.gmra.mxu3 %vm930_vm0, %v5630_v12  ;;  %v5637_v12 = vld [vmem:[%s8363_s2 + $0x3b0] sm:$0xff] }
 0x6aa   : > { %v3465_v42 = vpop.f32.mrf.mxu3 }
 0x6ab   : > { %v3466_v25 = vadd.f32 %v3465_v42, %v3452_v1  ;;  %v8188_v1 = vpop.permute.xlu0 %3887 }
 0x6ad   : > { %v8148_v23 = vadd.f32 %v3466_v25, %v7929_v50 }
 0x6b2   : > { %v8150_v6 = vpop.f32.mrf.mxu3 }
 0x6b3   : > { %v8191_v46 = vpop.permute.xlu0 %3792 }
 0x6b7   : > { %5470 = vmatmul.msk.bf16.gmra.mxu3 %vm930_vm0, %v5631_v24 }
 0x6ba   : > { %v4225_v15 = vpop.f32.mrf.mxu3 }
 0x6bb   : > { %v4226_v17 = vadd.f32 %v4225_v15, %v3683_v47  ;;  %v8197_v42 = vpop.permute.xlu0 %3877  ;;  %v5638_v15 = vld [vmem:[%s8363_s2 + $0x3b8] sm:$0xff] }
 0x6bd   : > { %v4361_v50 = vmax.f32 %v4226_v17, 0.0 }
 0x6c2   : > { %v4227_v21 = vpop.f32.mrf.mxu3 }
 0x6c3   : > { %v4228_v8 = vadd.f32 %v4227_v21, %v8693_v0  ;;  %v3783_v47 = vpop.permute.xlu0 %3782  ;;  %v8203_v21 = vpop.permute.xlu2 %3862 }
 0x6c5   : > { %v4362_v20 = vmax.f32 %v4228_v8, 0.0  ;;  %v8700_v8 = vld [vmem:[#allocation59_spill] sm:$0xff] }
 0x6c7   : > { %5471 = vmatmul.msk.bf16.gmra.mxu3 %vm930_vm0, %v5632_v38  ;;  %v8161_v34 = vpack.c.bf16 %v4362_v20, %v4361_v50  ;;  %v8701_v20 = vld [vmem:[#allocation17_spill] sm:$0xff] }
 0x6ca   : > { %v4230_v39 = vpop.f32.mrf.mxu3 }
 0x6cb   : > { %v4231_v43 = vadd.f32 %v4230_v39, %v8694_v14  ;;  %v8205_v0 = vpop.permute.xlu0 %3867  ;;  %v8702_v14 = vld [vmem:[#allocation58_spill] sm:$0xff] }
 0x6cd   : > { %v4363_v11 = vmax.f32 %v4231_v43, 0.0 }
 0x6d2   : > { %v4232_v45 = vpop.f32.mrf.mxu3 }
 0x6d3   : > { %v4233_v19 = vadd.f32 %v4232_v45, %v8695_v26  ;;  %v5639_v45 = vld [vmem:[%s8363_s2 + $0x3c0] sm:$0xff]  ;;  %v8703_v26 = vld [vmem:[#allocation50_spill] sm:$0xff] }
 0x6d5   : > { %v4364_v40 = vmax.f32 %v4233_v19, 0.0 }
 0x6d7   : > { %5472 = vmatmul.msk.bf16.gmra.mxu3 %vm930_vm0, %v5633_v55  ;;  %v8169_v54 = vpack.c.bf16 %v4364_v40, %v4363_v11  ;;  %v3778_v40 = vpop.permute.xlu2 %3777 }
 0x6da   : > { %v4235_v4 = vpop.f32.mrf.mxu3 }
 0x6db   : > { %v4236_v37 = vadd.f32 %v4235_v4, %v8696_v33  ;;  %v8704_v4 = vld [vmem:[#allocation9_spill] sm:$0xff] }
 0x6dd   : > { %v4365_v30 = vmax.f32 %v4236_v37, 0.0 }
 0x6e2   : > { %v4237_v60 = vpop.f32.mrf.mxu3 }
 0x6e3   : > { %v4238_v31 = vadd.f32 %v4237_v60, %v8697_v49  ;;  %v8216_v49 = vpop.permute.xlu0 %3852 }
 0x6e5   : > { %v4366_v56 = vmax.f32 %v4238_v31, 0.0  ;;  %v8705_v31 = vld [vmem:[#allocation60_spill] sm:$0xff] }
 0x6e7   : > { %5473 = vmatmul.msk.bf16.gmra.mxu3 %vm930_vm0, %v5634_v13  ;;  %v8177_v58 = vpack.c.bf16 %v4366_v56, %v4365_v30 }
 0x6ea   : > { %v4240_v48 = vpop.f32.mrf.mxu3 }
 0x6eb   : > { %v4241_v44 = vadd.f32 %v4240_v48, %v8698_v5  ;;  %v8706_v48 = vld [vmem:[#allocation57_spill] sm:$0xff] }
 0x6ed   : > { %v4367_v2 = vmax.f32 %v4241_v44, 0.0 }
 0x6f2   : > { %v4242_v10 = vpop.f32.mrf.mxu3 }
 0x6f3   : > { %v4243_v18 = vadd.f32 %v4242_v10, %v8699_v59  ;;  %v8707_v59 = vld [vmem:[#allocation42_spill] sm:$0xff] }
 0x6f5   : > { %v4368_v7 = vmax.f32 %v4243_v18, 0.0 }
 0x6f7   : > { %5474 = vmatmul.msk.bf16.gmra.mxu3 %vm930_vm0, %v5635_v27  ;;  %v4424_v29 = vpack.c.bf16 %v4368_v7, %v4367_v2 }
 0x6fa   : > { %v4245_v52 = vpop.f32.mrf.mxu3 }
 0x6fb   : > { %v4246_v18 = vadd.f32 %v4245_v52, %v8707_v59  ;;  %v3788_v52 = vpop.permute.xlu1 %3787  ;;  %v5644_v59 = vld [vmem:[%s8363_s2 + $0x3e8] sm:$0xff] }
 0x702   : > { %v4247_v41 = vpop.f32.mrf.mxu3 }
 0x703   : > { %v4248_v5 = vadd.f32 %v4247_v41, %v8706_v48  ;;  %v5640_v41 = vld [vmem:[%s8363_s2 + $0x3c8] sm:$0xff] }
 0x705   : > { %v4370_v2 = vmax.f32 %v4248_v5, 0.0 }
 0x707   : > { %5475 = vmatmul.msk.bf16.gmra.mxu3 %vm930_vm0, %v5636_v36  ;;  %v3763_v36 = vpop.permute.xlu2 %3762 }
 0x70a   : > { %v4250_v63 = vpop.f32.mrf.mxu3 }
 0x70b   : > { %v4251_v13 = vadd.f32 %v4250_v63, %v8705_v31 }
 0x70d   : > { %v4371_v27 = vmax.f32 %v4251_v13, 0.0  ;;  %v8708_v13 = vld [vmem:[#allocation6_spill] sm:$0xff] }
 0x712   : > { %v4252_v28 = vpop.f32.mrf.mxu3 }
 0x713   : > { %v4253_v33 = vadd.f32 %v4252_v28, %v8704_v4  ;;  %v4369_v28 = vmax.f32 %v4246_v18, 0.0 }
 0x715   : > { %v4372_v44 = vmax.f32 %v4253_v33, 0.0 }
 0x717   : > { %5476 = vmatmul.msk.bf16.gmra.mxu3 %vm930_vm0, %v5637_v12  ;;  %v4426_v7 = vpack.c.bf16 %v4372_v44, %v4371_v27  ;;  %v5645_v27 = vld [vmem:[%s8363_s2 + $0x3f0] sm:$0xff] }
 0x71a   : > { %v4255_v25 = vpop.f32.mrf.mxu3 }
 0x71b   : > { %v4256_v19 = vadd.f32 %v4255_v25, %v8703_v26  ;;  %v3768_v25 = vpop.permute.xlu0 %3767 }
 0x71d   : > { %v4373_v30 = vmax.f32 %v4256_v19, 0.0 }
 0x722   : > { %v4257_v24 = vpop.f32.mrf.mxu3 }
 0x723   : > { %v4258_v39 = vadd.f32 %v4257_v24, %v8701_v20  ;;  %v3773_v20 = vpop.permute.xlu1 %3772 }
 0x725   : > { %v4374_v37 = vmax.f32 %v4258_v39, 0.0 }
 0x727   : > { %5477 = vmatmul.msk.bf16.gmra.mxu3 %vm930_vm0, %v5638_v15  ;;  %v4427_v10 = vpack.c.bf16 %v4374_v37, %v4373_v30  ;;  %v4425_v15 = vpack.c.bf16 %v4370_v2, %v4369_v28 }
 0x72a   : > { %v4260_v17 = vpop.f32.mrf.mxu3 }
 0x72b   : > { %v4261_v38 = vadd.f32 %v4260_v17, %v8700_v8 }
 0x72d   : > { %v4375_v55 = vmax.f32 %v4261_v38, 0.0 }
 0x732   : > { %v4262_v50 = vpop.f32.mrf.mxu3 }
 0x733   : > { %v4263_v43 = vadd.f32 %v4262_v50, %v8702_v14 }
 0x735   : > { %v4376_v11 = vmax.f32 %v4263_v43, 0.0 }
 0x737   : > { %v4428_v60 = vpack.c.bf16 %v4376_v11, %v4375_v55  ;;  %5478 = vmatmul.msk.bf16.gmra.mxu3 %vm930_vm0, %v5639_v45  ;;  %v5641_v45 = vld [vmem:[%s8363_s2 + $0x3d0] sm:$0xff] }
 0x739   : > { %4479 = vmatpush.bf16.msra.mxu1 %v4428_v60 }
 0x73a   : > { %v4265_v56 = vpop.f32.mrf.mxu3 }
 0x73b   : > { %v4266_v12 = vadd.f32 %v4265_v56, %v3763_v36  ;;  %v5646_v36 = vld [vmem:[%s8363_s2 + $0x3f8] sm:$0xff] }
 0x73d   : > { %4480 = vmatpush.bf16.msra.mxu1 %v4427_v10  ;;  %v4377_v17 = vmax.f32 %v4266_v12, 0.0  ;;  %v8709_v12 = vld [vmem:[#allocation20_spill] sm:$0xff] }
 0x741   : > { %4481 = vmatpush.bf16.msra.mxu1 %v4426_v7 }
 0x742   : > { %v4267_v24 = vpop.f32.mrf.mxu3 }
 0x743   : > { %v4268_v63 = vadd.f32 %v4267_v24, %v3768_v25 }
 0x745   : > { %v4378_v8 = vmax.f32 %v4268_v63, 0.0  ;;  %4482 = vmatpush.bf16.msra.mxu1 %v4425_v15  ;;  %v8710_v63 = vld [vmem:[#allocation24_spill] sm:$0xff] }
 0x747   : > { %5479 = vmatmul.msk.bf16.gmra.mxu3 %vm930_vm0, %v5640_v41  ;;  %v8225_v38 = vpack.c.bf16 %v4378_v8, %v4377_v17  ;;  %v8711_v41 = vld [vmem:[#allocation16_spill] sm:$0xff]  ;;  %v8712_v8 = vld [vmem:[#allocation30_spill] sm:$0xff] }
 0x749   : > { %4483 = vmatpush.bf16.msra.mxu1 %v4424_v29 }
 0x74a   : > { %v4270_v50 = vpop.f32.mrf.mxu3 }
 0x74b   : > { %v4271_v39 = vadd.f32 %v4270_v50, %v3773_v20 }
 0x74d   : > { %4484 = vmatpush.bf16.msra.mxu1 %v8177_v58  ;;  %v4379_v26 = vmax.f32 %v4271_v39, 0.0  ;;  %v3858_v39 = vpop.permute.xlu1 %3857 }
 0x751   : > { %4485 = vmatpush.bf16.msra.mxu1 %v8169_v54  ;;  %v5642_v54 = vld [vmem:[%s8363_s2 + $0x3d8] sm:$0xff] }
 0x752   : > { %v4272_v14 = vpop.f32.mrf.mxu3 }
 0x753   : > { %v4273_v43 = vadd.f32 %v4272_v14, %v3778_v40 }
 0x755   : > { %v4380_v19 = vmax.f32 %v4273_v43, 0.0  ;;  %4486 = vmatpush.bf16.msra.mxu1 %v8161_v34 }
 0x757   : > { %5480 = vmatmul.msk.bf16.gmra.mxu3 %vm930_vm0, %v5641_v45  ;;  %v8234_v29 = vpack.c.bf16 %v4380_v19, %v4379_v26  ;;  %v8713_v26 = vld [vmem:[#allocation22_spill] sm:$0xff] }
 0x75a   : > { %v4275_v55 = vpop.f32.mrf.mxu3 }
 0x75b   : > { %v4276_v58 = vadd.f32 %v4275_v55, %v3783_v47  ;;  %v5643_v47 = vld [vmem:[%s8363_s2 + $0x3e0] sm:$0xff] }
 0x75d   : > { %v4381_v40 = vmax.f32 %v4276_v58, 0.0 }
 0x762   : > { %v4277_v11 = vpop.f32.mrf.mxu3 }
 0x763   : > { %v4278_v4 = vadd.f32 %v4277_v11, %v3788_v52  ;;  %v8714_v11 = vld [vmem:[#allocation7_spill] sm:$0xff] }
 0x765   : > { %v4382_v33 = vmax.f32 %v4278_v4, 0.0 }
 0x767   : > { %5481 = vmatmul.msk.bf16.gmra.mxu3 %vm930_vm0, %v5642_v54  ;;  %v4431_v37 = vpack.c.bf16 %v4382_v33, %v4381_v40  ;;  %v8715_v33 = vld [vmem:[#allocation44_spill] sm:$0xff] }
 0x76a   : > { %v4280_v60 = vpop.f32.mrf.mxu3 }
 0x76b   : > { %v4281_v34 = vadd.f32 %v4280_v60, %v8191_v46 }
 0x76d   : > { %v4383_v56 = vmax.f32 %v4281_v34, 0.0 }
 0x772   : > { %v4282_v31 = vpop.f32.mrf.mxu3 }
 0x773   : > { %v4283_v30 = vadd.f32 %v4282_v31, %v8708_v13 }
 0x775   : > { %v4384_v48 = vmax.f32 %v4283_v30, 0.0  ;;  %v3843_v30 = vpop.permute.xlu1 %3842 }
 0x777   : > { %5482 = vmatmul.msk.bf16.gmra.mxu3 %vm930_vm0, %v5643_v47  ;;  %v4432_v5 = vpack.c.bf16 %v4384_v48, %v4383_v56  ;;  %v3848_v56 = vpop.permute.xlu2 %3847 }
 0x77a   : > { %v4285_v44 = vpop.f32.mrf.mxu3 }
 0x77b   : > { %v4286_v60 = vadd.f32 %v4285_v44, %v8715_v33 }
 0x77d   : > { %v4385_v47 = vmax.f32 %v4286_v60, 0.0 }
 0x782   : > { %v4287_v10 = vpop.f32.mrf.mxu3 }
 0x783   : > { %v4288_v4 = vadd.f32 %v4287_v10, %v8714_v11 }
 0x785   : > { %v4386_v31 = vmax.f32 %v4288_v4, 0.0  ;;  %v5496_v4 = vld [vmem:[%s8365_s4 + $0x38] sm:$0xf] }
 0x787   : > { %5483 = vmatmul.msk.bf16.gmra.mxu3 %vm930_vm0, %v5644_v59 }
 0x78a   : > { %v4290_v46 = vpop.f32.mrf.mxu3 }
 0x78b   : > { %v4291_v19 = vadd.f32 %v4290_v46, %v8713_v26  ;;  %v4433_v46 = vpack.c.bf16 %v4386_v31, %v4385_v47 }
 0x78d   : > { %v4387_v34 = vmax.f32 %v4291_v19, 0.0 }
 0x792   : > { %v4292_v18 = vpop.f32.mrf.mxu3 }
 0x793   : > { %v4293_v14 = vadd.f32 %v4292_v18, %v7750_v62 }
 0x795   : > { %v4388_v54 = vmax.f32 %v4293_v14, 0.0 }
 0x797   : > { %5484 = vmatmul.msk.bf16.gmra.mxu3 %vm930_vm0, %v5645_v27  ;;  %v4434_v13 = vpack.c.bf16 %v4388_v54, %v4387_v34  ;;  %v5650_v54 = vld [vmem:[%s8365_s4 + $0x74] sm:$0xf0]  ;;  %v8717_v34 = vld [vmem:[#allocation21_spill] sm:$0xff] }
 0x79a   : > { %v4295_v2 = vpop.f32.mrf.mxu3 }
 0x79b   : > { %v4296_v52 = vadd.f32 %v4295_v2, %v8712_v8  ;;  %v8716_v8 = vld [vmem:[#allocation83_spill] sm:$0xff] }
 0x79d   : > { %v4389_v55 = vmax.f32 %v4296_v52, 0.0 }
 0x7a2   : > { %v4297_v7 = vpop.f32.mrf.mxu3 }
 0x7a3   : > { %v4298_v15 = vadd.f32 %v4297_v7, %v8710_v63 }
 0x7a5   : > { %v4390_v43 = vmax.f32 %v4298_v15, 0.0 }
 0x7a7   : > { %5485 = vmatmul.msk.bf16.gmra.mxu3 %vm930_vm0, %v5646_v36  ;;  %v4435_v40 = vpack.c.bf16 %v4390_v43, %v4389_v55 }
 0x7aa   : > { %v4300_v28 = vpop.f32.mrf.mxu3 }
 0x7ab   : > { %v4301_v25 = vadd.f32 %v4300_v28, %v8709_v12 }
 0x7ad   : > { %v4391_v50 = vmax.f32 %v4301_v25, 0.0 }
 0x7b2   : > { %v4302_v24 = vpop.f32.mrf.mxu3 }
 0x7b3   : > { %v4303_v17 = vadd.f32 %v4302_v24, %v8711_v41 }
 0x7b5   : > { %v4392_v20 = vmax.f32 %v4303_v17, 0.0 }
 0x7b7   : > { %v4436_v45 = vpack.c.bf16 %v4392_v20, %v4391_v50 }
 0x7b9   : > { %4493 = vmatpush.bf16.msrb.mxu0 %v4436_v45 }
 0x7ba   : > { %v4305_v58 = vpop.f32.mrf.mxu3 }
 0x7bb   : > { %v4306_v62 = vadd.f32 %v4305_v58, %v3843_v30  ;;  %v5490_v58 = vld [vmem:[%s8365_s4 + $0x70] sm:$0xf0]  ;;  %v8718_v30 = vld [vmem:[#allocation12_spill] sm:$0xff] }
 0x7bd   : > { %4494 = vmatpush.bf16.msrb.mxu0 %v4435_v40  ;;  %v4393_v18 = vmax.f32 %v4306_v62, 0.0  ;;  %v5497_v40 = vor.u32 %v5650_v54, %v5496_v4  ;;  %v8719_v62 = vld [vmem:[#allocation10_spill] sm:$0xff] }
 0x7c1   : > { %4495 = vmatpush.bf16.msrb.mxu0 %v4434_v13 }
 0x7c2   : > { %v4307_v48 = vpop.f32.mrf.mxu3 }
 0x7c3   : > { %v4308_v59 = vadd.f32 %v4307_v48, %v3848_v56  ;;  %v8720_v48 = vld [vmem:[#allocation15_spill] sm:$0xff] }
 0x7c5   : > { %v4394_v27 = vmax.f32 %v4308_v59, 0.0  ;;  %4496 = vmatpush.bf16.msrb.mxu0 %v4433_v46 }
 0x7c7   : > { %v8266_v10 = vpack.c.bf16 %v4394_v27, %v4393_v18  ;;  %v8721_v27 = vld [vmem:[#allocation41_spill] sm:$0xff] }
 0x7c9   : > { %4497 = vmatpush.bf16.msrb.mxu0 %v4432_v5 }
 0x7ca   : > { %v4310_v2 = vpop.f32.mrf.mxu3 }
 0x7cb   : > { %v4311_v44 = vadd.f32 %v4310_v2, %v8216_v49 }
 0x7cd   : > { %4498 = vmatpush.bf16.msrb.mxu0 %v4431_v37  ;;  %v4395_v28 = vmax.f32 %v4311_v44, 0.0 }
 0x7d1   : > { %4499 = vmatpush.bf16.msrb.mxu0 %v8234_v29 }
 0x7d2   : > { %v4312_v7 = vpop.f32.mrf.mxu3 }
 0x7d3   : > { %v4313_v36 = vadd.f32 %v4312_v7, %v3858_v39 }
 0x7d5   : > { %v4396_v12 = vmax.f32 %v4313_v36, 0.0  ;;  %4500 = vmatpush.bf16.msrb.mxu0 %v8225_v38  ;;  %v4538_v36 = vld [vmem:[%s8362_s1 + $0x8] sm:$0xff] }
 0x7d7   : > { %v8271_v25 = vpack.c.bf16 %v4396_v12, %v4395_v28 }
 0x7d8   : > { %4501 = vmatmul.bf16.vlgmr.msrb.gmra.mxu0 %v5497_v40 }
 0x7da   : > { %v4315_v24 = vpop.f32.mrf.mxu3 }
 0x7db   : > { %v4316_v63 = vadd.f32 %v4315_v24, %v8203_v21  ;;  %v5488_v21 = vld [vmem:[%s8365_s4 + $0x30] sm:$0xf]  ;;  %v5730_v24 = vmov 1  }
 0x7dc   : > { %5688 = vset.pattern.permute.xlu0 %v5730_v24  ;;  %5687 = vset.pattern.permute.xlu2 %v5730_v24 }
 0x7dd   : > { %v4397_v41 = vmax.f32 %v4316_v63, 0.0  ;;  %4556 = vperm.xlu0 %5688, %v4538_v36  }
 0x7e2   : > { %v4317_v15 = vpop.f32.mrf.mxu3 }
 0x7e3   : > { %v4318_v5 = vadd.f32 %v4317_v15, %v8205_v0  ;;  %v5649_v0 = vld [vmem:[%s8365_s4 + $0x6c] sm:$0xf0] }
 0x7e4   : > { %v5489_v19 = vor.u32 %v5649_v0, %v5488_v21 }
 0x7e5   : > { %v4398_v37 = vmax.f32 %v4318_v5, 0.0 }
 0x7e6   : > { %4473 = vmatmul.bf16.vlgmr.msra.gmra.mxu3 %v5489_v19 }
 0x7e7   : > { %v4439_v17 = vpack.c.bf16 %v4398_v37, %v4397_v41  ;;  %v5702_v41 = vld [vmem:[%s8362_s1] sm:$0xff] }
 0x7e8   : > { %4552 = vperm.xlu2 %5687, %v5702_v41   ;;  %v8722_v37 = vld [vmem:[#allocation4_spill] sm:$0xff] }
 0x7ea   : > { %v4320_v49 = vpop.f32.mrf.mxu3 }
 0x7eb   : > { %v4321_v29 = vadd.f32 %v4320_v49, %v8716_v8 }
 0x7ed   : > { %v4399_v20 = vmax.f32 %v4321_v29, 0.0 }
 0x7f2   : > { %v4322_v52 = vpop.f32.mrf.mxu3 }
 0x7f3   : > { %v4323_v50 = vadd.f32 %v4322_v52, %v8197_v42  ;;  %v5647_v42 = vld [vmem:[%s8365_s4 + $0x34] sm:$0xf] }
 0x7f4   : > { %v5493_v11 = vor.u32 %v5647_v42, %v5490_v58 }
 0x7f5   : > { %v4400_v39 = vmax.f32 %v4323_v50, 0.0 }
 0x7f6   : > { %4487 = vmatmul.bf16.vlgmr.msra.gmra.mxu1 %v5493_v11 }
 0x7f7   : > { %v4440_v38 = vpack.c.bf16 %v4400_v39, %v4399_v20  ;;  %v8723_v20 = vmov 0   ;;  %v5498_v39 = vld [vmem:[%s8365_s4 + $0x78] sm:$0xf0] }
 0x7f8   : > { %5689 = vset.pattern.permute.xlu2 %v8723_v20 }
 0x7f9   : > { %4546 = vperm.xlu2 %5689, %v4538_v36  }
 0x7fa   : > { %v4325_v14 = vpop.f32.mrf.mxu3 }
 0x7fb   : > { %v4326_v49 = vadd.f32 %v4325_v14, %v8722_v37 }
 0x7fd   : > { %v4401_v52 = vmax.f32 %v4326_v49, 0.0 }
 0x802   : > { %v4327_v43 = vpop.f32.mrf.mxu3 }
 0x803   : > { %v4328_v63 = vadd.f32 %v4327_v43, %v8188_v1  ;;  %v5648_v1 = vld [vmem:[%s8365_s4 + $0x3c] sm:$0xf] }
 0x804   : > { %v5501_v14 = vor.u32 %v5648_v1, %v5498_v39 }
 0x80a   : > { %v4330_v45 = vpop.f32.mrf.mxu3 }
 0x80b   : > { %v4331_v28 = vadd.f32 %v4330_v45, %v7756_v53  ;;  %v4402_v53 = vmax.f32 %v4328_v63, 0.0  ;;  %v8724_v45 = vld [vmem:[#allocation11_spill] sm:$0xff] }
 0x80d   : > { %v4403_v8 = vmax.f32 %v4331_v28, 0.0  ;;  %v4441_v50 = vpack.c.bf16 %v4402_v53, %v4401_v52 }
 0x812   : > { %v4332_v26 = vpop.f32.mrf.mxu3 }
 0x813   : > { %v4333_v2 = vadd.f32 %v4332_v26, %v8721_v27  ;;  %v2315_v26 = vadd.f32 %v7904_v3, %v8724_v45  ;;  %v4528_v3 = vpop.permute.xlu0 %4527 }
 0x815   : > { %v4404_v15 = vmax.f32 %v4333_v2, 0.0 }
 0x817   : > { %v4442_v29 = vpack.c.bf16 %v4404_v15, %v4403_v8 }
 0x81a   : > { %v4335_v55 = vpop.f32.mrf.mxu3 }
 0x81b   : > { %v4336_v59 = vadd.f32 %v4335_v55, %v8720_v48  ;;  %v3425_v55 = vpop.f32.mrf.mxu2 }
 0x81c   : > { %v3440_v58 = vadd.f32 %v8123_v35, %v3425_v55 }
 0x81d   : > { %v4405_v12 = vmax.f32 %v4336_v59, 0.0 }
 0x822   : > { %v4337_v33 = vpop.f32.mrf.mxu3 }
 0x823   : > { %v4338_v47 = vadd.f32 %v4337_v33, %v8718_v30  ;;  %v3454_v33 = vadd.f32 %v8141_v22, %v3440_v58 }
 0x825   : > { %v4406_v44 = vmax.f32 %v4338_v47, 0.0 }
 0x827   : > { %v4443_v5 = vpack.c.bf16 %v4406_v44, %v4405_v12 }
 0x82a   : > { %v4340_v60 = vpop.f32.mrf.mxu3 }
 0x82b   : > { %v4341_v31 = vadd.f32 %v4340_v60, %v8717_v34 }
 0x82d   : > { %v4407_v46 = vmax.f32 %v4341_v31, 0.0 }
 0x832   : > { %v4342_v13 = vpop.f32.mrf.mxu3 }
 0x833   : > { %v4343_v56 = vadd.f32 %v4342_v13, %v8719_v62 }
 0x835   : > { %v4408_v18 = vmax.f32 %v4343_v56, 0.0 }
 0x837   : > { %v4444_v7 = vpack.c.bf16 %v4408_v18, %v4407_v46 }
 0x839   : > { %4507 = vmatpush.bf16.msrb.mxu1 %v4444_v7 }
 0x83d   : > { %4508 = vmatpush.bf16.msrb.mxu1 %v4443_v5 }
 0x841   : > { %4509 = vmatpush.bf16.msrb.mxu1 %v4442_v29 }
 0x842   : > { %v4553_v34 = vpop.permute.xlu2 %4552 }
 0x845   : > { %4510 = vmatpush.bf16.msrb.mxu1 %v4441_v50 }
 0x849   : > { %4511 = vmatpush.bf16.msrb.mxu1 %v4440_v38 }
 0x84d   : > { %4512 = vmatpush.bf16.msrb.mxu1 %v4439_v17 }
 0x84f   : > { %v4557_v48 = vpop.permute.xlu0 %4556 }
 0x851   : > { %4513 = vmatpush.bf16.msrb.mxu1 %v8271_v25  ;;  %v2329_v25 = vadd.f32 %v7847_v51, %v2315_v26 }
 0x853   : > { %v2343_v0 = vadd.f32 %v7916_v9, %v2329_v25 }
 0x855   : > { %4514 = vmatpush.bf16.msrb.mxu1 %v8266_v10  ;;  %v4502_v21 = vpop.f32.mrf.mxu0  ;;  %v2377_v42 = vadd.f32 %v7867_v57, %v2343_v0  ;;  %v3468_v57 = vadd.f32 %v8150_v6, %v3454_v33 }
 0x857   : > { %v2391_v54 = vadd.f32 %v7923_v16, %v2377_v42 }
 0x858   : > { %4515 = vmatmul.bf16.vlgmr.msrb.gmra.mxu1 %v5501_v14 }
 0x859   : > { %v2405_v31 = vadd.f32 %v7874_v61, %v2391_v54  ;;  %v4547_v61 = vpop.permute.xlu2 %4546 }
 0x85b   : > { %v2419_v35 = vadd.f32 %v8117_v32, %v2405_v31 }
 0x85d   : > { %v4504_v9 = vpop.f32.mrf.mxu0  ;;  %v3471_v16 = vadd.f32 %v3468_v57, %v2419_v35 }
 0x869   : > { %v4474_v38 = vpop.f32.mrf.mxu3 }
 0x871   : > { %v4476_v4 = vpop.f32.mrf.mxu3 }
 0x873   : > { %v4488_v43 = vpop.f32.mrf.mxu1 }
 0x874   : > { %v4489_v19 = vadd.f32 %v4488_v43, %v4474_v38 }
 0x876   : > { %v4503_v11 = vadd.f32 %v4502_v21, %v4489_v19 }
 0x87b   : > { %v4490_v17 = vpop.f32.mrf.mxu1 }
 0x87c   : > { %v4491_v60 = vadd.f32 %v4490_v17, %v4476_v4 }
 0x87e   : > { %v4505_v47 = vadd.f32 %v4504_v9, %v4491_v60 }
 0x8d5   : > { %v4516_v10 = vpop.f32.mrf.mxu1 }
 0x8d6   : > { %v4517_v40 = vadd.f32 %v4516_v10, %v4503_v11 }
 0x8d8   : > { %v4521_v51 = vadd.f32 %v4517_v40, %v8148_v23  ;;  %v4533_v23 = vpop.permute.xlu1 %4532 }
 0x8da   : > { %v4535_v13 = vadd.f32 %v4528_v3, %v4521_v51 }
 0x8dc   : > { %v4559_v30 = vmul.f32 %v4553_v34, %v4535_v13 }
 0x8dd   : > { %v4518_v62 = vpop.f32.mrf.mxu1 }
 0x8de   : > { %v4519_v56 = vadd.f32 %v4518_v62, %v4505_v47  ;;  %4563 = vrot.lane.b32.xlu1 %v4559_v30, %s5731_s8  ;;  %v5703_v62 = vld [vmem:[%s5822_s19] sm:$0xff] }
 0x8e0   : > { %v4522_v22 = vadd.f32 %v4519_v56, %v3471_v16  ;;  %v4542_v2 = vpop.permute.xlu1 %4541 }
 0x8e1   : > { %v4549_v44 = vmul.f32 %v4542_v2, %v4535_v13 }
 0x8e2   : > { %v4536_v59 = vadd.f32 %v4533_v23, %v4522_v22  ;;  %v5704_v22 = vld [vmem:[%s5822_s19 + $0x8] sm:$0xff] }
 0x8e4   : > { %v4560_v46 = vmul.f32 %v4557_v48, %v4536_v59  ;;  %v4550_v6 = vmul.f32 %v4547_v61, %v4536_v59 }
 0x8e6   : > { %4565 = vrot.lane.b32.xlu2 %v4560_v46, %s5731_s8 }
 0x940   : > { %v4566_v18 = vpop.permute.xlu2 %4565 }
 0x941   : > { %v4570_v27 = vmax.f32 %v4550_v6, %v4566_v18 }
 0x943   : > { %v4572_v32 = vsub.f32 %v4550_v6, %v4570_v27  ;;  %4581 = vrot.lane.b32.xlu1 %v4570_v27, %s5732_s9 }
 0x945   : > { %v4575_v53 = vmul.f32 1.442695, %v4572_v32 }
 0x950   : > { %v4564_v7 = vpop.permute.xlu1 %4563 }
 0x951   : > { %v4569_v36 = vmax.f32 %v4549_v44, %v4564_v7 }
 0x953   : > { %v4571_v28 = vsub.f32 %v4549_v44, %v4569_v36  ;;  %4579 = vrot.lane.b32.xlu0 %v4569_v36, %s5732_s9 }
 0x955   : > { %v4573_v8 = vmul.f32 1.442695, %v4571_v28 }
 0x9b5   : > { %v4582_v12 = vpop.permute.xlu1 %4581 }
 0x9b6   : > { %v4586_v24 = vsub.f32 %v4560_v46, %v4582_v12 }
 0x9b8   : > { %v4589_v63 = vmul.f32 1.442695, %v4586_v24 }
 0x9ba   : > { %5690 = vpow2.f32 %v4589_v63 }
 0x9c0   : > { %v5691_v15 = vpop.eup %5690 }
 0x9c1   : > { %4595 = vrot.lane.b32.xlu0 %v5691_v15, %s5731_s8 }
 0x9c5   : > { %v4580_v5 = vpop.permute.xlu0 %4579 }
 0x9c6   : > { %v4585_v41 = vsub.f32 %v4559_v30, %v4580_v5 }
 0x9c8   : > { %v4587_v37 = vmul.f32 1.442695, %v4585_v41 }
 0x9ca   : > { %5692 = vpow2.f32 %v4587_v37 }
 0x9cb   : > { %5694 = vpow2.f32 %v4573_v8 }
 0x9cc   : > { %5696 = vpow2.f32 %v4575_v53 }
 0x9d0   : > { %v5693_v49 = vpop.eup %5692 }
 0x9d1   : > { %4593 = vrot.lane.b32.xlu2 %v5693_v49, %s5731_s8  ;;  %v5695_v29 = vpop.eup %5694 }
 0x9d2   : > { %v5697_v20 = vpop.eup %5696 }
 0xa2b   : > { %v4594_v52 = vpop.permute.xlu2 %4593 }
 0xa2c   : > { %v4599_v50 = vadd.f32 %v5695_v29, %v4594_v52 }
 0xa2e   : > { %5698 = vrcp.f32 %v4599_v50 }
 0xa33   : > { %v4596_v1 = vpop.permute.xlu0 %4595 }
 0xa34   : > { %v5699_v39 = vpop.eup %5698  ;;  %v4600_v14 = vadd.f32 %v5697_v20, %v4596_v1 }
 0xa35   : > { %v4603_v43 = vmul.f32 %v5699_v39, %v5695_v29  ;;  %4617 = vrot.lane.b32.xlu1 %v5699_v39, %s5732_s9 }
 0xa36   : > { %5700 = vrcp.f32 %v4600_v14 }
 0xa37   : > { %v4606_v38 = vsel %vm4605_vm1, %v4603_v43, 0.0 }
 0xa3c   : > { %v5701_v45 = vpop.eup %5700 }
 0xa3d   : > { %v4604_v26 = vmul.f32 %v5701_v45, %v5697_v20  ;;  %4619 = vrot.lane.b32.xlu2 %v5701_v45, %s5732_s9 }
 0xa3f   : > { %v4607_v17 = vsel %vm4605_vm1, %v4604_v26, 0.0 }
 0xa40   : > { %v4608_v25 = vadd.f32 %v4607_v17, %v4606_v38 }
 0xa42   : > { %v4609_v51 = vrot.slane %v4608_v25, 4 }
 0xa44   : > { %v4610_v60 = vadd.f32 %v4609_v51, %v4608_v25 }
 0xa46   : > { %v4611_v34 = vrot.slane %v4610_v60, 2 }
 0xa48   : > { %v4612_v9 = vadd.f32 %v4611_v34, %v4610_v60 }
 0xa4a   : > { %v4613_v31 = vrot.slane %v4612_v9, 1 }
 0xa4c   : > { %v4614_v57 = vadd.f32 %v4613_v31, %v4612_v9 }
 0xa97   : > { %v4620_v21 = vpop.permute.xlu2 %4619 }
 0xa98   : > { %v4624_v0 = vmul.f32 %v5691_v15, %v4620_v21 }
 0xa9a   : > { %v4627_v42 = vsel %vm4625_vm2, %v4624_v0, 0.0 }
 0xaa7   : > { %v4618_v19 = vpop.permute.xlu1 %4617 }
 0xaa8   : > { %v4623_v55 = vmul.f32 %v5693_v49, %v4618_v19 }
 0xaaa   : > { %v4626_v58 = vsel %vm4625_vm2, %v4623_v55, 0.0 }
 0xaab   : > { %v4628_v11 = vadd.f32 %v4627_v42, %v4626_v58 }
 0xaad   : > { %v4629_v10 = vrot.slane %v4628_v11, 4 }
 0xaaf   : > { %v4630_v4 = vadd.f32 %v4629_v10, %v4628_v11 }
 0xab1   : > { %v4631_v54 = vrot.slane %v4630_v4, 2 }
 0xab3   : > { %v4632_v40 = vadd.f32 %v4631_v54, %v4630_v4 }
 0xab5   : > { %v4633_v3 = vrot.slane %v4632_v40, 1 }
 0xab7   : > { %v4634_v33 = vadd.f32 %v4633_v3, %v4632_v40 }
 0xab9   : > { %4636 = vrot.lane.b32.xlu0 %v4634_v33, %s5731_s8 }
 0xb2b   : > { %v4637_v13 = vpop.permute.xlu0 %4636 }
 0xb2c   : > { %v4640_v35 = vsel %vm4639_vm3, %v4614_v57, %v4637_v13 }
 0xb2d   : > { %4641 = vxpose.xlu1.b32.start.end [1/1] (short) (narrow) %v4640_v35, 8 }
 0xbd1   : > { %v4657_v30 = vpop.trf.xlu1 }
 0xbd2   : > { %4681 = vperm.xlu0 %5688, %v4657_v30   ;;  %4675 = vperm.xlu2 %5689, %v4657_v30  }
 0xc2c   : > { %v4676_v47 = vpop.permute.xlu2 %4675 }
 0xc2d   : > { %v4678_v16 = vmul.f32 %v5703_v62, %v4676_v47 }
 0xc2f   : > { %4679 = vst.msk [vmem:[%s284_s10] sm:$0xff] %vm930_vm0, %v4678_v16 }
 0xc36   : > { %v4726_v48 = vld [vmem:[%s284_s10] sm:$0xff] (%p5798_p5) }
 0xc37   : > { %4727 = vst [vmem:[%s4695_s14] sm:$0xff] (%p5798_p5), %v4726_v48 }
 0xc43   : > { %4693 = sbr.rel (!%p5798_p5) target bundleno = 3152 (0xc50), region = 86 }
 0xc44   : > { %v4682_v56 = vpop.permute.xlu0 %4681 }
 0xc45   : > { %v4684_v23 = vmul.f32 %v5704_v22, %v4682_v56 }
 0xc47   : > { %5502 = vst.msk [vmem:[%s284_s10 + $0x8] sm:$0xff] %vm930_vm0, %v4684_v23 }
 0xc4e   : > { %v4728_v59 = vld [vmem:[%s284_s10 + $0x8] sm:$0xff] }
 0xc4f   : > { %4729 = vst [vmem:[%s4695_s14 + $0x28] sm:$0xff] %v4728_v59 }
 0xc50 PF: > { %p13_p10 = scmp.ge.s32.totalorder %s5785_s25, 7   ;;  %s8725_s21 = smov %s5723_s22 }
 0xc51   : > { %s8726_s22 = smov %s5796_s28  ;;  %s8727_s23 = smov %s5785_s25 }
 0xc52   :  { %15 = sbr.rel (!%p13_p10) target bundleno = 2 (0x2), region = 156 }

</bundles_post_ra>
